<compile_context>
chip_gen: v6e
topology: v6e:2x2x1
jax: 0.10.0
libtpu: 0.0.40
codegen_flags: <defaults>
</compile_context>

<pallas_src>
import math

import jax
import jax.numpy as jnp
from jax import lax  # noqa: F401  (kept for parity with common kernel imports)
from jax.experimental import pallas as pl
from jax.experimental.pallas import tpu as pltpu


_VMEM = pl.BlockSpec(memory_space=pltpu.MemorySpace.VMEM)
_SUBLANE = 8  # f32 sublane count


# ----------------------------------------------------------------------------
# Fused Pallas kernel: all GRU layers + Linear + softmax in one call
# ----------------------------------------------------------------------------
def _make_fused_gru_kernel(num_layers, seq_len, batch_pad, hidden, out_dim):
    L, T, Bp, H, O = num_layers, seq_len, batch_pad, hidden, out_dim

    def kernel(*refs):
        # inputs
        x_ref = refs[0]                           # (T*Bp, Cin)   time-major rows t*Bp+b
        layer_refs = refs[1:1 + 4 * L]            # per layer: w_ih(3,Cin,H) w_hh(3,H,H)
        #                                           b_ih(3,1,H) b_hh(3,1,H)
        lin_w_ref = refs[1 + 4 * L]               # (H, O)
        lin_b_ref = refs[2 + 4 * L]               # (1, O)
        # output
        out_ref = refs[3 + 4 * L]                 # (Bp, O)
        # scratch
        seq_refs = refs[4 + 4 * L:6 + 4 * L]      # 2 x (T*Bp, H)  inter-layer ping/pong
        gi_r_ref, gi_z_ref, gi_n_ref = refs[6 + 4 * L:9 + 4 * L]   # (T*Bp, H) each
        h_ref = refs[9 + 4 * L]                   # (Bp, H) hidden state

        for layer in range(L):
            w_ih_ref, w_hh_ref, b_ih_ref, b_hh_ref = (
                layer_refs[4 * layer:4 * layer + 4])

            if layer == 0:
                x2d = x_ref[...]                                  # (T*Bp, Cin)
            else:
                x2d = seq_refs[(layer - 1) % 2][...]              # (T*Bp, H)

            # --- Hoisted input projection: one big GEMM per gate, all timesteps ---
            gi_r_ref[...] = (jnp.dot(x2d, w_ih_ref[0],
                                     preferred_element_type=jnp.float32)
                             + b_ih_ref[0])
            gi_z_ref[...] = (jnp.dot(x2d, w_ih_ref[1],
                                     preferred_element_type=jnp.float32)
                             + b_ih_ref[1])
            gi_n_ref[...] = (jnp.dot(x2d, w_ih_ref[2],
                                     preferred_element_type=jnp.float32)
                             + b_ih_ref[2])

            # recurrent weights / biases (loaded once per layer)
            w_hr = w_hh_ref[0]
            w_hz = w_hh_ref[1]
            w_hn = w_hh_ref[2]
            b_hr = b_hh_ref[0]
            b_hz = b_hh_ref[1]
            b_hn = b_hh_ref[2]

            h_ref[...] = jnp.zeros((Bp, H), jnp.float32)          # h0 = zeros (as in module)
            last_layer = layer == L - 1
            out_seq_ref = seq_refs[layer % 2]

            # --- Recurrence: fully unrolled, static slice offsets ---
            for t in range(T):
                row = t * Bp
                h = h_ref[...]
                gr = (gi_r_ref[pl.ds(row, Bp), :]
                      + jnp.dot(h, w_hr, preferred_element_type=jnp.float32)
                      + b_hr)
                gz = (gi_z_ref[pl.ds(row, Bp), :]
                      + jnp.dot(h, w_hz, preferred_element_type=jnp.float32)
                      + b_hz)
                hn = (jnp.dot(h, w_hn, preferred_element_type=jnp.float32)
                      + b_hn)
                r = jax.nn.sigmoid(gr)
                z = jax.nn.sigmoid(gz)
                n = jnp.tanh(gi_n_ref[pl.ds(row, Bp), :] + r * hn)
                h_new = (1.0 - z) * n + z * h
                h_ref[...] = h_new
                if not last_layer:                # last layer: only final h is needed
                    out_seq_ref[pl.ds(row, Bp), :] = h_new

        # --- Head: Linear + softmax on the last hidden state ---
        logits = (jnp.dot(h_ref[...], lin_w_ref[...],
                          preferred_element_type=jnp.float32)
                  + lin_b_ref[...])
        m = jnp.max(logits, axis=-1, keepdims=True)
        e = jnp.exp(logits - m)
        out_ref[...] = (e / jnp.sum(e, axis=-1, keepdims=True)).astype(out_ref.dtype)

    return kernel


# ----------------------------------------------------------------------------
# Wrapper (batch_first interface, like the PyTorch module)
# ----------------------------------------------------------------------------
def gru_forward(x, params, times=None, interpolation_method=None):
    """x: (B, T, Cin) batch-first.  Returns (B, O) softmax probabilities."""
    del times, interpolation_method        # unused by the reference forward
    B, T, Cin = x.shape
    L = len(params["gru"])
    H = params["gru"][0]["w_hh"].shape[-1]
    O = params["linear_w"].shape[-1]
    Bp = max(_SUBLANE, ((B + _SUBLANE - 1) // _SUBLANE) * _SUBLANE)

    # time-major, batch padded to the sublane size, flattened to 2D rows t*Bp+b
    x_tm = jnp.transpose(x, (1, 0, 2)).astype(jnp.float32)        # (T, B, Cin)
    if Bp != B:
        x_tm = jnp.pad(x_tm, ((0, 0), (0, Bp - B), (0, 0)))
    x2d = x_tm.reshape(T * Bp, Cin)

    args = [x2d]
    for layer in params["gru"]:
        args += [layer["w_ih"], layer["w_hh"], layer["b_ih"], layer["b_hh"]]
    args += [params["linear_w"], params["linear_b"]]

    # advisory cost estimate
    flops = 2 * Bp * H * O + 5 * Bp * O
    trans = Bp * O
    for layer in params["gru"]:
        cin_l = int(layer["w_ih"].shape[1])
        flops += 2 * T * Bp * cin_l * 3 * H + 2 * T * Bp * H * 3 * H + 12 * T * Bp * H
        trans += 3 * T * Bp * H
    bytes_accessed = sum(int(a.size) * int(a.dtype.itemsize) for a in args) + Bp * O * 4

    out = pl.pallas_call(
        _make_fused_gru_kernel(L, T, Bp, H, O),
        out_shape=jax.ShapeDtypeStruct((Bp, O), jnp.float32),
        in_specs=[_VMEM] * len(args),
        out_specs=_VMEM,
        scratch_shapes=[
            pltpu.VMEM((T * Bp, H), jnp.float32),   # inter-layer sequence (ping)
            pltpu.VMEM((T * Bp, H), jnp.float32),   # inter-layer sequence (pong)
            pltpu.VMEM((T * Bp, H), jnp.float32),   # hoisted input-proj, r gate
            pltpu.VMEM((T * Bp, H), jnp.float32),   # hoisted input-proj, z gate
            pltpu.VMEM((T * Bp, H), jnp.float32),   # hoisted input-proj, n gate
            pltpu.VMEM((Bp, H), jnp.float32),       # hidden state h
        ],
        cost_estimate=pl.CostEstimate(flops=int(flops), transcendentals=int(trans),
                                      bytes_accessed=int(bytes_accessed)),
    )(*args)
    return out[:B]
    # TODO(synk): for very long T / large B*H, add a T-chunk grid (carry h across
    # chunks) and cap vmem_limit_bytes for v7x's smaller VMEM; unnecessary here.


# ----------------------------------------------------------------------------
# Deterministic parameter init (PyTorch nn.GRU-style uniform(-1/sqrt(H), 1/sqrt(H)))
# Packed per-gate (r, z, n) and pre-transposed for x @ W.
# ----------------------------------------------------------------------------
def init_params(key, input_channels, hidden_channels, num_layers, output_channels):
    H = hidden_channels
    k = 1.0 / math.sqrt(H)
    params = {"gru": []}
    for layer in range(num_layers):
        cin = input_channels if layer == 0 else H
        key, k1, k2, k3, k4 = jax.random.split(key, 5)
        w_ih = jax.random.uniform(k1, (3 * H, cin), jnp.float32, -k, k)   # torch layout
        w_hh = jax.random.uniform(k2, (3 * H, H), jnp.float32, -k, k)
        b_ih = jax.random.uniform(k3, (3 * H,), jnp.float32, -k, k)
        b_hh = jax.random.uniform(k4, (3 * H,), jnp.float32, -k, k)
        w_ih_g = jnp.stack([w_ih[g * H:(g + 1) * H, :].T for g in range(3)])       # (3,cin,H)
        w_hh_g = jnp.stack([w_hh[g * H:(g + 1) * H, :].T for g in range(3)])       # (3,H,H)
        b_ih_g = jnp.stack([b_ih[g * H:(g + 1) * H].reshape(1, H) for g in range(3)])
        b_hh_g = jnp.stack([b_hh[g * H:(g + 1) * H].reshape(1, H) for g in range(3)])
        params["gru"].append(
            {"w_ih": w_ih_g, "w_hh": w_hh_g, "b_ih": b_ih_g, "b_hh": b_hh_g})
    key, k1, k2 = jax.random.split(key, 3)
    lin_w = jax.random.uniform(k1, (output_channels, H), jnp.float32, -k, k)
    lin_b = jax.random.uniform(k2, (output_channels,), jnp.float32, -k, k)
    params["linear_w"] = lin_w.T                      # (H, O)
    params["linear_b"] = lin_b.reshape(1, output_channels)
    return params


# ----------------------------------------------------------------------------
# Pure-JAX reference (PyTorch GRU semantics) for correctness check
# ----------------------------------------------------------------------------
def gru_forward_ref(x, params):
    x_tm = jnp.transpose(x, (1, 0, 2)).astype(jnp.float32)
    T, B, _ = x_tm.shape
    for layer in params["gru"]:
        H = layer["w_hh"].shape[-1]
        h = jnp.zeros((B, H), jnp.float32)
        outs = []
        for t in range(T):
            x_t = x_tm[t]
            r = jax.nn.sigmoid(x_t @ layer["w_ih"][0] + layer["b_ih"][0]
                               + h @ layer["w_hh"][0] + layer["b_hh"][0])
            z = jax.nn.sigmoid(x_t @ layer["w_ih"][1] + layer["b_ih"][1]
                               + h @ layer["w_hh"][1] + layer["b_hh"][1])
            n = jnp.tanh(x_t @ layer["w_ih"][2] + layer["b_ih"][2]
                         + r * (h @ layer["w_hh"][2] + layer["b_hh"][2]))
            h = (1.0 - z) * n + z * h
            outs.append(h)
        x_tm = jnp.stack(outs, axis=0)
    logits = x_tm[-1] @ params["linear_w"] + params["linear_b"]
    return jax.nn.softmax(logits, axis=-1)


# ----------------------------------------------------------------------------
if __name__ == "__main__":
    B, T = 2, 8
    input_channels, hidden_channels, num_layers, output_channels = 4, 32, 2, 6

    key = jax.random.PRNGKey(0)
    key, kx = jax.random.split(key)
    x = jax.random.normal(kx, (B, T, input_channels), jnp.float32)
    times = jnp.arange(T, dtype=jnp.float32)           # unused by forward
    interpolation_method = "linear"                    # unused by forward

    params = init_params(key, input_channels, hidden_channels, num_layers,
                         output_channels)

    out = gru_forward(x, params, times, interpolation_method)
    out = jax.block_until_ready(out)

    ref = gru_forward_ref(x, params)
    assert out.shape == (B, output_channels)
    assert jnp.allclose(jnp.sum(out, axis=-1), 1.0, atol=1e-5)
    assert jnp.allclose(out, ref, atol=1e-3, rtol=1e-3)

    print("KERNEL_OK")
</pallas_src>

<mosaic_0001>
module attributes {stable_mosaic.version = 11 : i64} {
  func.func @kernel(%arg0: memref<64x4xf32, #tpu.memory_space<vmem>>, %arg1: memref<3x4x32xf32, #tpu.memory_space<vmem>>, %arg2: memref<3x32x32xf32, #tpu.memory_space<vmem>>, %arg3: memref<3x1x32xf32, #tpu.memory_space<vmem>>, %arg4: memref<3x1x32xf32, #tpu.memory_space<vmem>>, %arg5: memref<3x32x32xf32, #tpu.memory_space<vmem>>, %arg6: memref<3x32x32xf32, #tpu.memory_space<vmem>>, %arg7: memref<3x1x32xf32, #tpu.memory_space<vmem>>, %arg8: memref<3x1x32xf32, #tpu.memory_space<vmem>>, %arg9: memref<32x6xf32, #tpu.memory_space<vmem>>, %arg10: memref<1x6xf32, #tpu.memory_space<vmem>>, %arg11: memref<8x6xf32, #tpu.memory_space<vmem>>, %arg12: memref<64x32xf32, #tpu.memory_space<vmem>>, %arg13: memref<64x32xf32, #tpu.memory_space<vmem>>, %arg14: memref<64x32xf32, #tpu.memory_space<vmem>>, %arg15: memref<64x32xf32, #tpu.memory_space<vmem>>, %arg16: memref<64x32xf32, #tpu.memory_space<vmem>>, %arg17: memref<8x32xf32, #tpu.memory_space<vmem>>) attributes {dimension_semantics = [], scalar_prefetch = 0 : i64, scratch_operands = 6 : i64, tpu.core_type = #tpu.core_type<tc>} {
    %c0 = arith.constant 0 : index
    %c0_0 = arith.constant 0 : index
    %0 = vector.load %arg0[%c0, %c0_0] : memref<64x4xf32, #tpu.memory_space<vmem>>, vector<64x4xf32>
    %c0_1 = arith.constant 0 : index
    %c0_2 = arith.constant 0 : index
    %c0_3 = arith.constant 0 : index
    %1 = vector.load %arg1[%c0_1, %c0_2, %c0_3] : memref<3x4x32xf32, #tpu.memory_space<vmem>>, vector<1x4x32xf32>
    %2 = vector.shape_cast %1 : vector<1x4x32xf32> to vector<4x32xf32>
    %cst = arith.constant dense<0.000000e+00> : vector<64x32xf32>
    %3 = tpu.matmul %0, %2, %cst {dimension_numbers = #tpu.dot_dimension_numbers<[1], [0], [0], [1], [0, 0, 1, 1], [], []>} : vector<64x4xf32>, vector<4x32xf32>, vector<64x32xf32> -> vector<64x32xf32>
    %c0_4 = arith.constant 0 : index
    %c0_5 = arith.constant 0 : index
    %c0_6 = arith.constant 0 : index
    %4 = vector.load %arg3[%c0_4, %c0_5, %c0_6] : memref<3x1x32xf32, #tpu.memory_space<vmem>>, vector<1x1x32xf32>
    %5 = vector.shape_cast %4 : vector<1x1x32xf32> to vector<1x32xf32>
    %6 = vector.broadcast %5 : vector<1x32xf32> to vector<64x32xf32>
    %7 = arith.addf %3, %6 : vector<64x32xf32>
    %c0_7 = arith.constant 0 : index
    %c0_8 = arith.constant 0 : index
    %8 = vector.load %arg14[%c0_7, %c0_8] : memref<64x32xf32, #tpu.memory_space<vmem>>, vector<64x32xf32>
    tpu.vector_store %arg14[%c0_7, %c0_8], %7 {strides = array<i32>} : memref<64x32xf32, #tpu.memory_space<vmem>>, vector<64x32xf32>,
    %c1 = arith.constant 1 : index
    %c0_9 = arith.constant 0 : index
    %c0_10 = arith.constant 0 : index
    %9 = vector.load %arg1[%c1, %c0_9, %c0_10] : memref<3x4x32xf32, #tpu.memory_space<vmem>>, vector<1x4x32xf32>
    %10 = vector.shape_cast %9 : vector<1x4x32xf32> to vector<4x32xf32>
    %cst_11 = arith.constant dense<0.000000e+00> : vector<64x32xf32>
    %11 = tpu.matmul %0, %10, %cst_11 {dimension_numbers = #tpu.dot_dimension_numbers<[1], [0], [0], [1], [0, 0, 1, 1], [], []>} : vector<64x4xf32>, vector<4x32xf32>, vector<64x32xf32> -> vector<64x32xf32>
    %c1_12 = arith.constant 1 : index
    %c0_13 = arith.constant 0 : index
    %c0_14 = arith.constant 0 : index
    %12 = vector.load %arg3[%c1_12, %c0_13, %c0_14] : memref<3x1x32xf32, #tpu.memory_space<vmem>>, vector<1x1x32xf32>
    %13 = vector.shape_cast %12 : vector<1x1x32xf32> to vector<1x32xf32>
    %14 = vector.broadcast %13 : vector<1x32xf32> to vector<64x32xf32>
    %15 = arith.addf %11, %14 : vector<64x32xf32>
    %c0_15 = arith.constant 0 : index
    %c0_16 = arith.constant 0 : index
    %16 = vector.load %arg15[%c0_15, %c0_16] : memref<64x32xf32, #tpu.memory_space<vmem>>, vector<64x32xf32>
    tpu.vector_store %arg15[%c0_15, %c0_16], %15 {strides = array<i32>} : memref<64x32xf32, #tpu.memory_space<vmem>>, vector<64x32xf32>,
    %c2 = arith.constant 2 : index
    %c0_17 = arith.constant 0 : index
    %c0_18 = arith.constant 0 : index
    %17 = vector.load %arg1[%c2, %c0_17, %c0_18] : memref<3x4x32xf32, #tpu.memory_space<vmem>>, vector<1x4x32xf32>
    %18 = vector.shape_cast %17 : vector<1x4x32xf32> to vector<4x32xf32>
    %cst_19 = arith.constant dense<0.000000e+00> : vector<64x32xf32>
    %19 = tpu.matmul %0, %18, %cst_19 {dimension_numbers = #tpu.dot_dimension_numbers<[1], [0], [0], [1], [0, 0, 1, 1], [], []>} : vector<64x4xf32>, vector<4x32xf32>, vector<64x32xf32> -> vector<64x32xf32>
    %c2_20 = arith.constant 2 : index
    %c0_21 = arith.constant 0 : index
    %c0_22 = arith.constant 0 : index
    %20 = vector.load %arg3[%c2_20, %c0_21, %c0_22] : memref<3x1x32xf32, #tpu.memory_space<vmem>>, vector<1x1x32xf32>
    %21 = vector.shape_cast %20 : vector<1x1x32xf32> to vector<1x32xf32>
    %22 = vector.broadcast %21 : vector<1x32xf32> to vector<64x32xf32>
    %23 = arith.addf %19, %22 : vector<64x32xf32>
    %c0_23 = arith.constant 0 : index
    %c0_24 = arith.constant 0 : index
    %24 = vector.load %arg16[%c0_23, %c0_24] : memref<64x32xf32, #tpu.memory_space<vmem>>, vector<64x32xf32>
    tpu.vector_store %arg16[%c0_23, %c0_24], %23 {strides = array<i32>} : memref<64x32xf32, #tpu.memory_space<vmem>>, vector<64x32xf32>,
    %c0_25 = arith.constant 0 : index
    %c0_26 = arith.constant 0 : index
    %c0_27 = arith.constant 0 : index
    %25 = vector.load %arg2[%c0_25, %c0_26, %c0_27] : memref<3x32x32xf32, #tpu.memory_space<vmem>>, vector<1x32x32xf32>
    %26 = vector.shape_cast %25 : vector<1x32x32xf32> to vector<32x32xf32>
    %c1_28 = arith.constant 1 : index
    %c0_29 = arith.constant 0 : index
    %c0_30 = arith.constant 0 : index
    %27 = vector.load %arg2[%c1_28, %c0_29, %c0_30] : memref<3x32x32xf32, #tpu.memory_space<vmem>>, vector<1x32x32xf32>
    %28 = vector.shape_cast %27 : vector<1x32x32xf32> to vector<32x32xf32>
    %c2_31 = arith.constant 2 : index
    %c0_32 = arith.constant 0 : index
    %c0_33 = arith.constant 0 : index
    %29 = vector.load %arg2[%c2_31, %c0_32, %c0_33] : memref<3x32x32xf32, #tpu.memory_space<vmem>>, vector<1x32x32xf32>
    %30 = vector.shape_cast %29 : vector<1x32x32xf32> to vector<32x32xf32>
    %c0_34 = arith.constant 0 : index
    %c0_35 = arith.constant 0 : index
    %c0_36 = arith.constant 0 : index
    %31 = vector.load %arg4[%c0_34, %c0_35, %c0_36] : memref<3x1x32xf32, #tpu.memory_space<vmem>>, vector<1x1x32xf32>
    %32 = vector.shape_cast %31 : vector<1x1x32xf32> to vector<1x32xf32>
    %c1_37 = arith.constant 1 : index
    %c0_38 = arith.constant 0 : index
    %c0_39 = arith.constant 0 : index
    %33 = vector.load %arg4[%c1_37, %c0_38, %c0_39] : memref<3x1x32xf32, #tpu.memory_space<vmem>>, vector<1x1x32xf32>
    %34 = vector.shape_cast %33 : vector<1x1x32xf32> to vector<1x32xf32>
    %c2_40 = arith.constant 2 : index
    %c0_41 = arith.constant 0 : index
    %c0_42 = arith.constant 0 : index
    %35 = vector.load %arg4[%c2_40, %c0_41, %c0_42] : memref<3x1x32xf32, #tpu.memory_space<vmem>>, vector<1x1x32xf32>
    %36 = vector.shape_cast %35 : vector<1x1x32xf32> to vector<1x32xf32>
    %cst_43 = arith.constant 0.000000e+00 : f32
    %37 = vector.broadcast %cst_43 : f32 to vector<8x32xf32>
    %c0_44 = arith.constant 0 : index
    %c0_45 = arith.constant 0 : index
    %38 = vector.load %arg17[%c0_44, %c0_45] : memref<8x32xf32, #tpu.memory_space<vmem>>, vector<8x32xf32>
    tpu.vector_store %arg17[%c0_44, %c0_45], %37 {strides = array<i32>} : memref<8x32xf32, #tpu.memory_space<vmem>>, vector<8x32xf32>,
    %c0_46 = arith.constant 0 : index
    %c0_47 = arith.constant 0 : index
    %39 = vector.load %arg17[%c0_46, %c0_47] : memref<8x32xf32, #tpu.memory_space<vmem>>, vector<8x32xf32>
    %c0_48 = arith.constant 0 : index
    %c0_49 = arith.constant 0 : index
    %40 = vector.load %arg14[%c0_48, %c0_49] : memref<64x32xf32, #tpu.memory_space<vmem>>, vector<8x32xf32>
    %cst_50 = arith.constant dense<0.000000e+00> : vector<8x32xf32>
    %41 = tpu.matmul %39, %26, %cst_50 {dimension_numbers = #tpu.dot_dimension_numbers<[1], [0], [0], [1], [0, 0, 1, 1], [], []>} : vector<8x32xf32>, vector<32x32xf32>, vector<8x32xf32> -> vector<8x32xf32>
    %42 = arith.addf %40, %41 : vector<8x32xf32>
    %43 = vector.broadcast %32 : vector<1x32xf32> to vector<8x32xf32>
    %44 = arith.addf %42, %43 : vector<8x32xf32>
    %c0_51 = arith.constant 0 : index
    %c0_52 = arith.constant 0 : index
    %45 = vector.load %arg15[%c0_51, %c0_52] : memref<64x32xf32, #tpu.memory_space<vmem>>, vector<8x32xf32>
    %cst_53 = arith.constant dense<0.000000e+00> : vector<8x32xf32>
    %46 = tpu.matmul %39, %28, %cst_53 {dimension_numbers = #tpu.dot_dimension_numbers<[1], [0], [0], [1], [0, 0, 1, 1], [], []>} : vector<8x32xf32>, vector<32x32xf32>, vector<8x32xf32> -> vector<8x32xf32>
    %47 = arith.addf %45, %46 : vector<8x32xf32>
    %48 = vector.broadcast %34 : vector<1x32xf32> to vector<8x32xf32>
    %49 = arith.addf %47, %48 : vector<8x32xf32>
    %cst_54 = arith.constant dense<0.000000e+00> : vector<8x32xf32>
    %50 = tpu.matmul %39, %30, %cst_54 {dimension_numbers = #tpu.dot_dimension_numbers<[1], [0], [0], [1], [0, 0, 1, 1], [], []>} : vector<8x32xf32>, vector<32x32xf32>, vector<8x32xf32> -> vector<8x32xf32>
    %51 = vector.broadcast %36 : vector<1x32xf32> to vector<8x32xf32>
    %52 = arith.addf %50, %51 : vector<8x32xf32>
    %53 = arith.negf %44 : vector<8x32xf32>
    %54 = math.exp %53 : vector<8x32xf32>
    %cst_55 = arith.constant 1.000000e+00 : f32
    %55 = vector.broadcast %cst_55 : f32 to vector<8x32xf32>
    %56 = arith.addf %55, %54 : vector<8x32xf32>
    %57 = arith.divf %55, %56 : vector<8x32xf32>
    %58 = arith.negf %49 : vector<8x32xf32>
    %59 = math.exp %58 : vector<8x32xf32>
    %cst_56 = arith.constant 1.000000e+00 : f32
    %60 = vector.broadcast %cst_56 : f32 to vector<8x32xf32>
    %61 = arith.addf %60, %59 : vector<8x32xf32>
    %62 = arith.divf %60, %61 : vector<8x32xf32>
    %c0_57 = arith.constant 0 : index
    %c0_58 = arith.constant 0 : index
    %63 = vector.load %arg16[%c0_57, %c0_58] : memref<64x32xf32, #tpu.memory_space<vmem>>, vector<8x32xf32>
    %64 = arith.mulf %57, %52 : vector<8x32xf32>
    %65 = arith.addf %63, %64 : vector<8x32xf32>
    %66 = math.tanh %65 : vector<8x32xf32>
    %cst_59 = arith.constant 1.000000e+00 : f32
    %67 = vector.broadcast %cst_59 : f32 to vector<8x32xf32>
    %68 = arith.subf %67, %62 : vector<8x32xf32>
    %69 = arith.mulf %68, %66 : vector<8x32xf32>
    %70 = arith.mulf %62, %39 : vector<8x32xf32>
    %71 = arith.addf %69, %70 : vector<8x32xf32>
    %c0_60 = arith.constant 0 : index
    %c0_61 = arith.constant 0 : index
    %72 = vector.load %arg17[%c0_60, %c0_61] : memref<8x32xf32, #tpu.memory_space<vmem>>, vector<8x32xf32>
    tpu.vector_store %arg17[%c0_60, %c0_61], %71 {strides = array<i32>} : memref<8x32xf32, #tpu.memory_space<vmem>>, vector<8x32xf32>,
    %c0_62 = arith.constant 0 : index
    %c0_63 = arith.constant 0 : index
    %73 = vector.load %arg12[%c0_62, %c0_63] : memref<64x32xf32, #tpu.memory_space<vmem>>, vector<8x32xf32>
    tpu.vector_store %arg12[%c0_62, %c0_63], %71 {strides = array<i32>} : memref<64x32xf32, #tpu.memory_space<vmem>>, vector<8x32xf32>,
    %c0_64 = arith.constant 0 : index
    %c0_65 = arith.constant 0 : index
    %74 = vector.load %arg17[%c0_64, %c0_65] : memref<8x32xf32, #tpu.memory_space<vmem>>, vector<8x32xf32>
    %c8 = arith.constant 8 : index
    %c0_66 = arith.constant 0 : index
    %75 = vector.load %arg14[%c8, %c0_66] : memref<64x32xf32, #tpu.memory_space<vmem>>, vector<8x32xf32>
    %cst_67 = arith.constant dense<0.000000e+00> : vector<8x32xf32>
    %76 = tpu.matmul %74, %26, %cst_67 {dimension_numbers = #tpu.dot_dimension_numbers<[1], [0], [0], [1], [0, 0, 1, 1], [], []>} : vector<8x32xf32>, vector<32x32xf32>, vector<8x32xf32> -> vector<8x32xf32>
    %77 = arith.addf %75, %76 : vector<8x32xf32>
    %78 = vector.broadcast %32 : vector<1x32xf32> to vector<8x32xf32>
    %79 = arith.addf %77, %78 : vector<8x32xf32>
    %c8_68 = arith.constant 8 : index
    %c0_69 = arith.constant 0 : index
    %80 = vector.load %arg15[%c8_68, %c0_69] : memref<64x32xf32, #tpu.memory_space<vmem>>, vector<8x32xf32>
    %cst_70 = arith.constant dense<0.000000e+00> : vector<8x32xf32>
    %81 = tpu.matmul %74, %28, %cst_70 {dimension_numbers = #tpu.dot_dimension_numbers<[1], [0], [0], [1], [0, 0, 1, 1], [], []>} : vector<8x32xf32>, vector<32x32xf32>, vector<8x32xf32> -> vector<8x32xf32>
    %82 = arith.addf %80, %81 : vector<8x32xf32>
    %83 = vector.broadcast %34 : vector<1x32xf32> to vector<8x32xf32>
    %84 = arith.addf %82, %83 : vector<8x32xf32>
    %cst_71 = arith.constant dense<0.000000e+00> : vector<8x32xf32>
    %85 = tpu.matmul %74, %30, %cst_71 {dimension_numbers = #tpu.dot_dimension_numbers<[1], [0], [0], [1], [0, 0, 1, 1], [], []>} : vector<8x32xf32>, vector<32x32xf32>, vector<8x32xf32> -> vector<8x32xf32>
    %86 = vector.broadcast %36 : vector<1x32xf32> to vector<8x32xf32>
    %87 = arith.addf %85, %86 : vector<8x32xf32>
    %88 = arith.negf %79 : vector<8x32xf32>
    %89 = math.exp %88 : vector<8x32xf32>
    %cst_72 = arith.constant 1.000000e+00 : f32
    %90 = vector.broadcast %cst_72 : f32 to vector<8x32xf32>
    %91 = arith.addf %90, %89 : vector<8x32xf32>
    %92 = arith.divf %90, %91 : vector<8x32xf32>
    %93 = arith.negf %84 : vector<8x32xf32>
    %94 = math.exp %93 : vector<8x32xf32>
    %cst_73 = arith.constant 1.000000e+00 : f32
    %95 = vector.broadcast %cst_73 : f32 to vector<8x32xf32>
    %96 = arith.addf %95, %94 : vector<8x32xf32>
    %97 = arith.divf %95, %96 : vector<8x32xf32>
    %c8_74 = arith.constant 8 : index
    %c0_75 = arith.constant 0 : index
    %98 = vector.load %arg16[%c8_74, %c0_75] : memref<64x32xf32, #tpu.memory_space<vmem>>, vector<8x32xf32>
    %99 = arith.mulf %92, %87 : vector<8x32xf32>
    %100 = arith.addf %98, %99 : vector<8x32xf32>
    %101 = math.tanh %100 : vector<8x32xf32>
    %cst_76 = arith.constant 1.000000e+00 : f32
    %102 = vector.broadcast %cst_76 : f32 to vector<8x32xf32>
    %103 = arith.subf %102, %97 : vector<8x32xf32>
    %104 = arith.mulf %103, %101 : vector<8x32xf32>
    %105 = arith.mulf %97, %74 : vector<8x32xf32>
    %106 = arith.addf %104, %105 : vector<8x32xf32>
    %c0_77 = arith.constant 0 : index
    %c0_78 = arith.constant 0 : index
    %107 = vector.load %arg17[%c0_77, %c0_78] : memref<8x32xf32, #tpu.memory_space<vmem>>, vector<8x32xf32>
    tpu.vector_store %arg17[%c0_77, %c0_78], %106 {strides = array<i32>} : memref<8x32xf32, #tpu.memory_space<vmem>>, vector<8x32xf32>,
    %c8_79 = arith.constant 8 : index
    %c0_80 = arith.constant 0 : index
    %108 = vector.load %arg12[%c8_79, %c0_80] : memref<64x32xf32, #tpu.memory_space<vmem>>, vector<8x32xf32>
    tpu.vector_store %arg12[%c8_79, %c0_80], %106 {strides = array<i32>} : memref<64x32xf32, #tpu.memory_space<vmem>>, vector<8x32xf32>,
    %c0_81 = arith.constant 0 : index
    %c0_82 = arith.constant 0 : index
    %109 = vector.load %arg17[%c0_81, %c0_82] : memref<8x32xf32, #tpu.memory_space<vmem>>, vector<8x32xf32>
    %c16 = arith.constant 16 : index
    %c0_83 = arith.constant 0 : index
    %110 = vector.load %arg14[%c16, %c0_83] : memref<64x32xf32, #tpu.memory_space<vmem>>, vector<8x32xf32>
    %cst_84 = arith.constant dense<0.000000e+00> : vector<8x32xf32>
    %111 = tpu.matmul %109, %26, %cst_84 {dimension_numbers = #tpu.dot_dimension_numbers<[1], [0], [0], [1], [0, 0, 1, 1], [], []>} : vector<8x32xf32>, vector<32x32xf32>, vector<8x32xf32> -> vector<8x32xf32>
    %112 = arith.addf %110, %111 : vector<8x32xf32>
    %113 = vector.broadcast %32 : vector<1x32xf32> to vector<8x32xf32>
    %114 = arith.addf %112, %113 : vector<8x32xf32>
    %c16_85 = arith.constant 16 : index
    %c0_86 = arith.constant 0 : index
    %115 = vector.load %arg15[%c16_85, %c0_86] : memref<64x32xf32, #tpu.memory_space<vmem>>, vector<8x32xf32>
    %cst_87 = arith.constant dense<0.000000e+00> : vector<8x32xf32>
    %116 = tpu.matmul %109, %28, %cst_87 {dimension_numbers = #tpu.dot_dimension_numbers<[1], [0], [0], [1], [0, 0, 1, 1], [], []>} : vector<8x32xf32>, vector<32x32xf32>, vector<8x32xf32> -> vector<8x32xf32>
    %117 = arith.addf %115, %116 : vector<8x32xf32>
    %118 = vector.broadcast %34 : vector<1x32xf32> to vector<8x32xf32>
    %119 = arith.addf %117, %118 : vector<8x32xf32>
    %cst_88 = arith.constant dense<0.000000e+00> : vector<8x32xf32>
    %120 = tpu.matmul %109, %30, %cst_88 {dimension_numbers = #tpu.dot_dimension_numbers<[1], [0], [0], [1], [0, 0, 1, 1], [], []>} : vector<8x32xf32>, vector<32x32xf32>, vector<8x32xf32> -> vector<8x32xf32>
    %121 = vector.broadcast %36 : vector<1x32xf32> to vector<8x32xf32>
    %122 = arith.addf %120, %121 : vector<8x32xf32>
    %123 = arith.negf %114 : vector<8x32xf32>
    %124 = math.exp %123 : vector<8x32xf32>
    %cst_89 = arith.constant 1.000000e+00 : f32
    %125 = vector.broadcast %cst_89 : f32 to vector<8x32xf32>
    %126 = arith.addf %125, %124 : vector<8x32xf32>
    %127 = arith.divf %125, %126 : vector<8x32xf32>
    %128 = arith.negf %119 : vector<8x32xf32>
    %129 = math.exp %128 : vector<8x32xf32>
    %cst_90 = arith.constant 1.000000e+00 : f32
    %130 = vector.broadcast %cst_90 : f32 to vector<8x32xf32>
    %131 = arith.addf %130, %129 : vector<8x32xf32>
    %132 = arith.divf %130, %131 : vector<8x32xf32>
    %c16_91 = arith.constant 16 : index
    %c0_92 = arith.constant 0 : index
    %133 = vector.load %arg16[%c16_91, %c0_92] : memref<64x32xf32, #tpu.memory_space<vmem>>, vector<8x32xf32>
    %134 = arith.mulf %127, %122 : vector<8x32xf32>
    %135 = arith.addf %133, %134 : vector<8x32xf32>
    %136 = math.tanh %135 : vector<8x32xf32>
    %cst_93 = arith.constant 1.000000e+00 : f32
    %137 = vector.broadcast %cst_93 : f32 to vector<8x32xf32>
    %138 = arith.subf %137, %132 : vector<8x32xf32>
    %139 = arith.mulf %138, %136 : vector<8x32xf32>
    %140 = arith.mulf %132, %109 : vector<8x32xf32>
    %141 = arith.addf %139, %140 : vector<8x32xf32>
    %c0_94 = arith.constant 0 : index
    %c0_95 = arith.constant 0 : index
    %142 = vector.load %arg17[%c0_94, %c0_95] : memref<8x32xf32, #tpu.memory_space<vmem>>, vector<8x32xf32>
    tpu.vector_store %arg17[%c0_94, %c0_95], %141 {strides = array<i32>} : memref<8x32xf32, #tpu.memory_space<vmem>>, vector<8x32xf32>,
    %c16_96 = arith.constant 16 : index
    %c0_97 = arith.constant 0 : index
    %143 = vector.load %arg12[%c16_96, %c0_97] : memref<64x32xf32, #tpu.memory_space<vmem>>, vector<8x32xf32>
    tpu.vector_store %arg12[%c16_96, %c0_97], %141 {strides = array<i32>} : memref<64x32xf32, #tpu.memory_space<vmem>>, vector<8x32xf32>,
    %c0_98 = arith.constant 0 : index
    %c0_99 = arith.constant 0 : index
    %144 = vector.load %arg17[%c0_98, %c0_99] : memref<8x32xf32, #tpu.memory_space<vmem>>, vector<8x32xf32>
    %c24 = arith.constant 24 : index
    %c0_100 = arith.constant 0 : index
    %145 = vector.load %arg14[%c24, %c0_100] : memref<64x32xf32, #tpu.memory_space<vmem>>, vector<8x32xf32>
    %cst_101 = arith.constant dense<0.000000e+00> : vector<8x32xf32>
    %146 = tpu.matmul %144, %26, %cst_101 {dimension_numbers = #tpu.dot_dimension_numbers<[1], [0], [0], [1], [0, 0, 1, 1], [], []>} : vector<8x32xf32>, vector<32x32xf32>, vector<8x32xf32> -> vector<8x32xf32>
    %147 = arith.addf %145, %146 : vector<8x32xf32>
    %148 = vector.broadcast %32 : vector<1x32xf32> to vector<8x32xf32>
    %149 = arith.addf %147, %148 : vector<8x32xf32>
    %c24_102 = arith.constant 24 : index
    %c0_103 = arith.constant 0 : index
    %150 = vector.load %arg15[%c24_102, %c0_103] : memref<64x32xf32, #tpu.memory_space<vmem>>, vector<8x32xf32>
    %cst_104 = arith.constant dense<0.000000e+00> : vector<8x32xf32>
    %151 = tpu.matmul %144, %28, %cst_104 {dimension_numbers = #tpu.dot_dimension_numbers<[1], [0], [0], [1], [0, 0, 1, 1], [], []>} : vector<8x32xf32>, vector<32x32xf32>, vector<8x32xf32> -> vector<8x32xf32>
    %152 = arith.addf %150, %151 : vector<8x32xf32>
    %153 = vector.broadcast %34 : vector<1x32xf32> to vector<8x32xf32>
    %154 = arith.addf %152, %153 : vector<8x32xf32>
    %cst_105 = arith.constant dense<0.000000e+00> : vector<8x32xf32>
    %155 = tpu.matmul %144, %30, %cst_105 {dimension_numbers = #tpu.dot_dimension_numbers<[1], [0], [0], [1], [0, 0, 1, 1], [], []>} : vector<8x32xf32>, vector<32x32xf32>, vector<8x32xf32> -> vector<8x32xf32>
    %156 = vector.broadcast %36 : vector<1x32xf32> to vector<8x32xf32>
    %157 = arith.addf %155, %156 : vector<8x32xf32>
    %158 = arith.negf %149 : vector<8x32xf32>
    %159 = math.exp %158 : vector<8x32xf32>
    %cst_106 = arith.constant 1.000000e+00 : f32
    %160 = vector.broadcast %cst_106 : f32 to vector<8x32xf32>
    %161 = arith.addf %160, %159 : vector<8x32xf32>
    %162 = arith.divf %160, %161 : vector<8x32xf32>
    %163 = arith.negf %154 : vector<8x32xf32>
    %164 = math.exp %163 : vector<8x32xf32>
    %cst_107 = arith.constant 1.000000e+00 : f32
    %165 = vector.broadcast %cst_107 : f32 to vector<8x32xf32>
    %166 = arith.addf %165, %164 : vector<8x32xf32>
    %167 = arith.divf %165, %166 : vector<8x32xf32>
    %c24_108 = arith.constant 24 : index
    %c0_109 = arith.constant 0 : index
    %168 = vector.load %arg16[%c24_108, %c0_109] : memref<64x32xf32, #tpu.memory_space<vmem>>, vector<8x32xf32>
    %169 = arith.mulf %162, %157 : vector<8x32xf32>
    %170 = arith.addf %168, %169 : vector<8x32xf32>
    %171 = math.tanh %170 : vector<8x32xf32>
    %cst_110 = arith.constant 1.000000e+00 : f32
    %172 = vector.broadcast %cst_110 : f32 to vector<8x32xf32>
    %173 = arith.subf %172, %167 : vector<8x32xf32>
    %174 = arith.mulf %173, %171 : vector<8x32xf32>
    %175 = arith.mulf %167, %144 : vector<8x32xf32>
    %176 = arith.addf %174, %175 : vector<8x32xf32>
    %c0_111 = arith.constant 0 : index
    %c0_112 = arith.constant 0 : index
    %177 = vector.load %arg17[%c0_111, %c0_112] : memref<8x32xf32, #tpu.memory_space<vmem>>, vector<8x32xf32>
    tpu.vector_store %arg17[%c0_111, %c0_112], %176 {strides = array<i32>} : memref<8x32xf32, #tpu.memory_space<vmem>>, vector<8x32xf32>,
    %c24_113 = arith.constant 24 : index
    %c0_114 = arith.constant 0 : index
    %178 = vector.load %arg12[%c24_113, %c0_114] : memref<64x32xf32, #tpu.memory_space<vmem>>, vector<8x32xf32>
    tpu.vector_store %arg12[%c24_113, %c0_114], %176 {strides = array<i32>} : memref<64x32xf32, #tpu.memory_space<vmem>>, vector<8x32xf32>,
    %c0_115 = arith.constant 0 : index
    %c0_116 = arith.constant 0 : index
    %179 = vector.load %arg17[%c0_115, %c0_116] : memref<8x32xf32, #tpu.memory_space<vmem>>, vector<8x32xf32>
    %c32 = arith.constant 32 : index
    %c0_117 = arith.constant 0 : index
    %180 = vector.load %arg14[%c32, %c0_117] : memref<64x32xf32, #tpu.memory_space<vmem>>, vector<8x32xf32>
    %cst_118 = arith.constant dense<0.000000e+00> : vector<8x32xf32>
    %181 = tpu.matmul %179, %26, %cst_118 {dimension_numbers = #tpu.dot_dimension_numbers<[1], [0], [0], [1], [0, 0, 1, 1], [], []>} : vector<8x32xf32>, vector<32x32xf32>, vector<8x32xf32> -> vector<8x32xf32>
    %182 = arith.addf %180, %181 : vector<8x32xf32>
    %183 = vector.broadcast %32 : vector<1x32xf32> to vector<8x32xf32>
    %184 = arith.addf %182, %183 : vector<8x32xf32>
    %c32_119 = arith.constant 32 : index
    %c0_120 = arith.constant 0 : index
    %185 = vector.load %arg15[%c32_119, %c0_120] : memref<64x32xf32, #tpu.memory_space<vmem>>, vector<8x32xf32>
    %cst_121 = arith.constant dense<0.000000e+00> : vector<8x32xf32>
    %186 = tpu.matmul %179, %28, %cst_121 {dimension_numbers = #tpu.dot_dimension_numbers<[1], [0], [0], [1], [0, 0, 1, 1], [], []>} : vector<8x32xf32>, vector<32x32xf32>, vector<8x32xf32> -> vector<8x32xf32>
    %187 = arith.addf %185, %186 : vector<8x32xf32>
    %188 = vector.broadcast %34 : vector<1x32xf32> to vector<8x32xf32>
    %189 = arith.addf %187, %188 : vector<8x32xf32>
    %cst_122 = arith.constant dense<0.000000e+00> : vector<8x32xf32>
    %190 = tpu.matmul %179, %30, %cst_122 {dimension_numbers = #tpu.dot_dimension_numbers<[1], [0], [0], [1], [0, 0, 1, 1], [], []>} : vector<8x32xf32>, vector<32x32xf32>, vector<8x32xf32> -> vector<8x32xf32>
    %191 = vector.broadcast %36 : vector<1x32xf32> to vector<8x32xf32>
    %192 = arith.addf %190, %191 : vector<8x32xf32>
    %193 = arith.negf %184 : vector<8x32xf32>
    %194 = math.exp %193 : vector<8x32xf32>
    %cst_123 = arith.constant 1.000000e+00 : f32
    %195 = vector.broadcast %cst_123 : f32 to vector<8x32xf32>
    %196 = arith.addf %195, %194 : vector<8x32xf32>
    %197 = arith.divf %195, %196 : vector<8x32xf32>
    %198 = arith.negf %189 : vector<8x32xf32>
    %199 = math.exp %198 : vector<8x32xf32>
    %cst_124 = arith.constant 1.000000e+00 : f32
    %200 = vector.broadcast %cst_124 : f32 to vector<8x32xf32>
    %201 = arith.addf %200, %199 : vector<8x32xf32>
    %202 = arith.divf %200, %201 : vector<8x32xf32>
    %c32_125 = arith.constant 32 : index
    %c0_126 = arith.constant 0 : index
    %203 = vector.load %arg16[%c32_125, %c0_126] : memref<64x32xf32, #tpu.memory_space<vmem>>, vector<8x32xf32>
    %204 = arith.mulf %197, %192 : vector<8x32xf32>
    %205 = arith.addf %203, %204 : vector<8x32xf32>
    %206 = math.tanh %205 : vector<8x32xf32>
    %cst_127 = arith.constant 1.000000e+00 : f32
    %207 = vector.broadcast %cst_127 : f32 to vector<8x32xf32>
    %208 = arith.subf %207, %202 : vector<8x32xf32>
    %209 = arith.mulf %208, %206 : vector<8x32xf32>
    %210 = arith.mulf %202, %179 : vector<8x32xf32>
    %211 = arith.addf %209, %210 : vector<8x32xf32>
    %c0_128 = arith.constant 0 : index
    %c0_129 = arith.constant 0 : index
    %212 = vector.load %arg17[%c0_128, %c0_129] : memref<8x32xf32, #tpu.memory_space<vmem>>, vector<8x32xf32>
    tpu.vector_store %arg17[%c0_128, %c0_129], %211 {strides = array<i32>} : memref<8x32xf32, #tpu.memory_space<vmem>>, vector<8x32xf32>,
    %c32_130 = arith.constant 32 : index
    %c0_131 = arith.constant 0 : index
    %213 = vector.load %arg12[%c32_130, %c0_131] : memref<64x32xf32, #tpu.memory_space<vmem>>, vector<8x32xf32>
    tpu.vector_store %arg12[%c32_130, %c0_131], %211 {strides = array<i32>} : memref<64x32xf32, #tpu.memory_space<vmem>>, vector<8x32xf32>,
    %c0_132 = arith.constant 0 : index
    %c0_133 = arith.constant 0 : index
    %214 = vector.load %arg17[%c0_132, %c0_133] : memref<8x32xf32, #tpu.memory_space<vmem>>, vector<8x32xf32>
    %c40 = arith.constant 40 : index
    %c0_134 = arith.constant 0 : index
    %215 = vector.load %arg14[%c40, %c0_134] : memref<64x32xf32, #tpu.memory_space<vmem>>, vector<8x32xf32>
    %cst_135 = arith.constant dense<0.000000e+00> : vector<8x32xf32>
    %216 = tpu.matmul %214, %26, %cst_135 {dimension_numbers = #tpu.dot_dimension_numbers<[1], [0], [0], [1], [0, 0, 1, 1], [], []>} : vector<8x32xf32>, vector<32x32xf32>, vector<8x32xf32> -> vector<8x32xf32>
    %217 = arith.addf %215, %216 : vector<8x32xf32>
    %218 = vector.broadcast %32 : vector<1x32xf32> to vector<8x32xf32>
    %219 = arith.addf %217, %218 : vector<8x32xf32>
    %c40_136 = arith.constant 40 : index
    %c0_137 = arith.constant 0 : index
    %220 = vector.load %arg15[%c40_136, %c0_137] : memref<64x32xf32, #tpu.memory_space<vmem>>, vector<8x32xf32>
    %cst_138 = arith.constant dense<0.000000e+00> : vector<8x32xf32>
    %221 = tpu.matmul %214, %28, %cst_138 {dimension_numbers = #tpu.dot_dimension_numbers<[1], [0], [0], [1], [0, 0, 1, 1], [], []>} : vector<8x32xf32>, vector<32x32xf32>, vector<8x32xf32> -> vector<8x32xf32>
    %222 = arith.addf %220, %221 : vector<8x32xf32>
    %223 = vector.broadcast %34 : vector<1x32xf32> to vector<8x32xf32>
    %224 = arith.addf %222, %223 : vector<8x32xf32>
    %cst_139 = arith.constant dense<0.000000e+00> : vector<8x32xf32>
    %225 = tpu.matmul %214, %30, %cst_139 {dimension_numbers = #tpu.dot_dimension_numbers<[1], [0], [0], [1], [0, 0, 1, 1], [], []>} : vector<8x32xf32>, vector<32x32xf32>, vector<8x32xf32> -> vector<8x32xf32>
    %226 = vector.broadcast %36 : vector<1x32xf32> to vector<8x32xf32>
    %227 = arith.addf %225, %226 : vector<8x32xf32>
    %228 = arith.negf %219 : vector<8x32xf32>
    %229 = math.exp %228 : vector<8x32xf32>
    %cst_140 = arith.constant 1.000000e+00 : f32
    %230 = vector.broadcast %cst_140 : f32 to vector<8x32xf32>
    %231 = arith.addf %230, %229 : vector<8x32xf32>
    %232 = arith.divf %230, %231 : vector<8x32xf32>
    %233 = arith.negf %224 : vector<8x32xf32>
    %234 = math.exp %233 : vector<8x32xf32>
    %cst_141 = arith.constant 1.000000e+00 : f32
    %235 = vector.broadcast %cst_141 : f32 to vector<8x32xf32>
    %236 = arith.addf %235, %234 : vector<8x32xf32>
    %237 = arith.divf %235, %236 : vector<8x32xf32>
    %c40_142 = arith.constant 40 : index
    %c0_143 = arith.constant 0 : index
    %238 = vector.load %arg16[%c40_142, %c0_143] : memref<64x32xf32, #tpu.memory_space<vmem>>, vector<8x32xf32>
    %239 = arith.mulf %232, %227 : vector<8x32xf32>
    %240 = arith.addf %238, %239 : vector<8x32xf32>
    %241 = math.tanh %240 : vector<8x32xf32>
    %cst_144 = arith.constant 1.000000e+00 : f32
    %242 = vector.broadcast %cst_144 : f32 to vector<8x32xf32>
    %243 = arith.subf %242, %237 : vector<8x32xf32>
    %244 = arith.mulf %243, %241 : vector<8x32xf32>
    %245 = arith.mulf %237, %214 : vector<8x32xf32>
    %246 = arith.addf %244, %245 : vector<8x32xf32>
    %c0_145 = arith.constant 0 : index
    %c0_146 = arith.constant 0 : index
    %247 = vector.load %arg17[%c0_145, %c0_146] : memref<8x32xf32, #tpu.memory_space<vmem>>, vector<8x32xf32>
    tpu.vector_store %arg17[%c0_145, %c0_146], %246 {strides = array<i32>} : memref<8x32xf32, #tpu.memory_space<vmem>>, vector<8x32xf32>,
    %c40_147 = arith.constant 40 : index
    %c0_148 = arith.constant 0 : index
    %248 = vector.load %arg12[%c40_147, %c0_148] : memref<64x32xf32, #tpu.memory_space<vmem>>, vector<8x32xf32>
    tpu.vector_store %arg12[%c40_147, %c0_148], %246 {strides = array<i32>} : memref<64x32xf32, #tpu.memory_space<vmem>>, vector<8x32xf32>,
    %c0_149 = arith.constant 0 : index
    %c0_150 = arith.constant 0 : index
    %249 = vector.load %arg17[%c0_149, %c0_150] : memref<8x32xf32, #tpu.memory_space<vmem>>, vector<8x32xf32>
    %c48 = arith.constant 48 : index
    %c0_151 = arith.constant 0 : index
    %250 = vector.load %arg14[%c48, %c0_151] : memref<64x32xf32, #tpu.memory_space<vmem>>, vector<8x32xf32>
    %cst_152 = arith.constant dense<0.000000e+00> : vector<8x32xf32>
    %251 = tpu.matmul %249, %26, %cst_152 {dimension_numbers = #tpu.dot_dimension_numbers<[1], [0], [0], [1], [0, 0, 1, 1], [], []>} : vector<8x32xf32>, vector<32x32xf32>, vector<8x32xf32> -> vector<8x32xf32>
    %252 = arith.addf %250, %251 : vector<8x32xf32>
    %253 = vector.broadcast %32 : vector<1x32xf32> to vector<8x32xf32>
    %254 = arith.addf %252, %253 : vector<8x32xf32>
    %c48_153 = arith.constant 48 : index
    %c0_154 = arith.constant 0 : index
    %255 = vector.load %arg15[%c48_153, %c0_154] : memref<64x32xf32, #tpu.memory_space<vmem>>, vector<8x32xf32>
    %cst_155 = arith.constant dense<0.000000e+00> : vector<8x32xf32>
    %256 = tpu.matmul %249, %28, %cst_155 {dimension_numbers = #tpu.dot_dimension_numbers<[1], [0], [0], [1], [0, 0, 1, 1], [], []>} : vector<8x32xf32>, vector<32x32xf32>, vector<8x32xf32> -> vector<8x32xf32>
    %257 = arith.addf %255, %256 : vector<8x32xf32>
    %258 = vector.broadcast %34 : vector<1x32xf32> to vector<8x32xf32>
    %259 = arith.addf %257, %258 : vector<8x32xf32>
    %cst_156 = arith.constant dense<0.000000e+00> : vector<8x32xf32>
    %260 = tpu.matmul %249, %30, %cst_156 {dimension_numbers = #tpu.dot_dimension_numbers<[1], [0], [0], [1], [0, 0, 1, 1], [], []>} : vector<8x32xf32>, vector<32x32xf32>, vector<8x32xf32> -> vector<8x32xf32>
    %261 = vector.broadcast %36 : vector<1x32xf32> to vector<8x32xf32>
    %262 = arith.addf %260, %261 : vector<8x32xf32>
    %263 = arith.negf %254 : vector<8x32xf32>
    %264 = math.exp %263 : vector<8x32xf32>
    %cst_157 = arith.constant 1.000000e+00 : f32
    %265 = vector.broadcast %cst_157 : f32 to vector<8x32xf32>
    %266 = arith.addf %265, %264 : vector<8x32xf32>
    %267 = arith.divf %265, %266 : vector<8x32xf32>
    %268 = arith.negf %259 : vector<8x32xf32>
    %269 = math.exp %268 : vector<8x32xf32>
    %cst_158 = arith.constant 1.000000e+00 : f32
    %270 = vector.broadcast %cst_158 : f32 to vector<8x32xf32>
    %271 = arith.addf %270, %269 : vector<8x32xf32>
    %272 = arith.divf %270, %271 : vector<8x32xf32>
    %c48_159 = arith.constant 48 : index
    %c0_160 = arith.constant 0 : index
    %273 = vector.load %arg16[%c48_159, %c0_160] : memref<64x32xf32, #tpu.memory_space<vmem>>, vector<8x32xf32>
    %274 = arith.mulf %267, %262 : vector<8x32xf32>
    %275 = arith.addf %273, %274 : vector<8x32xf32>
    %276 = math.tanh %275 : vector<8x32xf32>
    %cst_161 = arith.constant 1.000000e+00 : f32
    %277 = vector.broadcast %cst_161 : f32 to vector<8x32xf32>
    %278 = arith.subf %277, %272 : vector<8x32xf32>
    %279 = arith.mulf %278, %276 : vector<8x32xf32>
    %280 = arith.mulf %272, %249 : vector<8x32xf32>
    %281 = arith.addf %279, %280 : vector<8x32xf32>
    %c0_162 = arith.constant 0 : index
    %c0_163 = arith.constant 0 : index
    %282 = vector.load %arg17[%c0_162, %c0_163] : memref<8x32xf32, #tpu.memory_space<vmem>>, vector<8x32xf32>
    tpu.vector_store %arg17[%c0_162, %c0_163], %281 {strides = array<i32>} : memref<8x32xf32, #tpu.memory_space<vmem>>, vector<8x32xf32>,
    %c48_164 = arith.constant 48 : index
    %c0_165 = arith.constant 0 : index
    %283 = vector.load %arg12[%c48_164, %c0_165] : memref<64x32xf32, #tpu.memory_space<vmem>>, vector<8x32xf32>
    tpu.vector_store %arg12[%c48_164, %c0_165], %281 {strides = array<i32>} : memref<64x32xf32, #tpu.memory_space<vmem>>, vector<8x32xf32>,
    %c0_166 = arith.constant 0 : index
    %c0_167 = arith.constant 0 : index
    %284 = vector.load %arg17[%c0_166, %c0_167] : memref<8x32xf32, #tpu.memory_space<vmem>>, vector<8x32xf32>
    %c56 = arith.constant 56 : index
    %c0_168 = arith.constant 0 : index
    %285 = vector.load %arg14[%c56, %c0_168] : memref<64x32xf32, #tpu.memory_space<vmem>>, vector<8x32xf32>
    %cst_169 = arith.constant dense<0.000000e+00> : vector<8x32xf32>
    %286 = tpu.matmul %284, %26, %cst_169 {dimension_numbers = #tpu.dot_dimension_numbers<[1], [0], [0], [1], [0, 0, 1, 1], [], []>} : vector<8x32xf32>, vector<32x32xf32>, vector<8x32xf32> -> vector<8x32xf32>
    %287 = arith.addf %285, %286 : vector<8x32xf32>
    %288 = vector.broadcast %32 : vector<1x32xf32> to vector<8x32xf32>
    %289 = arith.addf %287, %288 : vector<8x32xf32>
    %c56_170 = arith.constant 56 : index
    %c0_171 = arith.constant 0 : index
    %290 = vector.load %arg15[%c56_170, %c0_171] : memref<64x32xf32, #tpu.memory_space<vmem>>, vector<8x32xf32>
    %cst_172 = arith.constant dense<0.000000e+00> : vector<8x32xf32>
    %291 = tpu.matmul %284, %28, %cst_172 {dimension_numbers = #tpu.dot_dimension_numbers<[1], [0], [0], [1], [0, 0, 1, 1], [], []>} : vector<8x32xf32>, vector<32x32xf32>, vector<8x32xf32> -> vector<8x32xf32>
    %292 = arith.addf %290, %291 : vector<8x32xf32>
    %293 = vector.broadcast %34 : vector<1x32xf32> to vector<8x32xf32>
    %294 = arith.addf %292, %293 : vector<8x32xf32>
    %cst_173 = arith.constant dense<0.000000e+00> : vector<8x32xf32>
    %295 = tpu.matmul %284, %30, %cst_173 {dimension_numbers = #tpu.dot_dimension_numbers<[1], [0], [0], [1], [0, 0, 1, 1], [], []>} : vector<8x32xf32>, vector<32x32xf32>, vector<8x32xf32> -> vector<8x32xf32>
    %296 = vector.broadcast %36 : vector<1x32xf32> to vector<8x32xf32>
    %297 = arith.addf %295, %296 : vector<8x32xf32>
    %298 = arith.negf %289 : vector<8x32xf32>
    %299 = math.exp %298 : vector<8x32xf32>
    %cst_174 = arith.constant 1.000000e+00 : f32
    %300 = vector.broadcast %cst_174 : f32 to vector<8x32xf32>
    %301 = arith.addf %300, %299 : vector<8x32xf32>
    %302 = arith.divf %300, %301 : vector<8x32xf32>
    %303 = arith.negf %294 : vector<8x32xf32>
    %304 = math.exp %303 : vector<8x32xf32>
    %cst_175 = arith.constant 1.000000e+00 : f32
    %305 = vector.broadcast %cst_175 : f32 to vector<8x32xf32>
    %306 = arith.addf %305, %304 : vector<8x32xf32>
    %307 = arith.divf %305, %306 : vector<8x32xf32>
    %c56_176 = arith.constant 56 : index
    %c0_177 = arith.constant 0 : index
    %308 = vector.load %arg16[%c56_176, %c0_177] : memref<64x32xf32, #tpu.memory_space<vmem>>, vector<8x32xf32>
    %309 = arith.mulf %302, %297 : vector<8x32xf32>
    %310 = arith.addf %308, %309 : vector<8x32xf32>
    %311 = math.tanh %310 : vector<8x32xf32>
    %cst_178 = arith.constant 1.000000e+00 : f32
    %312 = vector.broadcast %cst_178 : f32 to vector<8x32xf32>
    %313 = arith.subf %312, %307 : vector<8x32xf32>
    %314 = arith.mulf %313, %311 : vector<8x32xf32>
    %315 = arith.mulf %307, %284 : vector<8x32xf32>
    %316 = arith.addf %314, %315 : vector<8x32xf32>
    %c0_179 = arith.constant 0 : index
    %c0_180 = arith.constant 0 : index
    %317 = vector.load %arg17[%c0_179, %c0_180] : memref<8x32xf32, #tpu.memory_space<vmem>>, vector<8x32xf32>
    tpu.vector_store %arg17[%c0_179, %c0_180], %316 {strides = array<i32>} : memref<8x32xf32, #tpu.memory_space<vmem>>, vector<8x32xf32>,
    %c56_181 = arith.constant 56 : index
    %c0_182 = arith.constant 0 : index
    %318 = vector.load %arg12[%c56_181, %c0_182] : memref<64x32xf32, #tpu.memory_space<vmem>>, vector<8x32xf32>
    tpu.vector_store %arg12[%c56_181, %c0_182], %316 {strides = array<i32>} : memref<64x32xf32, #tpu.memory_space<vmem>>, vector<8x32xf32>,
    %c0_183 = arith.constant 0 : index
    %c0_184 = arith.constant 0 : index
    %319 = vector.load %arg12[%c0_183, %c0_184] : memref<64x32xf32, #tpu.memory_space<vmem>>, vector<64x32xf32>
    %c0_185 = arith.constant 0 : index
    %c0_186 = arith.constant 0 : index
    %c0_187 = arith.constant 0 : index
    %320 = vector.load %arg5[%c0_185, %c0_186, %c0_187] : memref<3x32x32xf32, #tpu.memory_space<vmem>>, vector<1x32x32xf32>
    %321 = vector.shape_cast %320 : vector<1x32x32xf32> to vector<32x32xf32>
    %cst_188 = arith.constant dense<0.000000e+00> : vector<64x32xf32>
    %322 = tpu.matmul %319, %321, %cst_188 {dimension_numbers = #tpu.dot_dimension_numbers<[1], [0], [0], [1], [0, 0, 1, 1], [], []>} : vector<64x32xf32>, vector<32x32xf32>, vector<64x32xf32> -> vector<64x32xf32>
    %c0_189 = arith.constant 0 : index
    %c0_190 = arith.constant 0 : index
    %c0_191 = arith.constant 0 : index
    %323 = vector.load %arg7[%c0_189, %c0_190, %c0_191] : memref<3x1x32xf32, #tpu.memory_space<vmem>>, vector<1x1x32xf32>
    %324 = vector.shape_cast %323 : vector<1x1x32xf32> to vector<1x32xf32>
    %325 = vector.broadcast %324 : vector<1x32xf32> to vector<64x32xf32>
    %326 = arith.addf %322, %325 : vector<64x32xf32>
    %c0_192 = arith.constant 0 : index
    %c0_193 = arith.constant 0 : index
    %327 = vector.load %arg14[%c0_192, %c0_193] : memref<64x32xf32, #tpu.memory_space<vmem>>, vector<64x32xf32>
    tpu.vector_store %arg14[%c0_192, %c0_193], %326 {strides = array<i32>} : memref<64x32xf32, #tpu.memory_space<vmem>>, vector<64x32xf32>,
    %c1_194 = arith.constant 1 : index
    %c0_195 = arith.constant 0 : index
    %c0_196 = arith.constant 0 : index
    %328 = vector.load %arg5[%c1_194, %c0_195, %c0_196] : memref<3x32x32xf32, #tpu.memory_space<vmem>>, vector<1x32x32xf32>
    %329 = vector.shape_cast %328 : vector<1x32x32xf32> to vector<32x32xf32>
    %cst_197 = arith.constant dense<0.000000e+00> : vector<64x32xf32>
    %330 = tpu.matmul %319, %329, %cst_197 {dimension_numbers = #tpu.dot_dimension_numbers<[1], [0], [0], [1], [0, 0, 1, 1], [], []>} : vector<64x32xf32>, vector<32x32xf32>, vector<64x32xf32> -> vector<64x32xf32>
    %c1_198 = arith.constant 1 : index
    %c0_199 = arith.constant 0 : index
    %c0_200 = arith.constant 0 : index
    %331 = vector.load %arg7[%c1_198, %c0_199, %c0_200] : memref<3x1x32xf32, #tpu.memory_space<vmem>>, vector<1x1x32xf32>
    %332 = vector.shape_cast %331 : vector<1x1x32xf32> to vector<1x32xf32>
    %333 = vector.broadcast %332 : vector<1x32xf32> to vector<64x32xf32>
    %334 = arith.addf %330, %333 : vector<64x32xf32>
    %c0_201 = arith.constant 0 : index
    %c0_202 = arith.constant 0 : index
    %335 = vector.load %arg15[%c0_201, %c0_202] : memref<64x32xf32, #tpu.memory_space<vmem>>, vector<64x32xf32>
    tpu.vector_store %arg15[%c0_201, %c0_202], %334 {strides = array<i32>} : memref<64x32xf32, #tpu.memory_space<vmem>>, vector<64x32xf32>,
    %c2_203 = arith.constant 2 : index
    %c0_204 = arith.constant 0 : index
    %c0_205 = arith.constant 0 : index
    %336 = vector.load %arg5[%c2_203, %c0_204, %c0_205] : memref<3x32x32xf32, #tpu.memory_space<vmem>>, vector<1x32x32xf32>
    %337 = vector.shape_cast %336 : vector<1x32x32xf32> to vector<32x32xf32>
    %cst_206 = arith.constant dense<0.000000e+00> : vector<64x32xf32>
    %338 = tpu.matmul %319, %337, %cst_206 {dimension_numbers = #tpu.dot_dimension_numbers<[1], [0], [0], [1], [0, 0, 1, 1], [], []>} : vector<64x32xf32>, vector<32x32xf32>, vector<64x32xf32> -> vector<64x32xf32>
    %c2_207 = arith.constant 2 : index
    %c0_208 = arith.constant 0 : index
    %c0_209 = arith.constant 0 : index
    %339 = vector.load %arg7[%c2_207, %c0_208, %c0_209] : memref<3x1x32xf32, #tpu.memory_space<vmem>>, vector<1x1x32xf32>
    %340 = vector.shape_cast %339 : vector<1x1x32xf32> to vector<1x32xf32>
    %341 = vector.broadcast %340 : vector<1x32xf32> to vector<64x32xf32>
    %342 = arith.addf %338, %341 : vector<64x32xf32>
    %c0_210 = arith.constant 0 : index
    %c0_211 = arith.constant 0 : index
    %343 = vector.load %arg16[%c0_210, %c0_211] : memref<64x32xf32, #tpu.memory_space<vmem>>, vector<64x32xf32>
    tpu.vector_store %arg16[%c0_210, %c0_211], %342 {strides = array<i32>} : memref<64x32xf32, #tpu.memory_space<vmem>>, vector<64x32xf32>,
    %c0_212 = arith.constant 0 : index
    %c0_213 = arith.constant 0 : index
    %c0_214 = arith.constant 0 : index
    %344 = vector.load %arg6[%c0_212, %c0_213, %c0_214] : memref<3x32x32xf32, #tpu.memory_space<vmem>>, vector<1x32x32xf32>
    %345 = vector.shape_cast %344 : vector<1x32x32xf32> to vector<32x32xf32>
    %c1_215 = arith.constant 1 : index
    %c0_216 = arith.constant 0 : index
    %c0_217 = arith.constant 0 : index
    %346 = vector.load %arg6[%c1_215, %c0_216, %c0_217] : memref<3x32x32xf32, #tpu.memory_space<vmem>>, vector<1x32x32xf32>
    %347 = vector.shape_cast %346 : vector<1x32x32xf32> to vector<32x32xf32>
    %c2_218 = arith.constant 2 : index
    %c0_219 = arith.constant 0 : index
    %c0_220 = arith.constant 0 : index
    %348 = vector.load %arg6[%c2_218, %c0_219, %c0_220] : memref<3x32x32xf32, #tpu.memory_space<vmem>>, vector<1x32x32xf32>
    %349 = vector.shape_cast %348 : vector<1x32x32xf32> to vector<32x32xf32>
    %c0_221 = arith.constant 0 : index
    %c0_222 = arith.constant 0 : index
    %c0_223 = arith.constant 0 : index
    %350 = vector.load %arg8[%c0_221, %c0_222, %c0_223] : memref<3x1x32xf32, #tpu.memory_space<vmem>>, vector<1x1x32xf32>
    %351 = vector.shape_cast %350 : vector<1x1x32xf32> to vector<1x32xf32>
    %c1_224 = arith.constant 1 : index
    %c0_225 = arith.constant 0 : index
    %c0_226 = arith.constant 0 : index
    %352 = vector.load %arg8[%c1_224, %c0_225, %c0_226] : memref<3x1x32xf32, #tpu.memory_space<vmem>>, vector<1x1x32xf32>
    %353 = vector.shape_cast %352 : vector<1x1x32xf32> to vector<1x32xf32>
    %c2_227 = arith.constant 2 : index
    %c0_228 = arith.constant 0 : index
    %c0_229 = arith.constant 0 : index
    %354 = vector.load %arg8[%c2_227, %c0_228, %c0_229] : memref<3x1x32xf32, #tpu.memory_space<vmem>>, vector<1x1x32xf32>
    %355 = vector.shape_cast %354 : vector<1x1x32xf32> to vector<1x32xf32>
    %cst_230 = arith.constant 0.000000e+00 : f32
    %356 = vector.broadcast %cst_230 : f32 to vector<8x32xf32>
    %c0_231 = arith.constant 0 : index
    %c0_232 = arith.constant 0 : index
    %357 = vector.load %arg17[%c0_231, %c0_232] : memref<8x32xf32, #tpu.memory_space<vmem>>, vector<8x32xf32>
    tpu.vector_store %arg17[%c0_231, %c0_232], %356 {strides = array<i32>} : memref<8x32xf32, #tpu.memory_space<vmem>>, vector<8x32xf32>,
    %c0_233 = arith.constant 0 : index
    %c0_234 = arith.constant 0 : index
    %358 = vector.load %arg17[%c0_233, %c0_234] : memref<8x32xf32, #tpu.memory_space<vmem>>, vector<8x32xf32>
    %c0_235 = arith.constant 0 : index
    %c0_236 = arith.constant 0 : index
    %359 = vector.load %arg14[%c0_235, %c0_236] : memref<64x32xf32, #tpu.memory_space<vmem>>, vector<8x32xf32>
    %cst_237 = arith.constant dense<0.000000e+00> : vector<8x32xf32>
    %360 = tpu.matmul %358, %345, %cst_237 {dimension_numbers = #tpu.dot_dimension_numbers<[1], [0], [0], [1], [0, 0, 1, 1], [], []>} : vector<8x32xf32>, vector<32x32xf32>, vector<8x32xf32> -> vector<8x32xf32>
    %361 = arith.addf %359, %360 : vector<8x32xf32>
    %362 = vector.broadcast %351 : vector<1x32xf32> to vector<8x32xf32>
    %363 = arith.addf %361, %362 : vector<8x32xf32>
    %c0_238 = arith.constant 0 : index
    %c0_239 = arith.constant 0 : index
    %364 = vector.load %arg15[%c0_238, %c0_239] : memref<64x32xf32, #tpu.memory_space<vmem>>, vector<8x32xf32>
    %cst_240 = arith.constant dense<0.000000e+00> : vector<8x32xf32>
    %365 = tpu.matmul %358, %347, %cst_240 {dimension_numbers = #tpu.dot_dimension_numbers<[1], [0], [0], [1], [0, 0, 1, 1], [], []>} : vector<8x32xf32>, vector<32x32xf32>, vector<8x32xf32> -> vector<8x32xf32>
    %366 = arith.addf %364, %365 : vector<8x32xf32>
    %367 = vector.broadcast %353 : vector<1x32xf32> to vector<8x32xf32>
    %368 = arith.addf %366, %367 : vector<8x32xf32>
    %cst_241 = arith.constant dense<0.000000e+00> : vector<8x32xf32>
    %369 = tpu.matmul %358, %349, %cst_241 {dimension_numbers = #tpu.dot_dimension_numbers<[1], [0], [0], [1], [0, 0, 1, 1], [], []>} : vector<8x32xf32>, vector<32x32xf32>, vector<8x32xf32> -> vector<8x32xf32>
    %370 = vector.broadcast %355 : vector<1x32xf32> to vector<8x32xf32>
    %371 = arith.addf %369, %370 : vector<8x32xf32>
    %372 = arith.negf %363 : vector<8x32xf32>
    %373 = math.exp %372 : vector<8x32xf32>
    %cst_242 = arith.constant 1.000000e+00 : f32
    %374 = vector.broadcast %cst_242 : f32 to vector<8x32xf32>
    %375 = arith.addf %374, %373 : vector<8x32xf32>
    %376 = arith.divf %374, %375 : vector<8x32xf32>
    %377 = arith.negf %368 : vector<8x32xf32>
    %378 = math.exp %377 : vector<8x32xf32>
    %cst_243 = arith.constant 1.000000e+00 : f32
    %379 = vector.broadcast %cst_243 : f32 to vector<8x32xf32>
    %380 = arith.addf %379, %378 : vector<8x32xf32>
    %381 = arith.divf %379, %380 : vector<8x32xf32>
    %c0_244 = arith.constant 0 : index
    %c0_245 = arith.constant 0 : index
    %382 = vector.load %arg16[%c0_244, %c0_245] : memref<64x32xf32, #tpu.memory_space<vmem>>, vector<8x32xf32>
    %383 = arith.mulf %376, %371 : vector<8x32xf32>
    %384 = arith.addf %382, %383 : vector<8x32xf32>
    %385 = math.tanh %384 : vector<8x32xf32>
    %cst_246 = arith.constant 1.000000e+00 : f32
    %386 = vector.broadcast %cst_246 : f32 to vector<8x32xf32>
    %387 = arith.subf %386, %381 : vector<8x32xf32>
    %388 = arith.mulf %387, %385 : vector<8x32xf32>
    %389 = arith.mulf %381, %358 : vector<8x32xf32>
    %390 = arith.addf %388, %389 : vector<8x32xf32>
    %c0_247 = arith.constant 0 : index
    %c0_248 = arith.constant 0 : index
    %391 = vector.load %arg17[%c0_247, %c0_248] : memref<8x32xf32, #tpu.memory_space<vmem>>, vector<8x32xf32>
    tpu.vector_store %arg17[%c0_247, %c0_248], %390 {strides = array<i32>} : memref<8x32xf32, #tpu.memory_space<vmem>>, vector<8x32xf32>,
    %c0_249 = arith.constant 0 : index
    %c0_250 = arith.constant 0 : index
    %392 = vector.load %arg17[%c0_249, %c0_250] : memref<8x32xf32, #tpu.memory_space<vmem>>, vector<8x32xf32>
    %c8_251 = arith.constant 8 : index
    %c0_252 = arith.constant 0 : index
    %393 = vector.load %arg14[%c8_251, %c0_252] : memref<64x32xf32, #tpu.memory_space<vmem>>, vector<8x32xf32>
    %cst_253 = arith.constant dense<0.000000e+00> : vector<8x32xf32>
    %394 = tpu.matmul %392, %345, %cst_253 {dimension_numbers = #tpu.dot_dimension_numbers<[1], [0], [0], [1], [0, 0, 1, 1], [], []>} : vector<8x32xf32>, vector<32x32xf32>, vector<8x32xf32> -> vector<8x32xf32>
    %395 = arith.addf %393, %394 : vector<8x32xf32>
    %396 = vector.broadcast %351 : vector<1x32xf32> to vector<8x32xf32>
    %397 = arith.addf %395, %396 : vector<8x32xf32>
    %c8_254 = arith.constant 8 : index
    %c0_255 = arith.constant 0 : index
    %398 = vector.load %arg15[%c8_254, %c0_255] : memref<64x32xf32, #tpu.memory_space<vmem>>, vector<8x32xf32>
    %cst_256 = arith.constant dense<0.000000e+00> : vector<8x32xf32>
    %399 = tpu.matmul %392, %347, %cst_256 {dimension_numbers = #tpu.dot_dimension_numbers<[1], [0], [0], [1], [0, 0, 1, 1], [], []>} : vector<8x32xf32>, vector<32x32xf32>, vector<8x32xf32> -> vector<8x32xf32>
    %400 = arith.addf %398, %399 : vector<8x32xf32>
    %401 = vector.broadcast %353 : vector<1x32xf32> to vector<8x32xf32>
    %402 = arith.addf %400, %401 : vector<8x32xf32>
    %cst_257 = arith.constant dense<0.000000e+00> : vector<8x32xf32>
    %403 = tpu.matmul %392, %349, %cst_257 {dimension_numbers = #tpu.dot_dimension_numbers<[1], [0], [0], [1], [0, 0, 1, 1], [], []>} : vector<8x32xf32>, vector<32x32xf32>, vector<8x32xf32> -> vector<8x32xf32>
    %404 = vector.broadcast %355 : vector<1x32xf32> to vector<8x32xf32>
    %405 = arith.addf %403, %404 : vector<8x32xf32>
    %406 = arith.negf %397 : vector<8x32xf32>
    %407 = math.exp %406 : vector<8x32xf32>
    %cst_258 = arith.constant 1.000000e+00 : f32
    %408 = vector.broadcast %cst_258 : f32 to vector<8x32xf32>
    %409 = arith.addf %408, %407 : vector<8x32xf32>
    %410 = arith.divf %408, %409 : vector<8x32xf32>
    %411 = arith.negf %402 : vector<8x32xf32>
    %412 = math.exp %411 : vector<8x32xf32>
    %cst_259 = arith.constant 1.000000e+00 : f32
    %413 = vector.broadcast %cst_259 : f32 to vector<8x32xf32>
    %414 = arith.addf %413, %412 : vector<8x32xf32>
    %415 = arith.divf %413, %414 : vector<8x32xf32>
    %c8_260 = arith.constant 8 : index
    %c0_261 = arith.constant 0 : index
    %416 = vector.load %arg16[%c8_260, %c0_261] : memref<64x32xf32, #tpu.memory_space<vmem>>, vector<8x32xf32>
    %417 = arith.mulf %410, %405 : vector<8x32xf32>
    %418 = arith.addf %416, %417 : vector<8x32xf32>
    %419 = math.tanh %418 : vector<8x32xf32>
    %cst_262 = arith.constant 1.000000e+00 : f32
    %420 = vector.broadcast %cst_262 : f32 to vector<8x32xf32>
    %421 = arith.subf %420, %415 : vector<8x32xf32>
    %422 = arith.mulf %421, %419 : vector<8x32xf32>
    %423 = arith.mulf %415, %392 : vector<8x32xf32>
    %424 = arith.addf %422, %423 : vector<8x32xf32>
    %c0_263 = arith.constant 0 : index
    %c0_264 = arith.constant 0 : index
    %425 = vector.load %arg17[%c0_263, %c0_264] : memref<8x32xf32, #tpu.memory_space<vmem>>, vector<8x32xf32>
    tpu.vector_store %arg17[%c0_263, %c0_264], %424 {strides = array<i32>} : memref<8x32xf32, #tpu.memory_space<vmem>>, vector<8x32xf32>,
    %c0_265 = arith.constant 0 : index
    %c0_266 = arith.constant 0 : index
    %426 = vector.load %arg17[%c0_265, %c0_266] : memref<8x32xf32, #tpu.memory_space<vmem>>, vector<8x32xf32>
    %c16_267 = arith.constant 16 : index
    %c0_268 = arith.constant 0 : index
    %427 = vector.load %arg14[%c16_267, %c0_268] : memref<64x32xf32, #tpu.memory_space<vmem>>, vector<8x32xf32>
    %cst_269 = arith.constant dense<0.000000e+00> : vector<8x32xf32>
    %428 = tpu.matmul %426, %345, %cst_269 {dimension_numbers = #tpu.dot_dimension_numbers<[1], [0], [0], [1], [0, 0, 1, 1], [], []>} : vector<8x32xf32>, vector<32x32xf32>, vector<8x32xf32> -> vector<8x32xf32>
    %429 = arith.addf %427, %428 : vector<8x32xf32>
    %430 = vector.broadcast %351 : vector<1x32xf32> to vector<8x32xf32>
    %431 = arith.addf %429, %430 : vector<8x32xf32>
    %c16_270 = arith.constant 16 : index
    %c0_271 = arith.constant 0 : index
    %432 = vector.load %arg15[%c16_270, %c0_271] : memref<64x32xf32, #tpu.memory_space<vmem>>, vector<8x32xf32>
    %cst_272 = arith.constant dense<0.000000e+00> : vector<8x32xf32>
    %433 = tpu.matmul %426, %347, %cst_272 {dimension_numbers = #tpu.dot_dimension_numbers<[1], [0], [0], [1], [0, 0, 1, 1], [], []>} : vector<8x32xf32>, vector<32x32xf32>, vector<8x32xf32> -> vector<8x32xf32>
    %434 = arith.addf %432, %433 : vector<8x32xf32>
    %435 = vector.broadcast %353 : vector<1x32xf32> to vector<8x32xf32>
    %436 = arith.addf %434, %435 : vector<8x32xf32>
    %cst_273 = arith.constant dense<0.000000e+00> : vector<8x32xf32>
    %437 = tpu.matmul %426, %349, %cst_273 {dimension_numbers = #tpu.dot_dimension_numbers<[1], [0], [0], [1], [0, 0, 1, 1], [], []>} : vector<8x32xf32>, vector<32x32xf32>, vector<8x32xf32> -> vector<8x32xf32>
    %438 = vector.broadcast %355 : vector<1x32xf32> to vector<8x32xf32>
    %439 = arith.addf %437, %438 : vector<8x32xf32>
    %440 = arith.negf %431 : vector<8x32xf32>
    %441 = math.exp %440 : vector<8x32xf32>
    %cst_274 = arith.constant 1.000000e+00 : f32
    %442 = vector.broadcast %cst_274 : f32 to vector<8x32xf32>
    %443 = arith.addf %442, %441 : vector<8x32xf32>
    %444 = arith.divf %442, %443 : vector<8x32xf32>
    %445 = arith.negf %436 : vector<8x32xf32>
    %446 = math.exp %445 : vector<8x32xf32>
    %cst_275 = arith.constant 1.000000e+00 : f32
    %447 = vector.broadcast %cst_275 : f32 to vector<8x32xf32>
    %448 = arith.addf %447, %446 : vector<8x32xf32>
    %449 = arith.divf %447, %448 : vector<8x32xf32>
    %c16_276 = arith.constant 16 : index
    %c0_277 = arith.constant 0 : index
    %450 = vector.load %arg16[%c16_276, %c0_277] : memref<64x32xf32, #tpu.memory_space<vmem>>, vector<8x32xf32>
    %451 = arith.mulf %444, %439 : vector<8x32xf32>
    %452 = arith.addf %450, %451 : vector<8x32xf32>
    %453 = math.tanh %452 : vector<8x32xf32>
    %cst_278 = arith.constant 1.000000e+00 : f32
    %454 = vector.broadcast %cst_278 : f32 to vector<8x32xf32>
    %455 = arith.subf %454, %449 : vector<8x32xf32>
    %456 = arith.mulf %455, %453 : vector<8x32xf32>
    %457 = arith.mulf %449, %426 : vector<8x32xf32>
    %458 = arith.addf %456, %457 : vector<8x32xf32>
    %c0_279 = arith.constant 0 : index
    %c0_280 = arith.constant 0 : index
    %459 = vector.load %arg17[%c0_279, %c0_280] : memref<8x32xf32, #tpu.memory_space<vmem>>, vector<8x32xf32>
    tpu.vector_store %arg17[%c0_279, %c0_280], %458 {strides = array<i32>} : memref<8x32xf32, #tpu.memory_space<vmem>>, vector<8x32xf32>,
    %c0_281 = arith.constant 0 : index
    %c0_282 = arith.constant 0 : index
    %460 = vector.load %arg17[%c0_281, %c0_282] : memref<8x32xf32, #tpu.memory_space<vmem>>, vector<8x32xf32>
    %c24_283 = arith.constant 24 : index
    %c0_284 = arith.constant 0 : index
    %461 = vector.load %arg14[%c24_283, %c0_284] : memref<64x32xf32, #tpu.memory_space<vmem>>, vector<8x32xf32>
    %cst_285 = arith.constant dense<0.000000e+00> : vector<8x32xf32>
    %462 = tpu.matmul %460, %345, %cst_285 {dimension_numbers = #tpu.dot_dimension_numbers<[1], [0], [0], [1], [0, 0, 1, 1], [], []>} : vector<8x32xf32>, vector<32x32xf32>, vector<8x32xf32> -> vector<8x32xf32>
    %463 = arith.addf %461, %462 : vector<8x32xf32>
    %464 = vector.broadcast %351 : vector<1x32xf32> to vector<8x32xf32>
    %465 = arith.addf %463, %464 : vector<8x32xf32>
    %c24_286 = arith.constant 24 : index
    %c0_287 = arith.constant 0 : index
    %466 = vector.load %arg15[%c24_286, %c0_287] : memref<64x32xf32, #tpu.memory_space<vmem>>, vector<8x32xf32>
    %cst_288 = arith.constant dense<0.000000e+00> : vector<8x32xf32>
    %467 = tpu.matmul %460, %347, %cst_288 {dimension_numbers = #tpu.dot_dimension_numbers<[1], [0], [0], [1], [0, 0, 1, 1], [], []>} : vector<8x32xf32>, vector<32x32xf32>, vector<8x32xf32> -> vector<8x32xf32>
    %468 = arith.addf %466, %467 : vector<8x32xf32>
    %469 = vector.broadcast %353 : vector<1x32xf32> to vector<8x32xf32>
    %470 = arith.addf %468, %469 : vector<8x32xf32>
    %cst_289 = arith.constant dense<0.000000e+00> : vector<8x32xf32>
    %471 = tpu.matmul %460, %349, %cst_289 {dimension_numbers = #tpu.dot_dimension_numbers<[1], [0], [0], [1], [0, 0, 1, 1], [], []>} : vector<8x32xf32>, vector<32x32xf32>, vector<8x32xf32> -> vector<8x32xf32>
    %472 = vector.broadcast %355 : vector<1x32xf32> to vector<8x32xf32>
    %473 = arith.addf %471, %472 : vector<8x32xf32>
    %474 = arith.negf %465 : vector<8x32xf32>
    %475 = math.exp %474 : vector<8x32xf32>
    %cst_290 = arith.constant 1.000000e+00 : f32
    %476 = vector.broadcast %cst_290 : f32 to vector<8x32xf32>
    %477 = arith.addf %476, %475 : vector<8x32xf32>
    %478 = arith.divf %476, %477 : vector<8x32xf32>
    %479 = arith.negf %470 : vector<8x32xf32>
    %480 = math.exp %479 : vector<8x32xf32>
    %cst_291 = arith.constant 1.000000e+00 : f32
    %481 = vector.broadcast %cst_291 : f32 to vector<8x32xf32>
    %482 = arith.addf %481, %480 : vector<8x32xf32>
    %483 = arith.divf %481, %482 : vector<8x32xf32>
    %c24_292 = arith.constant 24 : index
    %c0_293 = arith.constant 0 : index
    %484 = vector.load %arg16[%c24_292, %c0_293] : memref<64x32xf32, #tpu.memory_space<vmem>>, vector<8x32xf32>
    %485 = arith.mulf %478, %473 : vector<8x32xf32>
    %486 = arith.addf %484, %485 : vector<8x32xf32>
    %487 = math.tanh %486 : vector<8x32xf32>
    %cst_294 = arith.constant 1.000000e+00 : f32
    %488 = vector.broadcast %cst_294 : f32 to vector<8x32xf32>
    %489 = arith.subf %488, %483 : vector<8x32xf32>
    %490 = arith.mulf %489, %487 : vector<8x32xf32>
    %491 = arith.mulf %483, %460 : vector<8x32xf32>
    %492 = arith.addf %490, %491 : vector<8x32xf32>
    %c0_295 = arith.constant 0 : index
    %c0_296 = arith.constant 0 : index
    %493 = vector.load %arg17[%c0_295, %c0_296] : memref<8x32xf32, #tpu.memory_space<vmem>>, vector<8x32xf32>
    tpu.vector_store %arg17[%c0_295, %c0_296], %492 {strides = array<i32>} : memref<8x32xf32, #tpu.memory_space<vmem>>, vector<8x32xf32>,
    %c0_297 = arith.constant 0 : index
    %c0_298 = arith.constant 0 : index
    %494 = vector.load %arg17[%c0_297, %c0_298] : memref<8x32xf32, #tpu.memory_space<vmem>>, vector<8x32xf32>
    %c32_299 = arith.constant 32 : index
    %c0_300 = arith.constant 0 : index
    %495 = vector.load %arg14[%c32_299, %c0_300] : memref<64x32xf32, #tpu.memory_space<vmem>>, vector<8x32xf32>
    %cst_301 = arith.constant dense<0.000000e+00> : vector<8x32xf32>
    %496 = tpu.matmul %494, %345, %cst_301 {dimension_numbers = #tpu.dot_dimension_numbers<[1], [0], [0], [1], [0, 0, 1, 1], [], []>} : vector<8x32xf32>, vector<32x32xf32>, vector<8x32xf32> -> vector<8x32xf32>
    %497 = arith.addf %495, %496 : vector<8x32xf32>
    %498 = vector.broadcast %351 : vector<1x32xf32> to vector<8x32xf32>
    %499 = arith.addf %497, %498 : vector<8x32xf32>
    %c32_302 = arith.constant 32 : index
    %c0_303 = arith.constant 0 : index
    %500 = vector.load %arg15[%c32_302, %c0_303] : memref<64x32xf32, #tpu.memory_space<vmem>>, vector<8x32xf32>
    %cst_304 = arith.constant dense<0.000000e+00> : vector<8x32xf32>
    %501 = tpu.matmul %494, %347, %cst_304 {dimension_numbers = #tpu.dot_dimension_numbers<[1], [0], [0], [1], [0, 0, 1, 1], [], []>} : vector<8x32xf32>, vector<32x32xf32>, vector<8x32xf32> -> vector<8x32xf32>
    %502 = arith.addf %500, %501 : vector<8x32xf32>
    %503 = vector.broadcast %353 : vector<1x32xf32> to vector<8x32xf32>
    %504 = arith.addf %502, %503 : vector<8x32xf32>
    %cst_305 = arith.constant dense<0.000000e+00> : vector<8x32xf32>
    %505 = tpu.matmul %494, %349, %cst_305 {dimension_numbers = #tpu.dot_dimension_numbers<[1], [0], [0], [1], [0, 0, 1, 1], [], []>} : vector<8x32xf32>, vector<32x32xf32>, vector<8x32xf32> -> vector<8x32xf32>
    %506 = vector.broadcast %355 : vector<1x32xf32> to vector<8x32xf32>
    %507 = arith.addf %505, %506 : vector<8x32xf32>
    %508 = arith.negf %499 : vector<8x32xf32>
    %509 = math.exp %508 : vector<8x32xf32>
    %cst_306 = arith.constant 1.000000e+00 : f32
    %510 = vector.broadcast %cst_306 : f32 to vector<8x32xf32>
    %511 = arith.addf %510, %509 : vector<8x32xf32>
    %512 = arith.divf %510, %511 : vector<8x32xf32>
    %513 = arith.negf %504 : vector<8x32xf32>
    %514 = math.exp %513 : vector<8x32xf32>
    %cst_307 = arith.constant 1.000000e+00 : f32
    %515 = vector.broadcast %cst_307 : f32 to vector<8x32xf32>
    %516 = arith.addf %515, %514 : vector<8x32xf32>
    %517 = arith.divf %515, %516 : vector<8x32xf32>
    %c32_308 = arith.constant 32 : index
    %c0_309 = arith.constant 0 : index
    %518 = vector.load %arg16[%c32_308, %c0_309] : memref<64x32xf32, #tpu.memory_space<vmem>>, vector<8x32xf32>
    %519 = arith.mulf %512, %507 : vector<8x32xf32>
    %520 = arith.addf %518, %519 : vector<8x32xf32>
    %521 = math.tanh %520 : vector<8x32xf32>
    %cst_310 = arith.constant 1.000000e+00 : f32
    %522 = vector.broadcast %cst_310 : f32 to vector<8x32xf32>
    %523 = arith.subf %522, %517 : vector<8x32xf32>
    %524 = arith.mulf %523, %521 : vector<8x32xf32>
    %525 = arith.mulf %517, %494 : vector<8x32xf32>
    %526 = arith.addf %524, %525 : vector<8x32xf32>
    %c0_311 = arith.constant 0 : index
    %c0_312 = arith.constant 0 : index
    %527 = vector.load %arg17[%c0_311, %c0_312] : memref<8x32xf32, #tpu.memory_space<vmem>>, vector<8x32xf32>
    tpu.vector_store %arg17[%c0_311, %c0_312], %526 {strides = array<i32>} : memref<8x32xf32, #tpu.memory_space<vmem>>, vector<8x32xf32>,
    %c0_313 = arith.constant 0 : index
    %c0_314 = arith.constant 0 : index
    %528 = vector.load %arg17[%c0_313, %c0_314] : memref<8x32xf32, #tpu.memory_space<vmem>>, vector<8x32xf32>
    %c40_315 = arith.constant 40 : index
    %c0_316 = arith.constant 0 : index
    %529 = vector.load %arg14[%c40_315, %c0_316] : memref<64x32xf32, #tpu.memory_space<vmem>>, vector<8x32xf32>
    %cst_317 = arith.constant dense<0.000000e+00> : vector<8x32xf32>
    %530 = tpu.matmul %528, %345, %cst_317 {dimension_numbers = #tpu.dot_dimension_numbers<[1], [0], [0], [1], [0, 0, 1, 1], [], []>} : vector<8x32xf32>, vector<32x32xf32>, vector<8x32xf32> -> vector<8x32xf32>
    %531 = arith.addf %529, %530 : vector<8x32xf32>
    %532 = vector.broadcast %351 : vector<1x32xf32> to vector<8x32xf32>
    %533 = arith.addf %531, %532 : vector<8x32xf32>
    %c40_318 = arith.constant 40 : index
    %c0_319 = arith.constant 0 : index
    %534 = vector.load %arg15[%c40_318, %c0_319] : memref<64x32xf32, #tpu.memory_space<vmem>>, vector<8x32xf32>
    %cst_320 = arith.constant dense<0.000000e+00> : vector<8x32xf32>
    %535 = tpu.matmul %528, %347, %cst_320 {dimension_numbers = #tpu.dot_dimension_numbers<[1], [0], [0], [1], [0, 0, 1, 1], [], []>} : vector<8x32xf32>, vector<32x32xf32>, vector<8x32xf32> -> vector<8x32xf32>
    %536 = arith.addf %534, %535 : vector<8x32xf32>
    %537 = vector.broadcast %353 : vector<1x32xf32> to vector<8x32xf32>
    %538 = arith.addf %536, %537 : vector<8x32xf32>
    %cst_321 = arith.constant dense<0.000000e+00> : vector<8x32xf32>
    %539 = tpu.matmul %528, %349, %cst_321 {dimension_numbers = #tpu.dot_dimension_numbers<[1], [0], [0], [1], [0, 0, 1, 1], [], []>} : vector<8x32xf32>, vector<32x32xf32>, vector<8x32xf32> -> vector<8x32xf32>
    %540 = vector.broadcast %355 : vector<1x32xf32> to vector<8x32xf32>
    %541 = arith.addf %539, %540 : vector<8x32xf32>
    %542 = arith.negf %533 : vector<8x32xf32>
    %543 = math.exp %542 : vector<8x32xf32>
    %cst_322 = arith.constant 1.000000e+00 : f32
    %544 = vector.broadcast %cst_322 : f32 to vector<8x32xf32>
    %545 = arith.addf %544, %543 : vector<8x32xf32>
    %546 = arith.divf %544, %545 : vector<8x32xf32>
    %547 = arith.negf %538 : vector<8x32xf32>
    %548 = math.exp %547 : vector<8x32xf32>
    %cst_323 = arith.constant 1.000000e+00 : f32
    %549 = vector.broadcast %cst_323 : f32 to vector<8x32xf32>
    %550 = arith.addf %549, %548 : vector<8x32xf32>
    %551 = arith.divf %549, %550 : vector<8x32xf32>
    %c40_324 = arith.constant 40 : index
    %c0_325 = arith.constant 0 : index
    %552 = vector.load %arg16[%c40_324, %c0_325] : memref<64x32xf32, #tpu.memory_space<vmem>>, vector<8x32xf32>
    %553 = arith.mulf %546, %541 : vector<8x32xf32>
    %554 = arith.addf %552, %553 : vector<8x32xf32>
    %555 = math.tanh %554 : vector<8x32xf32>
    %cst_326 = arith.constant 1.000000e+00 : f32
    %556 = vector.broadcast %cst_326 : f32 to vector<8x32xf32>
    %557 = arith.subf %556, %551 : vector<8x32xf32>
    %558 = arith.mulf %557, %555 : vector<8x32xf32>
    %559 = arith.mulf %551, %528 : vector<8x32xf32>
    %560 = arith.addf %558, %559 : vector<8x32xf32>
    %c0_327 = arith.constant 0 : index
    %c0_328 = arith.constant 0 : index
    %561 = vector.load %arg17[%c0_327, %c0_328] : memref<8x32xf32, #tpu.memory_space<vmem>>, vector<8x32xf32>
    tpu.vector_store %arg17[%c0_327, %c0_328], %560 {strides = array<i32>} : memref<8x32xf32, #tpu.memory_space<vmem>>, vector<8x32xf32>,
    %c0_329 = arith.constant 0 : index
    %c0_330 = arith.constant 0 : index
    %562 = vector.load %arg17[%c0_329, %c0_330] : memref<8x32xf32, #tpu.memory_space<vmem>>, vector<8x32xf32>
    %c48_331 = arith.constant 48 : index
    %c0_332 = arith.constant 0 : index
    %563 = vector.load %arg14[%c48_331, %c0_332] : memref<64x32xf32, #tpu.memory_space<vmem>>, vector<8x32xf32>
    %cst_333 = arith.constant dense<0.000000e+00> : vector<8x32xf32>
    %564 = tpu.matmul %562, %345, %cst_333 {dimension_numbers = #tpu.dot_dimension_numbers<[1], [0], [0], [1], [0, 0, 1, 1], [], []>} : vector<8x32xf32>, vector<32x32xf32>, vector<8x32xf32> -> vector<8x32xf32>
    %565 = arith.addf %563, %564 : vector<8x32xf32>
    %566 = vector.broadcast %351 : vector<1x32xf32> to vector<8x32xf32>
    %567 = arith.addf %565, %566 : vector<8x32xf32>
    %c48_334 = arith.constant 48 : index
    %c0_335 = arith.constant 0 : index
    %568 = vector.load %arg15[%c48_334, %c0_335] : memref<64x32xf32, #tpu.memory_space<vmem>>, vector<8x32xf32>
    %cst_336 = arith.constant dense<0.000000e+00> : vector<8x32xf32>
    %569 = tpu.matmul %562, %347, %cst_336 {dimension_numbers = #tpu.dot_dimension_numbers<[1], [0], [0], [1], [0, 0, 1, 1], [], []>} : vector<8x32xf32>, vector<32x32xf32>, vector<8x32xf32> -> vector<8x32xf32>
    %570 = arith.addf %568, %569 : vector<8x32xf32>
    %571 = vector.broadcast %353 : vector<1x32xf32> to vector<8x32xf32>
    %572 = arith.addf %570, %571 : vector<8x32xf32>
    %cst_337 = arith.constant dense<0.000000e+00> : vector<8x32xf32>
    %573 = tpu.matmul %562, %349, %cst_337 {dimension_numbers = #tpu.dot_dimension_numbers<[1], [0], [0], [1], [0, 0, 1, 1], [], []>} : vector<8x32xf32>, vector<32x32xf32>, vector<8x32xf32> -> vector<8x32xf32>
    %574 = vector.broadcast %355 : vector<1x32xf32> to vector<8x32xf32>
    %575 = arith.addf %573, %574 : vector<8x32xf32>
    %576 = arith.negf %567 : vector<8x32xf32>
    %577 = math.exp %576 : vector<8x32xf32>
    %cst_338 = arith.constant 1.000000e+00 : f32
    %578 = vector.broadcast %cst_338 : f32 to vector<8x32xf32>
    %579 = arith.addf %578, %577 : vector<8x32xf32>
    %580 = arith.divf %578, %579 : vector<8x32xf32>
    %581 = arith.negf %572 : vector<8x32xf32>
    %582 = math.exp %581 : vector<8x32xf32>
    %cst_339 = arith.constant 1.000000e+00 : f32
    %583 = vector.broadcast %cst_339 : f32 to vector<8x32xf32>
    %584 = arith.addf %583, %582 : vector<8x32xf32>
    %585 = arith.divf %583, %584 : vector<8x32xf32>
    %c48_340 = arith.constant 48 : index
    %c0_341 = arith.constant 0 : index
    %586 = vector.load %arg16[%c48_340, %c0_341] : memref<64x32xf32, #tpu.memory_space<vmem>>, vector<8x32xf32>
    %587 = arith.mulf %580, %575 : vector<8x32xf32>
    %588 = arith.addf %586, %587 : vector<8x32xf32>
    %589 = math.tanh %588 : vector<8x32xf32>
    %cst_342 = arith.constant 1.000000e+00 : f32
    %590 = vector.broadcast %cst_342 : f32 to vector<8x32xf32>
    %591 = arith.subf %590, %585 : vector<8x32xf32>
    %592 = arith.mulf %591, %589 : vector<8x32xf32>
    %593 = arith.mulf %585, %562 : vector<8x32xf32>
    %594 = arith.addf %592, %593 : vector<8x32xf32>
    %c0_343 = arith.constant 0 : index
    %c0_344 = arith.constant 0 : index
    %595 = vector.load %arg17[%c0_343, %c0_344] : memref<8x32xf32, #tpu.memory_space<vmem>>, vector<8x32xf32>
    tpu.vector_store %arg17[%c0_343, %c0_344], %594 {strides = array<i32>} : memref<8x32xf32, #tpu.memory_space<vmem>>, vector<8x32xf32>,
    %c0_345 = arith.constant 0 : index
    %c0_346 = arith.constant 0 : index
    %596 = vector.load %arg17[%c0_345, %c0_346] : memref<8x32xf32, #tpu.memory_space<vmem>>, vector<8x32xf32>
    %c56_347 = arith.constant 56 : index
    %c0_348 = arith.constant 0 : index
    %597 = vector.load %arg14[%c56_347, %c0_348] : memref<64x32xf32, #tpu.memory_space<vmem>>, vector<8x32xf32>
    %cst_349 = arith.constant dense<0.000000e+00> : vector<8x32xf32>
    %598 = tpu.matmul %596, %345, %cst_349 {dimension_numbers = #tpu.dot_dimension_numbers<[1], [0], [0], [1], [0, 0, 1, 1], [], []>} : vector<8x32xf32>, vector<32x32xf32>, vector<8x32xf32> -> vector<8x32xf32>
    %599 = arith.addf %597, %598 : vector<8x32xf32>
    %600 = vector.broadcast %351 : vector<1x32xf32> to vector<8x32xf32>
    %601 = arith.addf %599, %600 : vector<8x32xf32>
    %c56_350 = arith.constant 56 : index
    %c0_351 = arith.constant 0 : index
    %602 = vector.load %arg15[%c56_350, %c0_351] : memref<64x32xf32, #tpu.memory_space<vmem>>, vector<8x32xf32>
    %cst_352 = arith.constant dense<0.000000e+00> : vector<8x32xf32>
    %603 = tpu.matmul %596, %347, %cst_352 {dimension_numbers = #tpu.dot_dimension_numbers<[1], [0], [0], [1], [0, 0, 1, 1], [], []>} : vector<8x32xf32>, vector<32x32xf32>, vector<8x32xf32> -> vector<8x32xf32>
    %604 = arith.addf %602, %603 : vector<8x32xf32>
    %605 = vector.broadcast %353 : vector<1x32xf32> to vector<8x32xf32>
    %606 = arith.addf %604, %605 : vector<8x32xf32>
    %cst_353 = arith.constant dense<0.000000e+00> : vector<8x32xf32>
    %607 = tpu.matmul %596, %349, %cst_353 {dimension_numbers = #tpu.dot_dimension_numbers<[1], [0], [0], [1], [0, 0, 1, 1], [], []>} : vector<8x32xf32>, vector<32x32xf32>, vector<8x32xf32> -> vector<8x32xf32>
    %608 = vector.broadcast %355 : vector<1x32xf32> to vector<8x32xf32>
    %609 = arith.addf %607, %608 : vector<8x32xf32>
    %610 = arith.negf %601 : vector<8x32xf32>
    %611 = math.exp %610 : vector<8x32xf32>
    %cst_354 = arith.constant 1.000000e+00 : f32
    %612 = vector.broadcast %cst_354 : f32 to vector<8x32xf32>
    %613 = arith.addf %612, %611 : vector<8x32xf32>
    %614 = arith.divf %612, %613 : vector<8x32xf32>
    %615 = arith.negf %606 : vector<8x32xf32>
    %616 = math.exp %615 : vector<8x32xf32>
    %cst_355 = arith.constant 1.000000e+00 : f32
    %617 = vector.broadcast %cst_355 : f32 to vector<8x32xf32>
    %618 = arith.addf %617, %616 : vector<8x32xf32>
    %619 = arith.divf %617, %618 : vector<8x32xf32>
    %c56_356 = arith.constant 56 : index
    %c0_357 = arith.constant 0 : index
    %620 = vector.load %arg16[%c56_356, %c0_357] : memref<64x32xf32, #tpu.memory_space<vmem>>, vector<8x32xf32>
    %621 = arith.mulf %614, %609 : vector<8x32xf32>
    %622 = arith.addf %620, %621 : vector<8x32xf32>
    %623 = math.tanh %622 : vector<8x32xf32>
    %cst_358 = arith.constant 1.000000e+00 : f32
    %624 = vector.broadcast %cst_358 : f32 to vector<8x32xf32>
    %625 = arith.subf %624, %619 : vector<8x32xf32>
    %626 = arith.mulf %625, %623 : vector<8x32xf32>
    %627 = arith.mulf %619, %596 : vector<8x32xf32>
    %628 = arith.addf %626, %627 : vector<8x32xf32>
    %c0_359 = arith.constant 0 : index
    %c0_360 = arith.constant 0 : index
    %629 = vector.load %arg17[%c0_359, %c0_360] : memref<8x32xf32, #tpu.memory_space<vmem>>, vector<8x32xf32>
    tpu.vector_store %arg17[%c0_359, %c0_360], %628 {strides = array<i32>} : memref<8x32xf32, #tpu.memory_space<vmem>>, vector<8x32xf32>,
    %c0_361 = arith.constant 0 : index
    %c0_362 = arith.constant 0 : index
    %630 = vector.load %arg17[%c0_361, %c0_362] : memref<8x32xf32, #tpu.memory_space<vmem>>, vector<8x32xf32>
    %c0_363 = arith.constant 0 : index
    %c0_364 = arith.constant 0 : index
    %631 = vector.load %arg9[%c0_363, %c0_364] : memref<32x6xf32, #tpu.memory_space<vmem>>, vector<32x6xf32>
    %cst_365 = arith.constant dense<0.000000e+00> : vector<8x6xf32>
    %632 = tpu.matmul %630, %631, %cst_365 {dimension_numbers = #tpu.dot_dimension_numbers<[1], [0], [0], [1], [0, 0, 1, 1], [], []>} : vector<8x32xf32>, vector<32x6xf32>, vector<8x6xf32> -> vector<8x6xf32>
    %c0_366 = arith.constant 0 : index
    %c0_367 = arith.constant 0 : index
    %633 = vector.load %arg10[%c0_366, %c0_367] : memref<1x6xf32, #tpu.memory_space<vmem>>, vector<1x6xf32>
    %634 = vector.broadcast %633 : vector<1x6xf32> to vector<8x6xf32>
    %635 = arith.addf %632, %634 : vector<8x6xf32>
    %cst_368 = arith.constant dense<0xFF800000> : vector<8xf32>
    %636 = vector.multi_reduction <maximumf>, %635, %cst_368 [1] : vector<8x6xf32> to vector<8xf32>
    %637 = vector.shape_cast %636 : vector<8xf32> to vector<8x1xf32>
    %638 = vector.broadcast %637 : vector<8x1xf32> to vector<8x6xf32>
    %639 = arith.subf %635, %638 : vector<8x6xf32>
    %640 = math.exp %639 : vector<8x6xf32>
    %cst_369 = arith.constant dense<0.000000e+00> : vector<8xf32>
    %641 = vector.multi_reduction <add>, %640, %cst_369 [1] : vector<8x6xf32> to vector<8xf32>
    %642 = vector.shape_cast %641 : vector<8xf32> to vector<8x1xf32>
    %643 = vector.broadcast %642 : vector<8x1xf32> to vector<8x6xf32>
    %644 = arith.divf %640, %643 : vector<8x6xf32>
    %c0_370 = arith.constant 0 : index
    %c0_371 = arith.constant 0 : index
    %645 = vector.load %arg11[%c0_370, %c0_371] : memref<8x6xf32, #tpu.memory_space<vmem>>, vector<8x6xf32>
    tpu.vector_store %arg11[%c0_370, %c0_371], %644 {strides = array<i32>} : memref<8x6xf32, #tpu.memory_space<vmem>>, vector<8x6xf32>,
    return
  }
}

</mosaic_0001>

<bundles_post_ra>
// kernel: tpu_custom_call.1
= control target key start
LH: loop header
LB: loop body
LE: loop exit
PB: predicated region body
PF: predicated region fallthrough
CT: control target
= control target key end

     0   :  { %16 = vsyncpa [#allocation9], 0  ;;  %s7467_s0 = inlined_call_operand.vmem [shape: f32[64,4], index: 0, kind: input, shape index: {}]   ;;  %s7468_s1 = inlined_call_operand.vmem [shape: f32[3,4,32], index: 1, kind: input, shape index: {}]   ;;  %s7469_s2 = inlined_call_operand.vmem [shape: f32[3,32,32], index: 2, kind: input, shape index: {}]   ;;  %s7470_s3 = inlined_call_operand.vmem [shape: f32[3,1,32], index: 3, kind: input, shape index: {}]   ;;  %s7471_s4 = inlined_call_operand.vmem [shape: f32[3,1,32], index: 4, kind: input, shape index: {}]   ;;  %s7472_s5 = inlined_call_operand.hbm [shape: f32[3,32,32], index: 5, kind: input, shape index: {}]   ;;  %s7473_s6 = inlined_call_operand.hbm [shape: f32[3,32,32], index: 6, kind: input, shape index: {}]   ;;  %s7474_s7 = inlined_call_operand.hbm [shape: f32[3,1,32], index: 7, kind: input, shape index: {}]   ;;  %s7475_s8 = inlined_call_operand.hbm [shape: f32[3,1,32], index: 8, kind: input, shape index: {}]   ;;  %s7476_s9 = inlined_call_operand.vmem [shape: f32[32,6], index: 9, kind: input, shape index: {}]   ;;  %s7477_s10 = inlined_call_operand.vmem [shape: f32[1,6], index: 10, kind: input, shape index: {}]   ;;  %s7478_s11 = inlined_call_operand.hbm [shape: f32[8,6], index: 11, kind: output, shape index: {}]  }
   0x1   :  { %17 = vsyncpa [#allocation12], 0 }
   0x2   :  { %18 = vsyncpa [#allocation15], 0 }
   0x3   :  { %19 = vsyncpa [#allocation10], 0  ;;  %s6383_s17 = smov [#allocation11]   ;;  %s6384_s19 = smov [#allocation8]  }
   0x4   :  { %s47_s18 = sshll.u32 %s6383_s17, 4  ;;  %s35_s20 = sshll.u32 %s6384_s19, 4  ;;  %s48_s18 = int_to_ptr.vmem [resolvable:$true] %s47_s18  ;;  %s36_s20 = int_to_ptr.vmem [resolvable:$true] %s35_s20 }
   0x5   :  { %s6283_s21 = scalar_lea.vmem %s48_s18, 1536  ;;  %p6288_p1 = scmp.lt.s32.totalorder %s48_s18, %s48_s18 }
   0x6   :  { %p6284_p0 = scmp.ne.s32.totalorder %s48_s18, %s6283_s21  ;;  %p6289_p2 = scmp.lt.s32.totalorder %s6283_s21, %s6283_s21 }
   0x8   :  { %p6290_p3 = por %p6289_p2, %p6288_p1 }
   0xa   :  { %p6291_p4 = pnand %p6290_p3, %p6284_p0 }
   0xc   :  { %6294 = shalt.err (!%p6291_p4)
}
   0xd   :  { %s6385_s22 = smov 128   ;;  %s6386_s23 = smov 8  }
   0xe   :  { %53 = dma.hbm_to_vmem [thread:$0]  %s7473_s6, 1536, %s48_s18, [#allocation12], %s6385_s22, %s6385_s22, %s6386_s23  }
   0xf   :  { %s6303_s26 = scalar_lea.vmem %s36_s20, 1536  ;;  %p6308_p6 = scmp.lt.s32.totalorder %s36_s20, %s36_s20 }
  0x10   :  { %p6304_p5 = scmp.ne.s32.totalorder %s36_s20, %s6303_s26  ;;  %p6309_p7 = scmp.lt.s32.totalorder %s6303_s26, %s6303_s26 }
  0x12   :  { %p6310_p8 = por %p6309_p7, %p6308_p6 }
  0x14   :  { %p6311_p9 = pnand %p6310_p8, %p6304_p5 }
  0x16   :  { %6314 = shalt.err (!%p6311_p9)
}
  0x17   :  { %41 = dma.hbm_to_vmem [thread:$0]  %s7472_s5, 1536, %s36_s20, [#allocation9], %s6385_s22, %s6385_s22, %s6386_s23  }
  0x18   :  { %s6387_s29 = smov [#allocation13]  }
  0x19   :  { %s59_s30 = sshll.u32 %s6387_s29, 4  ;;  %s60_s30 = int_to_ptr.vmem [resolvable:$true] %s59_s30 }
  0x1a   :  { %s6323_s12 = scalar_lea.vmem %s60_s30, 48  ;;  %s6327_s13 = scalar_lea.vmem %s60_s30, 64 }
  0x1b   :  { %p6324_p10 = scmp.ne.s32.totalorder %s60_s30, %s6323_s12  ;;  %p6328_p11 = scmp.lt.s32.totalorder %s60_s30, %s60_s30 }
  0x1c   :  { %p6329_p12 = scmp.lt.s32.totalorder %s6327_s13, %s6323_s12 }
  0x1e   :  { %p6330_p13 = por %p6329_p12, %p6328_p11 }
  0x20   :  { %p6331_p0 = pnand %p6330_p13, %p6324_p10 }
  0x22   :  { %6334 = shalt.err (!%p6331_p0)
}
  0x23   :  { %s6388_s6 = smov 16   ;;  %s6389_s14 = smov 1  }
  0x24   :  { %65 = dma.hbm_to_vmem [thread:$0]  %s7474_s7, 48, %s60_s30, [#allocation12], %s6388_s6, %s6388_s6, %s6389_s14  }
  0x25   :  { %s6390_s17 = smov [#allocation14]  }
  0x26   :  { %s71_s18 = sshll.u32 %s6390_s17, 4  ;;  %s72_s18 = int_to_ptr.vmem [resolvable:$true] %s71_s18 }
  0x27   :  { %s6343_s5 = scalar_lea.vmem %s72_s18, 48  ;;  %s6347_s19 = scalar_lea.vmem %s72_s18, 64 }
  0x28   :  { %p6344_p1 = scmp.ne.s32.totalorder %s72_s18, %s6343_s5  ;;  %p6348_p2 = scmp.lt.s32.totalorder %s72_s18, %s72_s18 }
  0x29   :  { %p6349_p3 = scmp.lt.s32.totalorder %s6347_s19, %s6343_s5 }
  0x2b   :  { %p6350_p4 = por %p6349_p3, %p6348_p2 }
  0x2d   :  { %p6351_p5 = pnand %p6350_p4, %p6344_p1 }
  0x2f   :  { %6354 = shalt.err (!%p6351_p5)
}
  0x30   :  { %77 = dma.hbm_to_vmem [thread:$0]  %s7475_s8, 48, %s72_s18, [#allocation15], %s6388_s6, %s6388_s6, %s6389_s14  }
  0x31   :  { %6375 = dma.done.wait [#allocation9], 1536  }
  0x32   :  { %6376 = vsyncadd [#allocation9], 4294965760 }
  0x33   :  { %6377 = dma.done.wait [#allocation12], 1584  }
  0x34   :  { %6378 = vsyncadd [#allocation12], 4294965712 }
  0x35   :  { %6379 = dma.done.wait [#allocation15], 48  }
  0x36   :  { %6380 = vsyncadd [#allocation15], 4294967248  ;;  %vm244_vm0 = vcmask 261120   ;;  %v6391_v0 = vmov 0.0   ;;  %vm135_vm1 = vcmask 1043456   ;;  %vm110_vm2 = vcmask 31744  }
  0x37   :  { %524 = vst.msk [vmem:[#allocation7] sm:$0xff] %vm244_vm0, %v6391_v0  ;;  %v102_v1 = vld [vmem:[%s7468_s1] sm:$0xf]  ;;  %v6474_v2 = vld [vmem:[%s7467_s0 + $0x30] sm:$0xff]  ;;  %v6479_v3 = vld [vmem:[%s7467_s0 + $0x38] sm:$0xff]  ;;  %vm6392_vm3 = vmmov 0  }
  0x38   :  { %6076 = vmatprep.subr.msk.mxu1 %vm135_vm1, %v102_v1  ;;  %5446 = vmatprep.mubr.msk.f32.mxu1 %vm110_vm2, %v6474_v2  ;;  %v4978_v4 = vld [vmem:[%s7468_s1 + $0x4] sm:$0xf]  ;;  %v95_v6 = vld [vmem:[%s7467_s0 + $0x8] sm:$0xff]  ;;  %v6504_v7 = vld [vmem:[%s7469_s2 + $0x18] sm:$0xff]  ;;  %vm4938_vm4 = vcmask 48128   ;;  %s6393_s18 = smov [#allocation16]  }
  0x39   :  { %v94_v5 = vld [vmem:[%s7467_s0] sm:$0xff]  ;;  %6077 = vmatpush3.msk.msra.mxu1 %vm135_vm1, %v102_v1  ;;  %5435 = vmatprep.subr.msk.mxu0 %vm135_vm1, %v102_v1  ;;  %v96_v8 = vld [vmem:[%s7467_s0 + $0x10] sm:$0xff]  ;;  %v4990_v9 = vld [vmem:[%s7468_s1 + $0x8] sm:$0xf]  ;;  %s4957_s5 = sshll.u32 %s6393_s18, 4  ;;  %s4958_s5 = int_to_ptr.vmem [resolvable:$true] %s4957_s5 }
  0x3a   :  { %5447 = vmatmul.mubr.msk.f32.vlgmr.msra.gmra.mxu1 %vm110_vm2, %v6479_v3  ;;  %5449 = vmatprep.subr.msk.mxu1 %vm135_vm1, %v4978_v4  ;;  %v6519_v10 = vld [vmem:[%s7469_s2 + $0x10] sm:$0xff]  ;;  %v97_v11 = vld [vmem:[%s7467_s0 + $0x18] sm:$0xff]  ;;  %v98_v12 = vld [vmem:[%s7467_s0 + $0x20] sm:$0xff]  ;;  %p6360_p7 = scmp.lt.s32.totalorder %s4958_s5, %s4958_s5 }
  0x3b   :  { %5450 = vmatpush3.msk.msra.mxu1 %vm135_vm1, %v4978_v4  ;;  %5451 = vmatprep.mubr.msk.f32.mxu1 %vm110_vm2, %v94_v5  ;;  %v6533_v13 = vld [vmem:[%s7469_s2 + $0x8] sm:$0xff]  ;;  %v6543_v14 = vld [vmem:[%s7469_s2] sm:$0xff]  ;;  %v6571_v17 = vld [vmem:[%s7469_s2 + $0x58] sm:$0xff] }
  0x3c   :  { %5477 = vmatprep.subr.mxu1 %v6391_v0  ;;  %5436 = vmatpush3.msk.msra.mxu0 %vm135_vm1, %v102_v1  ;;  %v99_v15 = vld [vmem:[%s7467_s0 + $0x28] sm:$0xff]  ;;  %v6576_v18 = vld [vmem:[%s7469_s2 + $0x38] sm:$0xff]  ;;  %v6584_v19 = vld [vmem:[%s7469_s2 + $0x30] sm:$0xff] }
  0x3d   :  { %5437 = vmatprep.mubr.msk.f32.mxu0 %vm110_vm2, %v94_v5  ;;  %5463 = vmatprep.subr.msk.mxu0 %vm135_vm1, %v4990_v9  ;;  %v6594_v20 = vld [vmem:[%s7469_s2 + $0x28] sm:$0xff]  ;;  %v6600_v21 = vld [vmem:[%s7469_s2 + $0x50] sm:$0xff]  ;;  %v6608_v22 = vld [vmem:[%s7469_s2 + $0x20] sm:$0xff] }
  0x3e   :  { %5452 = vmatmul.mubr.msk.f32.vlgmr.msra.gmra.mxu1 %vm110_vm2, %v95_v6  ;;  %5438 = vmatmul.mubr.msk.f32.vlgmr.msra.gmra.mxu0 %vm110_vm2, %v95_v6  ;;  %v6566_v16 = vld [vmem:[#allocation7] sm:$0xff]  ;;  %v6618_v23 = vld [vmem:[%s7469_s2 + $0x48] sm:$0xff] }
  0x3f   :  { %5478 = vmatpush3.msra.mxu1 %v6504_v7  ;;  %5454 = vmatprep.mubr.msk.f32.mxu1 %vm110_vm2, %v96_v8  ;;  %v6631_v24 = vld [vmem:[%s7469_s2 + $0x40] sm:$0xff] }
  0x40   :  { %5479 = vmatprep.subr.mxu1 %v6391_v0  ;;  %5464 = vmatpush3.msk.msra.mxu0 %vm135_vm1, %v4990_v9  ;;  %v4968_v25 = vld [vmem:[%s7470_s3] ss:$0 sm:$0xff]  ;;  %v4980_v29 = vld [vmem:[%s7470_s3 + $0x1] ss:$0 sm:$0xff]  ;;  %v4992_v56 = vld [vmem:[%s7470_s3 + $0x2] ss:$0 sm:$0xff] }
  0x41   :  { %5480 = vmatpush3.msra.mxu1 %v6519_v10  ;;  %5440 = vmatprep.mubr.msk.f32.mxu0 %vm110_vm2, %v96_v8  ;;  %v6689_v61 = vld [vmem:[%s7471_s4] ss:$0 sm:$0xff] }
  0x42   :  { %5455 = vmatmul.mubr.msk.f32.gmra.mxu1 %vm110_vm2, %v97_v11  ;;  %5481 = vmatprep.subr.mxu1 %v6391_v0 }
  0x43   :  { %5457 = vmatprep.mubr.msk.f32.mxu1 %vm110_vm2, %v98_v12  ;;  %5482 = vmatpush3.msra.mxu1 %v6533_v13 }
  0x44   :  { %5483 = vmatprep.subr.mxu1 %v6391_v0  ;;  %5441 = vmatmul.mubr.msk.f32.gmra.mxu0 %vm110_vm2, %v97_v11 }
  0x45   :  { %5484 = vmatpush3.msra.mxu1 %v6543_v14  ;;  %5443 = vmatprep.mubr.msk.f32.mxu0 %vm110_vm2, %v98_v12 }
  0x46   :  { %5458 = vmatmul.mubr.msk.f32.gmra.mxu1 %vm110_vm2, %v99_v15  ;;  %5488 = vmatprep.subr.mxu1 %v6391_v0 }
  0x47   :  { %5460 = vmatprep.mubr.msk.f32.mxu1 %vm110_vm2, %v6474_v2  ;;  %5499 = vmatprep.subr.mxu0 %v6391_v0 }
  0x48   :  { %5444 = vmatmul.mubr.msk.f32.gmra.mxu0 %vm110_vm2, %v99_v15 }
  0x49   :  { %5465 = vmatprep.mubr.msk.f32.mxu0 %vm110_vm2, %v94_v5 }
  0x4a   :  { %5461 = vmatmul.mubr.msk.f32.gmra.mxu1 %vm110_vm2, %v6479_v3 }
  0x4b   :  { %5485 = vmatprep.mubr.msk.f32.mxu1 %vm6392_vm3, %v6391_v0 }
  0x4c   :  { %5466 = vmatmul.mubr.msk.f32.vlgmr.msra.gmra.mxu0 %vm110_vm2, %v95_v6 }
  0x4d   :  { %5500 = vmatpush3.msra.mxu0 %v6571_v17  ;;  %5468 = vmatprep.mubr.msk.f32.mxu0 %vm110_vm2, %v96_v8 }
  0x4e   :  { %5486 = vmatmul.mubr.msk.f32.vlgmr.msra.gmra.mxu1 %vm244_vm0, %v6566_v16  ;;  %5501 = vmatprep.subr.mxu0 %v6391_v0 }
  0x4f   :  { %5489 = vmatpush3.msra.mxu1 %v6576_v18  ;;  %5496 = vmatprep.mubr.msk.f32.mxu1 %vm6392_vm3, %v6391_v0 }
  0x50   :  { %5490 = vmatprep.subr.mxu1 %v6391_v0  ;;  %5469 = vmatmul.mubr.msk.f32.gmra.mxu0 %vm110_vm2, %v97_v11 }
  0x51   :  { %5491 = vmatpush3.msra.mxu1 %v6584_v19  ;;  %5502 = vmatpush3.msra.mxu0 %v6600_v21 }
  0x52   :  { %5492 = vmatprep.subr.mxu1 %v6391_v0  ;;  %5471 = vmatprep.mubr.msk.f32.mxu0 %vm110_vm2, %v98_v12 }
  0x53   :  { %5493 = vmatpush3.msra.mxu1 %v6594_v20  ;;  %5503 = vmatprep.subr.mxu0 %v6391_v0 }
  0x54   :  { %5494 = vmatprep.subr.mxu1 %v6391_v0  ;;  %5472 = vmatmul.mubr.msk.f32.gmra.mxu0 %vm110_vm2, %v99_v15 }
  0x55   :  { %5495 = vmatpush3.msra.mxu1 %v6608_v22  ;;  %5504 = vmatpush3.msra.mxu0 %v6618_v23 }
  0x56   :  { %5497 = vmatmul.mubr.msk.f32.vlgmr.msra.gmra.mxu1 %vm244_vm0, %v6566_v16  ;;  %5474 = vmatprep.mubr.msk.f32.mxu0 %vm110_vm2, %v6474_v2 }
  0x57   :  { %5505 = vmatprep.subr.mxu0 %v6391_v0  ;;  %5510 = vmatprep.subr.mxu1 %v6391_v0 }
  0x58   :  { %5475 = vmatmul.mubr.msk.f32.gmra.mxu0 %vm110_vm2, %v6479_v3  ;;  %5511 = vmatpush3.msra.mxu1 %v6504_v7 }
  0x59   :  { %5506 = vmatpush3.msra.mxu0 %v6631_v24  ;;  %5507 = vmatprep.mubr.msk.f32.mxu0 %vm6392_vm3, %v6391_v0 }
  0x5a   :  { %5521 = vmatprep.subr.mxu0 %v6391_v0  ;;  %5512 = vmatprep.subr.mxu1 %v6391_v0 }
  0x5b   :  { %5513 = vmatpush3.msra.mxu1 %v6519_v10  ;;  %5518 = vmatprep.mubr.msk.f32.mxu1 %vm6392_vm3, %v6391_v0 }
  0x5c   :  { %5508 = vmatmul.mubr.msk.f32.vlgmr.msra.gmra.mxu0 %vm244_vm0, %v6566_v16  ;;  %5514 = vmatprep.subr.mxu1 %v6391_v0 }
  0x5d   :  { %5522 = vmatpush3.msra.mxu0 %v6576_v18  ;;  %5515 = vmatpush3.msra.mxu1 %v6533_v13 }
  0x5e   :  { %5523 = vmatprep.subr.mxu0 %v6391_v0  ;;  %5516 = vmatprep.subr.mxu1 %v6391_v0 }
  0x5f   :  { %5524 = vmatpush3.msra.mxu0 %v6584_v19  ;;  %5517 = vmatpush3.msra.mxu1 %v6543_v14 }
  0x60   :  { %5525 = vmatprep.subr.mxu0 %v6391_v0  ;;  %5529 = vmatprep.mubr.msk.f32.mxu0 %vm6392_vm3, %v6391_v0 }
  0x61   :  { %5526 = vmatpush3.msra.mxu0 %v6594_v20  ;;  %5532 = vmatprep.subr.mxu1 %v6391_v0 }
  0x62   :  { %5527 = vmatprep.subr.mxu0 %v6391_v0 }
  0x63   :  { %5528 = vmatpush3.msra.mxu0 %v6608_v22 }
  0x64   :  { %5543 = vmatprep.subr.mxu0 %v6391_v0 }
  0xfa   :  { %v5448_v26 = vpop.f32.mrf.mxu1 }
  0xfb   :  { %v241_v27 = vadd.f32 %v5448_v26, %v4968_v25  ;;  %v6700_v26 = vld [vmem:[%s7471_s4 + $0x1] ss:$0 sm:$0xff] }
  0xfc   :  { %v235_v28 = vpop.f32.mrf.mxu1 }
  0xfd   :  { %252 = vst.msk [vmem:[#allocation4 + $0x38] sm:$0xff] %vm244_vm0, %v241_v27  ;;  %v236_v30 = vadd.f32 %v4968_v25, %v235_v28 }
  0xfe   :  { %v5453_v31 = vpop.f32.mrf.mxu1  ;;  %v5439_v32 = vpop.f32.mrf.mxu0 }
  0xff   :  { %251 = vst.msk [vmem:[#allocation4 + $0x30] sm:$0xff] %vm244_vm0, %v236_v30  ;;  %v338_v33 = vadd.f32 %v5453_v31, %v4980_v29  ;;  %v211_v34 = vadd.f32 %v5439_v32, %v4968_v25 }
 0x100   :  { %v332_v35 = vpop.f32.mrf.mxu1  ;;  %v205_v36 = vpop.f32.mrf.mxu0 }
 0x101   :  { %372 = vst.msk [vmem:[#allocation5 + $0x8] sm:$0xff] %vm244_vm0, %v338_v33  ;;  %v333_v37 = vadd.f32 %v4980_v29, %v332_v35  ;;  %246 = vst.msk [vmem:[#allocation4 + $0x8] sm:$0xff] %vm244_vm0, %v211_v34  ;;  %v206_v38 = vadd.f32 %v4968_v25, %v205_v36 }
 0x102   :  { %v5456_v39 = vpop.f32.mrf.mxu1 }
 0x103   :  { %371 = vst.msk [vmem:[#allocation5] sm:$0xff] %vm244_vm0, %v333_v37  ;;  %v348_v40 = vadd.f32 %v5456_v39, %v4980_v29  ;;  %245 = vst.msk [vmem:[#allocation4] sm:$0xff] %vm244_vm0, %v206_v38 }
 0x104   :  { %v342_v41 = vpop.f32.mrf.mxu1  ;;  %v5442_v43 = vpop.f32.mrf.mxu0 }
 0x105   :  { %374 = vst.msk [vmem:[#allocation5 + $0x18] sm:$0xff] %vm244_vm0, %v348_v40  ;;  %v343_v42 = vadd.f32 %v4980_v29, %v342_v41  ;;  %v221_v45 = vadd.f32 %v5442_v43, %v4968_v25 }
 0x106   :  { %v5459_v44 = vpop.f32.mrf.mxu1  ;;  %v215_v47 = vpop.f32.mrf.mxu0 }
 0x107   :  { %373 = vst.msk [vmem:[#allocation5 + $0x10] sm:$0xff] %vm244_vm0, %v343_v42  ;;  %v358_v46 = vadd.f32 %v5459_v44, %v4980_v29  ;;  %248 = vst.msk [vmem:[#allocation4 + $0x18] sm:$0xff] %vm244_vm0, %v221_v45  ;;  %v216_v49 = vadd.f32 %v4968_v25, %v215_v47  ;;  %v6711_v45 = vld [vmem:[%s7471_s4 + $0x2] ss:$0 sm:$0xff] }
 0x108   :  { %v352_v48 = vpop.f32.mrf.mxu1  ;;  %v5445_v51 = vpop.f32.mrf.mxu0 }
 0x109   :  { %376 = vst.msk [vmem:[#allocation5 + $0x28] sm:$0xff] %vm244_vm0, %v358_v46  ;;  %v353_v50 = vadd.f32 %v4980_v29, %v352_v48  ;;  %247 = vst.msk [vmem:[#allocation4 + $0x10] sm:$0xff] %vm244_vm0, %v216_v49  ;;  %v231_v53 = vadd.f32 %v5445_v51, %v4968_v25 }
 0x10a   :  { %v5462_v52 = vpop.f32.mrf.mxu1  ;;  %v225_v55 = vpop.f32.mrf.mxu0  ;;  %v526_v62 = vld [vmem:[#allocation4] sm:$0xff] }
 0x10b   :  { %375 = vst.msk [vmem:[#allocation5 + $0x20] sm:$0xff] %vm244_vm0, %v353_v50  ;;  %v368_v54 = vadd.f32 %v5462_v52, %v4980_v29  ;;  %250 = vst.msk [vmem:[#allocation4 + $0x28] sm:$0xff] %vm244_vm0, %v231_v53  ;;  %v226_v58 = vadd.f32 %v4968_v25, %v225_v55  ;;  %v608_v27 = vld [vmem:[#allocation5] sm:$0xff] }
 0x10c   :  { %v362_v57 = vpop.f32.mrf.mxu1  ;;  %v5467_v60 = vpop.f32.mrf.mxu0 }
 0x10d   :  { %378 = vst.msk [vmem:[#allocation5 + $0x38] sm:$0xff] %vm244_vm0, %v368_v54  ;;  %v363_v59 = vadd.f32 %v4980_v29, %v362_v57  ;;  %249 = vst.msk [vmem:[#allocation4 + $0x20] sm:$0xff] %vm244_vm0, %v226_v58  ;;  %v464_v1 = vadd.f32 %v5467_v60, %v4992_v56 }
 0x10e   :  { %v596_v63 = vpop.f32.mrf.mxu1  ;;  %v458_v3 = vpop.f32.mrf.mxu0 }
 0x10f   :  { %377 = vst.msk [vmem:[#allocation5 + $0x30] sm:$0xff] %vm244_vm0, %v363_v59  ;;  %v600_v2 = vadd.f32 %v596_v63, %v526_v62  ;;  %498 = vst.msk [vmem:[#allocation6 + $0x8] sm:$0xff] %vm244_vm0, %v464_v1  ;;  %v459_v5 = vadd.f32 %v4992_v56, %v458_v3  ;;  %v862_v3 = vld [vmem:[#allocation5 + $0x8] sm:$0xff] }
 0x110   :  { %v5487_v4 = vpop.f32.mrf.mxu1  ;;  %v5470_v8 = vpop.f32.mrf.mxu0 }
 0x111   :  { %v607_v6 = vadd.f32 %v6689_v61, %v600_v2  ;;  %497 = vst.msk [vmem:[#allocation6] sm:$0xff] %vm244_vm0, %v459_v5  ;;  %v474_v9 = vadd.f32 %v5470_v8, %v4992_v56 }
 0x112   :  { %v468_v12 = vpop.f32.mrf.mxu0 }
 0x113   :  { %v5018_v11 = vmul.f32 -1.442695, %v607_v6  ;;  %500 = vst.msk [vmem:[#allocation6 + $0x18] sm:$0xff] %vm244_vm0, %v474_v9  ;;  %v469_v15 = vadd.f32 %v4992_v56, %v468_v12 }
 0x114   :  { %v5473_v25 = vpop.f32.mrf.mxu0 }
 0x115   :  { %6089 = vpow2.f32 %v5018_v11  ;;  %499 = vst.msk [vmem:[#allocation6 + $0x10] sm:$0xff] %vm244_vm0, %v469_v15  ;;  %v484_v29 = vadd.f32 %v5473_v25, %v4992_v56 }
 0x116   :  { %v675_v28 = vpop.f32.mrf.mxu1  ;;  %v478_v31 = vpop.f32.mrf.mxu0 }
 0x117   :  { %v679_v30 = vadd.f32 %v675_v28, %v608_v27  ;;  %502 = vst.msk [vmem:[#allocation6 + $0x28] sm:$0xff] %vm244_vm0, %v484_v29  ;;  %v479_v33 = vadd.f32 %v4992_v56, %v478_v31  ;;  %v1017_v31 = vld [vmem:[#allocation6 + $0x8] sm:$0xff] }
 0x118   :  { %v5498_v32 = vpop.f32.mrf.mxu1  ;;  %v5476_v35 = vpop.f32.mrf.mxu0  ;;  %v775_v50 = vld [vmem:[#allocation6] sm:$0xff] }
 0x119   :  { %v686_v34 = vadd.f32 %v6700_v26, %v679_v30  ;;  %501 = vst.msk [vmem:[#allocation6 + $0x20] sm:$0xff] %vm244_vm0, %v479_v33  ;;  %v494_v36 = vadd.f32 %v5476_v35, %v4992_v56 }
 0x11a   :  { %v488_v38 = vpop.f32.mrf.mxu0 }
 0x11b   :  { %v5019_v37 = vmul.f32 -1.442695, %v686_v34  ;;  %504 = vst.msk [vmem:[#allocation6 + $0x38] sm:$0xff] %vm244_vm0, %v494_v36  ;;  %v489_v39 = vadd.f32 %v4992_v56, %v488_v38 }
 0x11c   :  { %v759_v40 = vpop.f32.mrf.mxu0 }
 0x11d   :  { %503 = vst.msk [vmem:[#allocation6 + $0x30] sm:$0xff] %vm244_vm0, %v489_v39  ;;  %6091 = vpow2.f32 %v5019_v37  ;;  %v760_v47 = vadd.f32 %v6711_v45, %v759_v40  ;;  %v1028_v40 = vld [vmem:[#allocation4 + $0x10] sm:$0xff] }
 0x11e   :  { %v5509_v41 = vpop.f32.mrf.mxu0 }
 0x122   :  { %v6090_v42 = vpop.eup %6089 }
 0x123   :  { %v766_v43 = vadd.f32 1.0, %v6090_v42 }
 0x125   :  { %6093 = vrcp.f32 %v766_v43 }
 0x12a   :  { %v6092_v44 = vpop.eup %6091 }
 0x12b   :  { %v772_v46 = vadd.f32 1.0, %v6092_v44 }
 0x12d   :  { %6095 = vrcp.f32 %v772_v46 }
 0x132   :  { %v6094_v48 = vpop.eup %6093 }
 0x133   :  { %v776_v49 = vmul.f32 %v6094_v48, %v760_v47  ;;  %v1104_v48 = vld [vmem:[#allocation5 + $0x10] sm:$0xff] }
 0x135   :  { %v777_v51 = vadd.f32 %v776_v49, %v775_v50 }
 0x137   :  { %6097 = vtanh.f32 %v777_v51 }
 0x13a   :  { %v6096_v52 = vpop.eup %6095 }
 0x13b   :  { %v779_v53 = vsub.f32 1.0, %v6096_v52  ;;  %v781_v55 = vmul.f32 %v6096_v52, %v6566_v16  ;;  %v786_v16 = vld [vmem:[#allocation4 + $0x8] sm:$0xff] }
 0x144   :  { %v6098_v54 = vpop.eup %6097 }
 0x145   :  { %v780_v56 = vmul.f32 %v6098_v54, %v779_v53 }
 0x147   :  { %v782_v57 = vadd.f32 %v781_v55, %v780_v56 }
 0x149   :  { %783 = vst.msk [vmem:[#allocation7] sm:$0xff] %vm244_vm0, %v782_v57  ;;  %784 = vst.msk [vmem:[#allocation2] sm:$0xff] %vm244_vm0, %v782_v57 }
 0x150   :  { %v785_v58 = vld [vmem:[#allocation7] sm:$0xff] }
 0x151   :  { %5519 = vmatmul.mubr.msk.f32.vlgmr.msra.gmra.mxu1 %vm244_vm0, %v785_v58  ;;  %5530 = vmatmul.mubr.msk.f32.vlgmr.msra.gmra.mxu0 %vm244_vm0, %v785_v58 }
 0x152   :  { %5533 = vmatpush3.msra.mxu1 %v6571_v17  ;;  %5540 = vmatprep.mubr.msk.f32.mxu1 %vm6392_vm3, %v6391_v0 }
 0x153   :  { %5534 = vmatprep.subr.mxu1 %v6391_v0  ;;  %5544 = vmatpush3.msra.mxu0 %v6504_v7 }
 0x154   :  { %5535 = vmatpush3.msra.mxu1 %v6600_v21  ;;  %5545 = vmatprep.subr.mxu0 %v6391_v0 }
 0x155   :  { %5536 = vmatprep.subr.mxu1 %v6391_v0  ;;  %5546 = vmatpush3.msra.mxu0 %v6519_v10 }
 0x156   :  { %5537 = vmatpush3.msra.mxu1 %v6618_v23  ;;  %5547 = vmatprep.subr.mxu0 %v6391_v0 }
 0x157   :  { %5538 = vmatprep.subr.mxu1 %v6391_v0  ;;  %5548 = vmatpush3.msra.mxu0 %v6533_v13 }
 0x158   :  { %5539 = vmatpush3.msra.mxu1 %v6631_v24  ;;  %5549 = vmatprep.subr.mxu0 %v6391_v0 }
 0x159   :  { %5541 = vmatmul.mubr.msk.f32.vlgmr.msra.gmra.mxu1 %vm244_vm0, %v785_v58  ;;  %5554 = vmatprep.subr.mxu1 %v6391_v0 }
 0x15a   :  { %5555 = vmatpush3.msra.mxu1 %v6576_v18  ;;  %5550 = vmatpush3.msra.mxu0 %v6543_v14 }
 0x15b   :  { %5556 = vmatprep.subr.mxu1 %v6391_v0  ;;  %5551 = vmatprep.mubr.msk.f32.mxu0 %vm6392_vm3, %v6391_v0 }
 0x15c   :  { %5557 = vmatpush3.msra.mxu1 %v6584_v19  ;;  %5562 = vmatprep.mubr.msk.f32.mxu1 %vm6392_vm3, %v6391_v0 }
 0x15d   :  { %5558 = vmatprep.subr.mxu1 %v6391_v0  ;;  %5565 = vmatprep.subr.mxu0 %v6391_v0 }
 0x15e   :  { %5559 = vmatpush3.msra.mxu1 %v6594_v20 }
 0x15f   :  { %5560 = vmatprep.subr.mxu1 %v6391_v0 }
 0x160   :  { %5561 = vmatpush3.msra.mxu1 %v6608_v22 }
 0x161   :  { %5576 = vmatprep.subr.mxu1 %v6391_v0 }
 0x211   :  { %v856_v59 = vpop.f32.mrf.mxu1  ;;  %v929_v60 = vpop.f32.mrf.mxu0 }
 0x212   :  { %v860_v62 = vadd.f32 %v856_v59, %v786_v16  ;;  %v933_v5 = vadd.f32 %v929_v60, %v862_v3 }
 0x213   :  { %v5520_v63 = vpop.f32.mrf.mxu1  ;;  %v5531_v1 = vpop.f32.mrf.mxu0 }
 0x214   :  { %v861_v2 = vadd.f32 %v6689_v61, %v860_v62  ;;  %v934_v8 = vadd.f32 %v6700_v26, %v933_v5  ;;  %v1259_v62 = vld [vmem:[#allocation6 + $0x10] sm:$0xff] }
 0x216   :  { %v5023_v4 = vmul.f32 -1.442695, %v861_v2  ;;  %v5024_v11 = vmul.f32 -1.442695, %v934_v8 }
 0x218   :  { %6099 = vpow2.f32 %v5023_v4 }
 0x219   :  { %v1001_v6 = vpop.f32.mrf.mxu1  ;;  %6101 = vpow2.f32 %v5024_v11 }
 0x21a   :  { %v1002_v28 = vadd.f32 %v6711_v45, %v1001_v6 }
 0x21b   :  { %v5542_v9 = vpop.f32.mrf.mxu1 }
 0x21c   :  { %v1270_v9 = vld [vmem:[#allocation4 + $0x18] sm:$0xff] }
 0x225   :  { %v6100_v12 = vpop.eup %6099 }
 0x226   :  { %v1008_v15 = vadd.f32 1.0, %v6100_v12  ;;  %v6102_v25 = vpop.eup %6101 }
 0x227   :  { %v1014_v27 = vadd.f32 1.0, %v6102_v25 }
 0x228   :  { %6103 = vrcp.f32 %v1008_v15 }
 0x229   :  { %6105 = vrcp.f32 %v1014_v27 }
 0x235   :  { %v6104_v29 = vpop.eup %6103 }
 0x236   :  { %v1018_v30 = vmul.f32 %v6104_v29, %v1002_v28  ;;  %v6106_v33 = vpop.eup %6105  ;;  %v1346_v29 = vld [vmem:[#allocation5 + $0x18] sm:$0xff] }
 0x237   :  { %v1021_v34 = vsub.f32 1.0, %v6106_v33  ;;  %v1023_v36 = vmul.f32 %v6106_v33, %v785_v58 }
 0x238   :  { %v1019_v32 = vadd.f32 %v1018_v30, %v1017_v31 }
 0x23a   :  { %6107 = vtanh.f32 %v1019_v32 }
 0x247   :  { %v6108_v35 = vpop.eup %6107 }
 0x248   :  { %v1022_v37 = vmul.f32 %v6108_v35, %v1021_v34 }
 0x24a   :  { %v1024_v38 = vadd.f32 %v1023_v36, %v1022_v37 }
 0x24c   :  { %1025 = vst.msk [vmem:[#allocation7] sm:$0xff] %vm244_vm0, %v1024_v38  ;;  %1026 = vst.msk [vmem:[#allocation2 + $0x8] sm:$0xff] %vm244_vm0, %v1024_v38 }
 0x253   :  { %v1027_v39 = vld [vmem:[#allocation7] sm:$0xff] }
 0x254   :  { %5552 = vmatmul.mubr.msk.f32.vlgmr.msra.gmra.mxu0 %vm244_vm0, %v1027_v39  ;;  %5563 = vmatmul.mubr.msk.f32.vlgmr.msra.gmra.mxu1 %vm244_vm0, %v1027_v39 }
 0x255   :  { %5566 = vmatpush3.msra.mxu0 %v6571_v17  ;;  %5573 = vmatprep.mubr.msk.f32.mxu0 %vm6392_vm3, %v6391_v0 }
 0x256   :  { %5567 = vmatprep.subr.mxu0 %v6391_v0  ;;  %5577 = vmatpush3.msra.mxu1 %v6504_v7 }
 0x257   :  { %5568 = vmatpush3.msra.mxu0 %v6600_v21  ;;  %5578 = vmatprep.subr.mxu1 %v6391_v0 }
 0x258   :  { %5569 = vmatprep.subr.mxu0 %v6391_v0  ;;  %5579 = vmatpush3.msra.mxu1 %v6519_v10 }
 0x259   :  { %5570 = vmatpush3.msra.mxu0 %v6618_v23  ;;  %5580 = vmatprep.subr.mxu1 %v6391_v0 }
 0x25a   :  { %5571 = vmatprep.subr.mxu0 %v6391_v0  ;;  %5581 = vmatpush3.msra.mxu1 %v6533_v13 }
 0x25b   :  { %5572 = vmatpush3.msra.mxu0 %v6631_v24  ;;  %5582 = vmatprep.subr.mxu1 %v6391_v0 }
 0x25c   :  { %5574 = vmatmul.mubr.msk.f32.vlgmr.msra.gmra.mxu0 %vm244_vm0, %v1027_v39  ;;  %5587 = vmatprep.subr.mxu0 %v6391_v0 }
 0x25d   :  { %5588 = vmatpush3.msra.mxu0 %v6576_v18  ;;  %5583 = vmatpush3.msra.mxu1 %v6543_v14 }
 0x25e   :  { %5589 = vmatprep.subr.mxu0 %v6391_v0  ;;  %5584 = vmatprep.mubr.msk.f32.mxu1 %vm6392_vm3, %v6391_v0 }
 0x25f   :  { %5590 = vmatpush3.msra.mxu0 %v6584_v19  ;;  %5595 = vmatprep.mubr.msk.f32.mxu0 %vm6392_vm3, %v6391_v0 }
 0x260   :  { %5591 = vmatprep.subr.mxu0 %v6391_v0  ;;  %5598 = vmatprep.subr.mxu1 %v6391_v0 }
 0x261   :  { %5592 = vmatpush3.msra.mxu0 %v6594_v20 }
 0x262   :  { %5593 = vmatprep.subr.mxu0 %v6391_v0 }
 0x263   :  { %5594 = vmatpush3.msra.mxu0 %v6608_v22 }
 0x264   :  { %5609 = vmatprep.subr.mxu0 %v6391_v0 }
 0x314   :  { %v1098_v41 = vpop.f32.mrf.mxu0  ;;  %v1171_v42 = vpop.f32.mrf.mxu1 }
 0x315   :  { %v1102_v43 = vadd.f32 %v1098_v41, %v1028_v40  ;;  %v1175_v50 = vadd.f32 %v1171_v42, %v1104_v48 }
 0x316   :  { %v5553_v44 = vpop.f32.mrf.mxu0  ;;  %v5564_v46 = vpop.f32.mrf.mxu1 }
 0x317   :  { %v1103_v47 = vadd.f32 %v6689_v61, %v1102_v43  ;;  %v1176_v52 = vadd.f32 %v6700_v26, %v1175_v50  ;;  %v1501_v43 = vld [vmem:[#allocation6 + $0x18] sm:$0xff] }
 0x319   :  { %v5028_v49 = vmul.f32 -1.442695, %v1103_v47  ;;  %v5029_v54 = vmul.f32 -1.442695, %v1176_v52 }
 0x31b   :  { %6109 = vpow2.f32 %v5028_v49 }
 0x31c   :  { %v1243_v51 = vpop.f32.mrf.mxu0  ;;  %6111 = vpow2.f32 %v5029_v54 }
 0x31d   :  { %v1244_v16 = vadd.f32 %v6711_v45, %v1243_v51 }
 0x31e   :  { %v5575_v53 = vpop.f32.mrf.mxu0 }
 0x31f   :  { %v1512_v53 = vld [vmem:[#allocation4 + $0x20] sm:$0xff] }
 0x328   :  { %v6110_v55 = vpop.eup %6109 }
 0x329   :  { %v1250_v56 = vadd.f32 1.0, %v6110_v55  ;;  %v6112_v57 = vpop.eup %6111 }
 0x32a   :  { %v1256_v58 = vadd.f32 1.0, %v6112_v57 }
 0x32b   :  { %6113 = vrcp.f32 %v1250_v56 }
 0x32c   :  { %6115 = vrcp.f32 %v1256_v58 }
 0x338   :  { %v6114_v59 = vpop.eup %6113 }
 0x339   :  { %v1260_v60 = vmul.f32 %v6114_v59, %v1244_v16  ;;  %v6116_v1 = vpop.eup %6115  ;;  %v1588_v59 = vld [vmem:[#allocation5 + $0x20] sm:$0xff] }
 0x33a   :  { %v1263_v2 = vsub.f32 1.0, %v6116_v1  ;;  %v1265_v4 = vmul.f32 %v6116_v1, %v1027_v39 }
 0x33b   :  { %v1261_v63 = vadd.f32 %v1260_v60, %v1259_v62 }
 0x33d   :  { %6117 = vtanh.f32 %v1261_v63 }
 0x34a   :  { %v6118_v3 = vpop.eup %6117 }
 0x34b   :  { %v1264_v5 = vmul.f32 %v6118_v3, %v1263_v2 }
 0x34d   :  { %v1266_v6 = vadd.f32 %v1265_v4, %v1264_v5 }
 0x34f   :  { %1267 = vst.msk [vmem:[#allocation7] sm:$0xff] %vm244_vm0, %v1266_v6  ;;  %1268 = vst.msk [vmem:[#allocation2 + $0x10] sm:$0xff] %vm244_vm0, %v1266_v6 }
 0x356   :  { %v1269_v8 = vld [vmem:[#allocation7] sm:$0xff] }
 0x357   :  { %5585 = vmatmul.mubr.msk.f32.vlgmr.msra.gmra.mxu1 %vm244_vm0, %v1269_v8  ;;  %5596 = vmatmul.mubr.msk.f32.vlgmr.msra.gmra.mxu0 %vm244_vm0, %v1269_v8 }
 0x358   :  { %5599 = vmatpush3.msra.mxu1 %v6571_v17  ;;  %5606 = vmatprep.mubr.msk.f32.mxu1 %vm6392_vm3, %v6391_v0 }
 0x359   :  { %5600 = vmatprep.subr.mxu1 %v6391_v0  ;;  %5610 = vmatpush3.msra.mxu0 %v6504_v7 }
 0x35a   :  { %5601 = vmatpush3.msra.mxu1 %v6600_v21  ;;  %5611 = vmatprep.subr.mxu0 %v6391_v0 }
 0x35b   :  { %5602 = vmatprep.subr.mxu1 %v6391_v0  ;;  %5612 = vmatpush3.msra.mxu0 %v6519_v10 }
 0x35c   :  { %5603 = vmatpush3.msra.mxu1 %v6618_v23  ;;  %5613 = vmatprep.subr.mxu0 %v6391_v0 }
 0x35d   :  { %5604 = vmatprep.subr.mxu1 %v6391_v0  ;;  %5614 = vmatpush3.msra.mxu0 %v6533_v13 }
 0x35e   :  { %5605 = vmatpush3.msra.mxu1 %v6631_v24  ;;  %5615 = vmatprep.subr.mxu0 %v6391_v0 }
 0x35f   :  { %5607 = vmatmul.mubr.msk.f32.vlgmr.msra.gmra.mxu1 %vm244_vm0, %v1269_v8  ;;  %5620 = vmatprep.subr.mxu1 %v6391_v0 }
 0x360   :  { %5621 = vmatpush3.msra.mxu1 %v6576_v18  ;;  %5616 = vmatpush3.msra.mxu0 %v6543_v14 }
 0x361   :  { %5622 = vmatprep.subr.mxu1 %v6391_v0  ;;  %5617 = vmatprep.mubr.msk.f32.mxu0 %vm6392_vm3, %v6391_v0 }
 0x362   :  { %5623 = vmatpush3.msra.mxu1 %v6584_v19  ;;  %5628 = vmatprep.mubr.msk.f32.mxu1 %vm6392_vm3, %v6391_v0 }
 0x363   :  { %5624 = vmatprep.subr.mxu1 %v6391_v0  ;;  %5631 = vmatprep.subr.mxu0 %v6391_v0 }
 0x364   :  { %5625 = vmatpush3.msra.mxu1 %v6594_v20 }
 0x365   :  { %5626 = vmatprep.subr.mxu1 %v6391_v0 }
 0x366   :  { %5627 = vmatpush3.msra.mxu1 %v6608_v22 }
 0x367   :  { %5642 = vmatprep.subr.mxu1 %v6391_v0 }
 0x417   :  { %v1340_v11 = vpop.f32.mrf.mxu1  ;;  %v1413_v12 = vpop.f32.mrf.mxu0 }
 0x418   :  { %v1344_v15 = vadd.f32 %v1340_v11, %v1270_v9  ;;  %v1417_v31 = vadd.f32 %v1413_v12, %v1346_v29 }
 0x419   :  { %v5586_v25 = vpop.f32.mrf.mxu1  ;;  %v5597_v27 = vpop.f32.mrf.mxu0 }
 0x41a   :  { %v1345_v28 = vadd.f32 %v6689_v61, %v1344_v15  ;;  %v1418_v33 = vadd.f32 %v6700_v26, %v1417_v31  ;;  %v1743_v15 = vld [vmem:[#allocation6 + $0x20] sm:$0xff] }
 0x41c   :  { %v5033_v30 = vmul.f32 -1.442695, %v1345_v28  ;;  %v5034_v35 = vmul.f32 -1.442695, %v1418_v33 }
 0x41e   :  { %6119 = vpow2.f32 %v5033_v30 }
 0x41f   :  { %v1485_v32 = vpop.f32.mrf.mxu1  ;;  %6121 = vpow2.f32 %v5034_v35  ;;  %v1830_v35 = vld [vmem:[#allocation5 + $0x28] sm:$0xff] }
 0x420   :  { %v1486_v40 = vadd.f32 %v6711_v45, %v1485_v32 }
 0x421   :  { %v5608_v34 = vpop.f32.mrf.mxu1 }
 0x42b   :  { %v6120_v36 = vpop.eup %6119 }
 0x42c   :  { %v1492_v37 = vadd.f32 1.0, %v6120_v36  ;;  %v6122_v38 = vpop.eup %6121 }
 0x42d   :  { %v1498_v39 = vadd.f32 1.0, %v6122_v38 }
 0x42e   :  { %6123 = vrcp.f32 %v1492_v37 }
 0x42f   :  { %6125 = vrcp.f32 %v1498_v39 }
 0x43b   :  { %v6124_v41 = vpop.eup %6123 }
 0x43c   :  { %v1502_v42 = vmul.f32 %v6124_v41, %v1486_v40  ;;  %v6126_v46 = vpop.eup %6125 }
 0x43d   :  { %v1505_v47 = vsub.f32 1.0, %v6126_v46  ;;  %v1507_v49 = vmul.f32 %v6126_v46, %v1269_v8 }
 0x43e   :  { %v1503_v44 = vadd.f32 %v1502_v42, %v1501_v43 }
 0x440   :  { %6127 = vtanh.f32 %v1503_v44 }
 0x44d   :  { %v6128_v48 = vpop.eup %6127 }
 0x44e   :  { %v1506_v50 = vmul.f32 %v6128_v48, %v1505_v47  ;;  %v1985_v48 = vld [vmem:[#allocation6 + $0x28] sm:$0xff] }
 0x450   :  { %v1508_v51 = vadd.f32 %v1507_v49, %v1506_v50 }
 0x452   :  { %1509 = vst.msk [vmem:[#allocation7] sm:$0xff] %vm244_vm0, %v1508_v51  ;;  %1510 = vst.msk [vmem:[#allocation2 + $0x18] sm:$0xff] %vm244_vm0, %v1508_v51 }
 0x459   :  { %v1511_v52 = vld [vmem:[#allocation7] sm:$0xff] }
 0x45a   :  { %5618 = vmatmul.mubr.msk.f32.vlgmr.msra.gmra.mxu0 %vm244_vm0, %v1511_v52  ;;  %5629 = vmatmul.mubr.msk.f32.vlgmr.msra.gmra.mxu1 %vm244_vm0, %v1511_v52 }
 0x45b   :  { %5632 = vmatpush3.msra.mxu0 %v6571_v17  ;;  %5639 = vmatprep.mubr.msk.f32.mxu0 %vm6392_vm3, %v6391_v0 }
 0x45c   :  { %5633 = vmatprep.subr.mxu0 %v6391_v0  ;;  %5643 = vmatpush3.msra.mxu1 %v6504_v7 }
 0x45d   :  { %5634 = vmatpush3.msra.mxu0 %v6600_v21  ;;  %5644 = vmatprep.subr.mxu1 %v6391_v0 }
 0x45e   :  { %5635 = vmatprep.subr.mxu0 %v6391_v0  ;;  %5645 = vmatpush3.msra.mxu1 %v6519_v10 }
 0x45f   :  { %5636 = vmatpush3.msra.mxu0 %v6618_v23  ;;  %5646 = vmatprep.subr.mxu1 %v6391_v0 }
 0x460   :  { %5637 = vmatprep.subr.mxu0 %v6391_v0  ;;  %5647 = vmatpush3.msra.mxu1 %v6533_v13 }
 0x461   :  { %5638 = vmatpush3.msra.mxu0 %v6631_v24  ;;  %5648 = vmatprep.subr.mxu1 %v6391_v0 }
 0x462   :  { %5640 = vmatmul.mubr.msk.f32.vlgmr.msra.gmra.mxu0 %vm244_vm0, %v1511_v52  ;;  %5653 = vmatprep.subr.mxu0 %v6391_v0 }
 0x463   :  { %5654 = vmatpush3.msra.mxu0 %v6576_v18  ;;  %5649 = vmatpush3.msra.mxu1 %v6543_v14 }
 0x464   :  { %5655 = vmatprep.subr.mxu0 %v6391_v0  ;;  %5650 = vmatprep.mubr.msk.f32.mxu1 %vm6392_vm3, %v6391_v0 }
 0x465   :  { %5656 = vmatpush3.msra.mxu0 %v6584_v19  ;;  %5661 = vmatprep.mubr.msk.f32.mxu0 %vm6392_vm3, %v6391_v0 }
 0x466   :  { %5657 = vmatprep.subr.mxu0 %v6391_v0  ;;  %5664 = vmatprep.subr.mxu1 %v6391_v0 }
 0x467   :  { %5658 = vmatpush3.msra.mxu0 %v6594_v20 }
 0x468   :  { %5659 = vmatprep.subr.mxu0 %v6391_v0 }
 0x469   :  { %5660 = vmatpush3.msra.mxu0 %v6608_v22 }
 0x46a   :  { %5675 = vmatprep.subr.mxu0 %v6391_v0 }
 0x51a   :  { %v1582_v54 = vpop.f32.mrf.mxu0  ;;  %v1655_v55 = vpop.f32.mrf.mxu1 }
 0x51b   :  { %v1586_v56 = vadd.f32 %v1582_v54, %v1512_v53  ;;  %v1659_v62 = vadd.f32 %v1655_v55, %v1588_v59  ;;  %v6260_v59 = vld [vmem:[%s7469_s2 + $0x20] sm:$0xff] }
 0x51c   :  { %v5619_v57 = vpop.f32.mrf.mxu0  ;;  %v5630_v58 = vpop.f32.mrf.mxu1 }
 0x51d   :  { %v1587_v16 = vadd.f32 %v6689_v61, %v1586_v56  ;;  %v1660_v1 = vadd.f32 %v6700_v26, %v1659_v62  ;;  %v6253_v57 = vld [vmem:[%s7469_s2 + $0x18] sm:$0xff]  ;;  %v6255_v58 = vld [vmem:[%s7469_s2 + $0x8] sm:$0xff]  ;;  %v1996_v62 = vld [vmem:[#allocation4 + $0x30] sm:$0xff] }
 0x51f   :  { %v5038_v60 = vmul.f32 -1.442695, %v1587_v16  ;;  %v5039_v3 = vmul.f32 -1.442695, %v1660_v1  ;;  %v6259_v16 = vld [vmem:[%s7469_s2 + $0x28] sm:$0xff] }
 0x521   :  { %6129 = vpow2.f32 %v5038_v60  ;;  %v2490_v60 = vld [vmem:[#allocation8 + $0x18] sm:$0xff] }
 0x522   :  { %v1727_v63 = vpop.f32.mrf.mxu0  ;;  %6131 = vpow2.f32 %v5039_v3 }
 0x523   :  { %v1728_v9 = vadd.f32 %v6711_v45, %v1727_v63 }
 0x524   :  { %v5641_v2 = vpop.f32.mrf.mxu0 }
 0x52e   :  { %v6130_v4 = vpop.eup %6129 }
 0x52f   :  { %v1734_v5 = vadd.f32 1.0, %v6130_v4  ;;  %v6132_v6 = vpop.eup %6131 }
 0x530   :  { %v1740_v8 = vadd.f32 1.0, %v6132_v6  ;;  %v2072_v6 = vld [vmem:[#allocation5 + $0x30] sm:$0xff] }
 0x531   :  { %6133 = vrcp.f32 %v1734_v5 }
 0x532   :  { %6135 = vrcp.f32 %v1740_v8 }
 0x53e   :  { %v6134_v11 = vpop.eup %6133 }
 0x53f   :  { %v1744_v12 = vmul.f32 %v6134_v11, %v1728_v9  ;;  %v6136_v27 = vpop.eup %6135 }
 0x540   :  { %v1747_v28 = vsub.f32 1.0, %v6136_v27  ;;  %v1749_v30 = vmul.f32 %v6136_v27, %v1511_v52 }
 0x541   :  { %v1745_v25 = vadd.f32 %v1744_v12, %v1743_v15 }
 0x543   :  { %6137 = vtanh.f32 %v1745_v25 }
 0x550   :  { %v6138_v29 = vpop.eup %6137 }
 0x551   :  { %v1748_v31 = vmul.f32 %v6138_v29, %v1747_v28 }
 0x553   :  { %v1750_v32 = vadd.f32 %v1749_v30, %v1748_v31 }
 0x555   :  { %1751 = vst.msk [vmem:[#allocation7] sm:$0xff] %vm244_vm0, %v1750_v32  ;;  %1752 = vst.msk [vmem:[#allocation2 + $0x20] sm:$0xff] %vm244_vm0, %v1750_v32 }
 0x55c   :  { %v1753_v33 = vld [vmem:[#allocation7] sm:$0xff] }
 0x55d   :  { %5651 = vmatmul.mubr.msk.f32.vlgmr.msra.gmra.mxu1 %vm244_vm0, %v1753_v33  ;;  %5662 = vmatmul.mubr.msk.f32.vlgmr.msra.gmra.mxu0 %vm244_vm0, %v1753_v33 }
 0x55e   :  { %5665 = vmatpush3.msra.mxu1 %v6571_v17  ;;  %5672 = vmatprep.mubr.msk.f32.mxu1 %vm6392_vm3, %v6391_v0 }
 0x55f   :  { %5666 = vmatprep.subr.mxu1 %v6391_v0  ;;  %5676 = vmatpush3.msra.mxu0 %v6504_v7  ;;  %v1754_v7 = vld [vmem:[#allocation4 + $0x28] sm:$0xff] }
 0x560   :  { %5667 = vmatpush3.msra.mxu1 %v6600_v21  ;;  %5677 = vmatprep.subr.mxu0 %v6391_v0 }
 0x561   :  { %5668 = vmatprep.subr.mxu1 %v6391_v0  ;;  %5678 = vmatpush3.msra.mxu0 %v6519_v10 }
 0x562   :  { %5669 = vmatpush3.msra.mxu1 %v6618_v23  ;;  %5679 = vmatprep.subr.mxu0 %v6391_v0 }
 0x563   :  { %5670 = vmatprep.subr.mxu1 %v6391_v0  ;;  %5680 = vmatpush3.msra.mxu0 %v6533_v13 }
 0x564   :  { %5671 = vmatpush3.msra.mxu1 %v6631_v24  ;;  %5681 = vmatprep.subr.mxu0 %v6391_v0 }
 0x565   :  { %5673 = vmatmul.mubr.msk.f32.vlgmr.msra.gmra.mxu1 %vm244_vm0, %v1753_v33  ;;  %5686 = vmatprep.subr.mxu1 %v6391_v0 }
 0x566   :  { %5687 = vmatpush3.msra.mxu1 %v6576_v18  ;;  %5682 = vmatpush3.msra.mxu0 %v6543_v14 }
 0x567   :  { %5688 = vmatprep.subr.mxu1 %v6391_v0  ;;  %5683 = vmatprep.mubr.msk.f32.mxu0 %vm6392_vm3, %v6391_v0 }
 0x568   :  { %5689 = vmatpush3.msra.mxu1 %v6584_v19  ;;  %5694 = vmatprep.mubr.msk.f32.mxu1 %vm6392_vm3, %v6391_v0 }
 0x569   :  { %5690 = vmatprep.subr.mxu1 %v6391_v0  ;;  %5697 = vmatprep.subr.mxu0 %v6391_v0 }
 0x56a   :  { %5691 = vmatpush3.msra.mxu1 %v6594_v20 }
 0x56b   :  { %5692 = vmatprep.subr.mxu1 %v6391_v0 }
 0x56c   :  { %5693 = vmatpush3.msra.mxu1 %v6608_v22 }
 0x56d   :  { %5708 = vmatprep.subr.mxu1 %v6391_v0 }
 0x61d   :  { %v1824_v10 = vpop.f32.mrf.mxu1  ;;  %v1897_v13 = vpop.f32.mrf.mxu0 }
 0x61e   :  { %v1828_v14 = vadd.f32 %v1824_v10, %v1754_v7  ;;  %v1901_v37 = vadd.f32 %v1897_v13, %v1830_v35  ;;  %v6261_v35 = vld [vmem:[%s7469_s2 + $0x58] sm:$0xff] }
 0x61f   :  { %v5652_v18 = vpop.f32.mrf.mxu1  ;;  %v5663_v19 = vpop.f32.mrf.mxu0 }
 0x620   :  { %v1829_v34 = vadd.f32 %v6689_v61, %v1828_v14  ;;  %v1902_v20 = vadd.f32 %v6700_v26, %v1901_v37  ;;  %v2488_v37 = vld [vmem:[#allocation8 + $0x8] sm:$0xff] }
 0x622   :  { %v5043_v36 = vmul.f32 -1.442695, %v1829_v34  ;;  %v5044_v40 = vmul.f32 -1.442695, %v1902_v20  ;;  %v2487_v20 = vld [vmem:[#allocation8] sm:$0xff] }
 0x624   :  { %6139 = vpow2.f32 %v5043_v36  ;;  %v6976_v36 = vld [vmem:[#allocation2] sm:$0xff] }
 0x625   :  { %v1969_v38 = vpop.f32.mrf.mxu1  ;;  %6141 = vpow2.f32 %v5044_v40  ;;  %v6264_v40 = vld [vmem:[%s7469_s2 + $0x40] sm:$0xff] }
 0x626   :  { %v1970_v44 = vadd.f32 %v6711_v45, %v1969_v38  ;;  %v6262_v38 = vld [vmem:[%s7469_s2 + $0x50] sm:$0xff] }
 0x627   :  { %v5674_v39 = vpop.f32.mrf.mxu1 }
 0x628   :  { %v6263_v39 = vld [vmem:[%s7469_s2 + $0x48] sm:$0xff] }
 0x631   :  { %v6140_v22 = vpop.eup %6139 }
 0x632   :  { %v1976_v41 = vadd.f32 1.0, %v6140_v22  ;;  %v6142_v42 = vpop.eup %6141  ;;  %v2639_v22 = vld [vmem:[#allocation8 + $0x38] sm:$0xff] }
 0x633   :  { %v1982_v43 = vadd.f32 1.0, %v6142_v42  ;;  %v6999_v42 = vld [vmem:[#allocation2 + $0x10] sm:$0xff] }
 0x634   :  { %6143 = vrcp.f32 %v1976_v41  ;;  %v6993_v41 = vld [vmem:[#allocation2 + $0x8] sm:$0xff] }
 0x635   :  { %6145 = vrcp.f32 %v1982_v43  ;;  %v2638_v43 = vld [vmem:[#allocation8 + $0x30] sm:$0xff] }
 0x641   :  { %v6144_v46 = vpop.eup %6143 }
 0x642   :  { %v1986_v47 = vmul.f32 %v6144_v46, %v1970_v44  ;;  %v6146_v50 = vpop.eup %6145  ;;  %v2637_v44 = vld [vmem:[#allocation8 + $0x28] sm:$0xff]  ;;  %v7005_v46 = vld [vmem:[#allocation2 + $0x18] sm:$0xff] }
 0x643   :  { %v1989_v51 = vsub.f32 1.0, %v6146_v50  ;;  %v1991_v53 = vmul.f32 %v6146_v50, %v1753_v33  ;;  %v2227_v33 = vld [vmem:[#allocation6 + $0x30] sm:$0xff] }
 0x644   :  { %v1987_v49 = vadd.f32 %v1986_v47, %v1985_v48  ;;  %v7009_v47 = vld [vmem:[#allocation2 + $0x20] sm:$0xff]  ;;  %v2636_v48 = vld [vmem:[#allocation8 + $0x20] sm:$0xff] }
 0x646   :  { %6147 = vtanh.f32 %v1987_v49 }
 0x653   :  { %v6148_v52 = vpop.eup %6147 }
 0x654   :  { %v1990_v54 = vmul.f32 %v6148_v52, %v1989_v51  ;;  %v7034_v51 = vld [vmem:[#allocation11 + $0x18] sm:$0xff]  ;;  %v7036_v52 = vld [vmem:[#allocation11 + $0x10] sm:$0xff] }
 0x656   :  { %v1992_v55 = vadd.f32 %v1991_v53, %v1990_v54  ;;  %v2765_v53 = vld [vmem:[#allocation8 + $0x58] sm:$0xff]  ;;  %v2764_v54 = vld [vmem:[#allocation8 + $0x50] sm:$0xff] }
 0x658   :  { %1993 = vst.msk [vmem:[#allocation7] sm:$0xff] %vm244_vm0, %v1992_v55  ;;  %1994 = vst.msk [vmem:[#allocation2 + $0x28] sm:$0xff] %vm244_vm0, %v1992_v55  ;;  %v7040_v55 = vld [vmem:[#allocation11 + $0x8] sm:$0xff] }
 0x65f   :  { %v6907_v56 = vld [vmem:[#allocation7] sm:$0xff]  ;;  %v7013_v49 = vld [vmem:[#allocation2 + $0x28] sm:$0xff] }
 0x660   :  { %5684 = vmatmul.mubr.msk.f32.vlgmr.msra.gmra.mxu0 %vm244_vm0, %v6907_v56  ;;  %5695 = vmatmul.mubr.msk.f32.vlgmr.msra.gmra.mxu1 %vm244_vm0, %v6907_v56 }
 0x661   :  { %5698 = vmatpush3.msra.mxu0 %v6571_v17  ;;  %5705 = vmatprep.mubr.msk.f32.mxu0 %vm6392_vm3, %v6391_v0  ;;  %v6254_v17 = vld [vmem:[%s7469_s2 + $0x10] sm:$0xff] }
 0x662   :  { %5699 = vmatprep.subr.mxu0 %v6391_v0  ;;  %5709 = vmatpush3.msra.mxu1 %v6253_v57  ;;  %v7046_v57 = vld [vmem:[#allocation11] sm:$0xff] }
 0x663   :  { %5700 = vmatpush3.msra.mxu0 %v6600_v21  ;;  %5710 = vmatprep.subr.mxu1 %v6391_v0  ;;  %v6256_v21 = vld [vmem:[%s7469_s2 + $0x38] sm:$0xff] }
 0x664   :  { %5701 = vmatprep.subr.mxu0 %v6391_v0  ;;  %5711 = vmatpush3.msra.mxu1 %v6254_v17  ;;  %v2762_v17 = vld [vmem:[#allocation8 + $0x40] sm:$0xff] }
 0x665   :  { %5702 = vmatpush3.msra.mxu0 %v6618_v23  ;;  %5712 = vmatprep.subr.mxu1 %v6391_v0  ;;  %v6257_v23 = vld [vmem:[%s7469_s2] sm:$0xff] }
 0x666   :  { %5703 = vmatprep.subr.mxu0 %v6391_v0  ;;  %5713 = vmatpush3.msra.mxu1 %v6255_v58  ;;  %v2238_v58 = vld [vmem:[#allocation4 + $0x38] sm:$0xff] }
 0x667   :  { %5704 = vmatpush3.msra.mxu0 %v6631_v24  ;;  %5714 = vmatprep.subr.mxu1 %v6391_v0  ;;  %v6258_v24 = vld [vmem:[%s7469_s2 + $0x30] sm:$0xff] }
 0x668   :  { %5706 = vmatmul.mubr.msk.f32.vlgmr.msra.gmra.mxu0 %vm244_vm0, %v6907_v56  ;;  %5719 = vmatprep.subr.mxu0 %v6391_v0 }
 0x669   :  { %5720 = vmatpush3.msra.mxu0 %v6256_v21  ;;  %5715 = vmatpush3.msra.mxu1 %v6257_v23 }
 0x66a   :  { %5721 = vmatprep.subr.mxu0 %v6391_v0  ;;  %5716 = vmatprep.mubr.msk.f32.mxu1 %vm6392_vm3, %v6391_v0 }
 0x66b   :  { %5722 = vmatpush3.msra.mxu0 %v6258_v24  ;;  %5727 = vmatprep.mubr.msk.f32.mxu0 %vm6392_vm3, %v6391_v0 }
 0x66c   :  { %5723 = vmatprep.subr.mxu0 %v6391_v0  ;;  %5730 = vmatprep.subr.mxu1 %v6391_v0 }
 0x66d   :  { %5724 = vmatpush3.msra.mxu0 %v6259_v16 }
 0x66e   :  { %5725 = vmatprep.subr.mxu0 %v6391_v0 }
 0x66f   :  { %5726 = vmatpush3.msra.mxu0 %v6260_v59 }
 0x670   :  { %5741 = vmatprep.subr.mxu0 %v2490_v60 }
 0x720   :  { %v2066_v63 = vpop.f32.mrf.mxu0  ;;  %v2139_v1 = vpop.f32.mrf.mxu1 }
 0x721   :  { %v2070_v2 = vadd.f32 %v2066_v63, %v1996_v62  ;;  %v2143_v9 = vadd.f32 %v2139_v1, %v2072_v6  ;;  %v2314_v63 = vld [vmem:[#allocation5 + $0x38] sm:$0xff] }
 0x722   :  { %v5685_v3 = vpop.f32.mrf.mxu0  ;;  %v5696_v4 = vpop.f32.mrf.mxu1 }
 0x723   :  { %v2071_v5 = vadd.f32 %v6689_v61, %v2070_v2  ;;  %v2144_v12 = vadd.f32 %v6700_v26, %v2143_v9  ;;  %v7054_v3 = vld [vmem:[#allocation13] ss:$0 sm:$0xff]  ;;  %v6266_v4 = vld [vmem:[%s7471_s4 + $0x1] ss:$0 sm:$0xff] }
 0x725   :  { %v5048_v8 = vmul.f32 -1.442695, %v2071_v5  ;;  %v5049_v25 = vmul.f32 -1.442695, %v2144_v12 }
 0x727   :  { %6149 = vpow2.f32 %v5048_v8 }
 0x728   :  { %v2211_v11 = vpop.f32.mrf.mxu0  ;;  %6151 = vpow2.f32 %v5049_v25 }
 0x729   :  { %v2212_v31 = vadd.f32 %v6711_v45, %v2211_v11  ;;  %v2489_v45 = vld [vmem:[#allocation8 + $0x10] sm:$0xff] }
 0x72a   :  { %v5707_v15 = vpop.f32.mrf.mxu0 }
 0x734   :  { %v6150_v27 = vpop.eup %6149 }
 0x735   :  { %v2218_v28 = vadd.f32 1.0, %v6150_v27  ;;  %v6152_v29 = vpop.eup %6151 }
 0x736   :  { %v2224_v30 = vadd.f32 1.0, %v6152_v29 }
 0x737   :  { %6153 = vrcp.f32 %v2218_v28 }
 0x738   :  { %6155 = vrcp.f32 %v2224_v30 }
 0x744   :  { %v6154_v32 = vpop.eup %6153 }
 0x745   :  { %v2228_v61 = vmul.f32 %v6154_v32, %v2212_v31  ;;  %v6156_v10 = vpop.eup %6155  ;;  %v7066_v31 = vld [vmem:[#allocation13 + $0x1] ss:$0 sm:$0xff] }
 0x746   :  { %v2231_v13 = vsub.f32 1.0, %v6156_v10  ;;  %v2233_v26 = vmul.f32 %v6156_v10, %v6907_v56  ;;  %v2763_v56 = vld [vmem:[#allocation8 + $0x48] sm:$0xff] }
 0x747   :  { %v2229_v7 = vadd.f32 %v2228_v61, %v2227_v33 }
 0x749   :  { %6157 = vtanh.f32 %v2229_v7 }
 0x756   :  { %v6158_v14 = vpop.eup %6157 }
 0x757   :  { %v2232_v18 = vmul.f32 %v6158_v14, %v2231_v13 }
 0x759   :  { %v2234_v19 = vadd.f32 %v2233_v26, %v2232_v18 }
 0x75b   :  { %2235 = vst.msk [vmem:[#allocation7] sm:$0xff] %vm244_vm0, %v2234_v19  ;;  %2236 = vst.msk [vmem:[#allocation2 + $0x30] sm:$0xff] %vm244_vm0, %v2234_v19 }
 0x762   :  { %v6966_v34 = vld [vmem:[#allocation7] sm:$0xff]  ;;  %v7017_v50 = vld [vmem:[#allocation2 + $0x30] sm:$0xff] }
 0x763   :  { %5717 = vmatmul.mubr.msk.f32.vlgmr.msra.gmra.mxu1 %vm244_vm0, %v6966_v34  ;;  %5728 = vmatmul.mubr.msk.f32.vlgmr.msra.gmra.mxu0 %vm244_vm0, %v6966_v34 }
 0x764   :  { %5731 = vmatpush3.msra.mxu1 %v6261_v35  ;;  %5742 = vmatpush3.msra.mxu0 %v2490_v60  ;;  %v6265_v60 = vld [vmem:[%s7471_s4] ss:$0 sm:$0xff] }
 0x765   :  { %5732 = vmatprep.subr.mxu1 %v6391_v0  ;;  %5743 = vmatprep.subr.mxu0 %v2489_v45 }
 0x766   :  { %5749 = vmatprep.mubr.msk.f32.mxu0 %vm244_vm0, %v6976_v36  ;;  %5733 = vmatpush3.msra.mxu1 %v6262_v38 }
 0x767   :  { %5744 = vmatpush3.msra.mxu0 %v2489_v45  ;;  %5734 = vmatprep.subr.mxu1 %v6391_v0 }
 0x768   :  { %5745 = vmatprep.subr.mxu0 %v2488_v37  ;;  %5735 = vmatpush3.msra.mxu1 %v6263_v39 }
 0x769   :  { %5746 = vmatpush3.msra.mxu0 %v2488_v37  ;;  %5736 = vmatprep.subr.mxu1 %v6391_v0 }
 0x76a   :  { %5747 = vmatprep.subr.mxu0 %v2487_v20  ;;  %5737 = vmatpush3.msra.mxu1 %v6264_v40 }
 0x76b   :  { %5738 = vmatprep.mubr.msk.f32.mxu1 %vm6392_vm3, %v6391_v0  ;;  %5748 = vmatpush3.msra.mxu0 %v2487_v20 }
 0x76c   :  { %5739 = vmatmul.mubr.msk.f32.vlgmr.msra.gmra.mxu1 %vm244_vm0, %v6966_v34  ;;  %5750 = vmatmul.mubr.msk.f32.vlgmr.msra.gmra.mxu0 %vm244_vm0, %v6993_v41 }
 0x76d   :  { %5761 = vmatprep.subr.mxu1 %v2639_v22  ;;  %5752 = vmatprep.mubr.msk.f32.mxu0 %vm244_vm0, %v6999_v42 }
 0x76e   :  { %5762 = vmatpush3.msra.mxu1 %v2639_v22  ;;  %5769 = vmatprep.mubr.msk.f32.mxu1 %vm244_vm0, %v6976_v36 }
 0x76f   :  { %5763 = vmatprep.subr.mxu1 %v2638_v43  ;;  %5781 = vmatprep.subr.mxu0 %v2765_v53 }
 0x770   :  { %5764 = vmatpush3.msra.mxu1 %v2638_v43  ;;  %5753 = vmatmul.mubr.msk.f32.gmra.mxu0 %vm244_vm0, %v7005_v46 }
 0x771   :  { %5765 = vmatprep.subr.mxu1 %v2637_v44  ;;  %5755 = vmatprep.mubr.msk.f32.mxu0 %vm244_vm0, %v7009_v47 }
 0x772   :  { %5766 = vmatpush3.msra.mxu1 %v2637_v44  ;;  %5782 = vmatpush3.msra.mxu0 %v2765_v53 }
 0x773   :  { %5767 = vmatprep.subr.mxu1 %v2636_v48  ;;  %5783 = vmatprep.subr.mxu0 %v2764_v54 }
 0x774   :  { %5768 = vmatpush3.msra.mxu1 %v2636_v48  ;;  %5756 = vmatmul.mubr.msk.f32.gmra.mxu0 %vm244_vm0, %v7013_v49  ;;  %v6267_v48 = vld [vmem:[%s7471_s4 + $0x2] ss:$0 sm:$0xff] }
 0x775   :  { %5770 = vmatmul.mubr.msk.f32.vlgmr.msra.gmra.mxu1 %vm244_vm0, %v6993_v41  ;;  %5758 = vmatprep.mubr.msk.f32.mxu0 %vm244_vm0, %v7017_v50 }
 0x776   :  { %5772 = vmatprep.mubr.msk.f32.mxu1 %vm244_vm0, %v6999_v42  ;;  %5801 = vmatprep.subr.mxu1 %v6391_v0 }
 0x777   :  { %5802 = vmatpush3.msra.mxu1 %v7034_v51  ;;  %5784 = vmatpush3.msra.mxu0 %v2764_v54 }
 0x778   :  { %5803 = vmatprep.subr.mxu1 %v6391_v0  ;;  %5785 = vmatprep.subr.mxu0 %v2763_v56 }
 0x779   :  { %5773 = vmatmul.mubr.msk.f32.gmra.mxu1 %vm244_vm0, %v7005_v46  ;;  %5786 = vmatpush3.msra.mxu0 %v2763_v56 }
 0x77a   :  { %5775 = vmatprep.mubr.msk.f32.mxu1 %vm244_vm0, %v7009_v47  ;;  %5804 = vmatpush3.msra.mxu1 %v7036_v52 }
 0x77b   :  { %5805 = vmatprep.subr.mxu1 %v6391_v0  ;;  %5787 = vmatprep.subr.mxu0 %v2762_v17 }
 0x77c   :  { %5806 = vmatpush3.msra.mxu1 %v7040_v55  ;;  %5788 = vmatpush3.msra.mxu0 %v2762_v17  ;;  %v2469_v17 = vld [vmem:[#allocation6 + $0x38] sm:$0xff] }
 0x77d   :  { %5776 = vmatmul.mubr.msk.f32.gmra.mxu1 %vm244_vm0, %v7013_v49  ;;  %5807 = vmatprep.subr.mxu1 %v6391_v0 }
 0x77e   :  { %5778 = vmatprep.mubr.msk.f32.mxu1 %vm244_vm0, %v7017_v50  ;;  %5808 = vmatpush3.msra.mxu1 %v7046_v57 }
 0x77f   :  { %5812 = vmatprep.subr.mxu1 %v6391_v0  ;;  %5823 = vmatprep.subr.mxu0 %v6391_v0 }
 0x823   :  { %v2308_v21 = vpop.f32.mrf.mxu1  ;;  %v2381_v23 = vpop.f32.mrf.mxu0 }
 0x824   :  { %v2312_v24 = vadd.f32 %v2308_v21, %v2238_v58  ;;  %v2385_v2 = vadd.f32 %v2381_v23, %v2314_v63  ;;  %v7101_v63 = vld [vmem:[#allocation11 + $0x38] sm:$0xff] }
 0x825   :  { %v5718_v16 = vpop.f32.mrf.mxu1  ;;  %v5729_v59 = vpop.f32.mrf.mxu0 }
 0x826   :  { %v2313_v62 = vadd.f32 %v6265_v60, %v2312_v24  ;;  %v2386_v5 = vadd.f32 %v6266_v4, %v2385_v2  ;;  %v7109_v2 = vld [vmem:[#allocation11 + $0x58] sm:$0xff]  ;;  %v7126_v4 = vld [vmem:[#allocation11 + $0x50] sm:$0xff] }
 0x828   :  { %v5053_v1 = vmul.f32 -1.442695, %v2313_v62  ;;  %v5054_v25 = vmul.f32 -1.442695, %v2386_v5 }
 0x82a   :  { %6159 = vpow2.f32 %v5053_v1  ;;  %v7107_v1 = vld [vmem:[#allocation11 + $0x30] sm:$0xff] }
 0x82b   :  { %6161 = vpow2.f32 %v5054_v25  ;;  %v7182_v25 = vld [vmem:[#allocation14] ss:$0 sm:$0xff] }
 0x82c   :  { %v2453_v6 = vpop.f32.mrf.mxu1  ;;  %v5751_v8 = vpop.f32.mrf.mxu0 }
 0x82d   :  { %v2594_v9 = vadd.f32 %v5751_v8, %v7054_v3  ;;  %v2454_v53 = vadd.f32 %v6267_v48, %v2453_v6 }
 0x82e   :  { %v5740_v11 = vpop.f32.mrf.mxu1  ;;  %v2588_v12 = vpop.f32.mrf.mxu0 }
 0x82f   :  { %2628 = vst.msk [vmem:[#allocation4 + $0x8] sm:$0xff] %vm244_vm0, %v2594_v9  ;;  %v2589_v15 = vadd.f32 %v7054_v3, %v2588_v12  ;;  %v5073_v9 = vld [vmem:[#allocation13 + $0x2] ss:$0 sm:$0xff] }
 0x830   :  { %v5754_v27 = vpop.f32.mrf.mxu0 }
 0x831   :  { %2627 = vst.msk [vmem:[#allocation4] sm:$0xff] %vm244_vm0, %v2589_v15  ;;  %v2604_v28 = vadd.f32 %v5754_v27, %v7054_v3 }
 0x832   :  { %v2598_v29 = vpop.f32.mrf.mxu0 }
 0x833   :  { %2630 = vst.msk [vmem:[#allocation4 + $0x18] sm:$0xff] %vm244_vm0, %v2604_v28  ;;  %v2599_v30 = vadd.f32 %v7054_v3, %v2598_v29 }
 0x834   :  { %v5757_v32 = vpop.f32.mrf.mxu0 }
 0x835   :  { %2629 = vst.msk [vmem:[#allocation4 + $0x10] sm:$0xff] %vm244_vm0, %v2599_v30  ;;  %v2614_v61 = vadd.f32 %v5757_v32, %v7054_v3  ;;  %v5771_v33 = vpop.f32.mrf.mxu1 }
 0x836   :  { %v2720_v7 = vadd.f32 %v5771_v33, %v7066_v31  ;;  %v2608_v10 = vpop.f32.mrf.mxu0 }
 0x837   :  { %v6160_v13 = vpop.eup %6159  ;;  %2632 = vst.msk [vmem:[#allocation4 + $0x28] sm:$0xff] %vm244_vm0, %v2614_v61  ;;  %v2609_v14 = vadd.f32 %v7054_v3, %v2608_v10  ;;  %v2714_v26 = vpop.f32.mrf.mxu1 }
 0x838   :  { %v2460_v18 = vadd.f32 1.0, %v6160_v13  ;;  %2754 = vst.msk [vmem:[#allocation5 + $0x8] sm:$0xff] %vm244_vm0, %v2720_v7  ;;  %v2715_v19 = vadd.f32 %v7066_v31, %v2714_v26  ;;  %v6162_v43 = vpop.eup %6161  ;;  %v2908_v27 = vld [vmem:[#allocation4] sm:$0xff]  ;;  %v7190_v26 = vld [vmem:[#allocation14 + $0x1] ss:$0 sm:$0xff] }
 0x839   :  { %2631 = vst.msk [vmem:[#allocation4 + $0x20] sm:$0xff] %vm244_vm0, %v2609_v14  ;;  %v5774_v45 = vpop.f32.mrf.mxu1  ;;  %v2466_v44 = vadd.f32 1.0, %v6162_v43 }
 0x83a   :  { %6163 = vrcp.f32 %v2460_v18  ;;  %2753 = vst.msk [vmem:[#allocation5] sm:$0xff] %vm244_vm0, %v2715_v19  ;;  %v2730_v35 = vadd.f32 %v5774_v45, %v7066_v31 }
 0x83b   :  { %v2724_v37 = vpop.f32.mrf.mxu1  ;;  %6165 = vrcp.f32 %v2466_v44 }
 0x83c   :  { %2756 = vst.msk [vmem:[#allocation5 + $0x18] sm:$0xff] %vm244_vm0, %v2730_v35  ;;  %v2725_v38 = vadd.f32 %v7066_v31, %v2724_v37 }
 0x83d   :  { %v5777_v20 = vpop.f32.mrf.mxu1 }
 0x83e   :  { %2755 = vst.msk [vmem:[#allocation5 + $0x10] sm:$0xff] %vm244_vm0, %v2725_v38  ;;  %v2740_v39 = vadd.f32 %v5777_v20, %v7066_v31 }
 0x83f   :  { %v2734_v40 = vpop.f32.mrf.mxu1 }
 0x840   :  { %2758 = vst.msk [vmem:[#allocation5 + $0x28] sm:$0xff] %vm244_vm0, %v2740_v39  ;;  %v2735_v22 = vadd.f32 %v7066_v31, %v2734_v40 }
 0x841   :  { %v2990_v18 = vld [vmem:[#allocation5] sm:$0xff] }
 0x842   :  { %2757 = vst.msk [vmem:[#allocation5 + $0x20] sm:$0xff] %vm244_vm0, %v2735_v22 }
 0x847   :  { %v6164_v54 = vpop.eup %6163 }
 0x848   :  { %v2470_v56 = vmul.f32 %v6164_v54, %v2454_v53  ;;  %v6166_v21 = vpop.eup %6165 }
 0x849   :  { %v2473_v23 = vsub.f32 1.0, %v6166_v21  ;;  %v2475_v16 = vmul.f32 %v6166_v21, %v6966_v34 }
 0x84a   :  { %v2471_v58 = vadd.f32 %v2470_v56, %v2469_v17 }
 0x84c   :  { %6167 = vtanh.f32 %v2471_v58 }
 0x859   :  { %v6168_v24 = vpop.eup %6167 }
 0x85a   :  { %v2474_v59 = vmul.f32 %v6168_v24, %v2473_v23  ;;  %v7198_v23 = vld [vmem:[#allocation14 + $0x2] ss:$0 sm:$0xff] }
 0x85c   :  { %v2476_v60 = vadd.f32 %v2475_v16, %v2474_v59 }
 0x85e   :  { %2477 = vst.msk [vmem:[#allocation7] sm:$0xff] %vm244_vm0, %v2476_v60  ;;  %2478 = vst.msk [vmem:[#allocation2 + $0x38] sm:$0xff] %vm244_vm0, %v2476_v60 }
 0x85f   :  { %2906 = vst.msk [vmem:[#allocation7] sm:$0xff] %vm244_vm0, %v6391_v0 }
 0x865   :  { %v2486_v62 = vld [vmem:[#allocation2 + $0x38] sm:$0xff] }
 0x866   :  { %5759 = vmatmul.mubr.msk.f32.gmra.mxu0 %vm244_vm0, %v2486_v62  ;;  %5779 = vmatmul.mubr.msk.f32.gmra.mxu1 %vm244_vm0, %v2486_v62  ;;  %v7099_v34 = vld [vmem:[#allocation7] sm:$0xff] }
 0x867   :  { %5789 = vmatprep.mubr.msk.f32.mxu0 %vm244_vm0, %v6976_v36  ;;  %5809 = vmatprep.mubr.msk.f32.mxu1 %vm6392_vm3, %v6391_v0  ;;  %v7115_v36 = vld [vmem:[#allocation11 + $0x28] sm:$0xff] }
 0x86a   :  { %5790 = vmatmul.mubr.msk.f32.vlgmr.msra.gmra.mxu0 %vm244_vm0, %v6993_v41  ;;  %5810 = vmatmul.mubr.msk.f32.vlgmr.msra.gmra.mxu1 %vm244_vm0, %v7099_v34  ;;  %v7124_v41 = vld [vmem:[#allocation11 + $0x20] sm:$0xff] }
 0x86b   :  { %5813 = vmatpush3.msra.mxu1 %v7101_v63  ;;  %5792 = vmatprep.mubr.msk.f32.mxu0 %vm244_vm0, %v6999_v42  ;;  %v7135_v42 = vld [vmem:[#allocation11 + $0x48] sm:$0xff] }
 0x86c   :  { %5814 = vmatprep.subr.mxu1 %v6391_v0  ;;  %5820 = vmatprep.mubr.msk.f32.mxu1 %vm6392_vm3, %v6391_v0 }
 0x86d   :  { %5815 = vmatpush3.msra.mxu1 %v7107_v1  ;;  %5824 = vmatpush3.msra.mxu0 %v7109_v2 }
 0x86e   :  { %5816 = vmatprep.subr.mxu1 %v6391_v0  ;;  %5793 = vmatmul.mubr.msk.f32.gmra.mxu0 %vm244_vm0, %v7005_v46  ;;  %v7145_v46 = vld [vmem:[#allocation11 + $0x40] sm:$0xff] }
 0x86f   :  { %5817 = vmatpush3.msra.mxu1 %v7115_v36  ;;  %5795 = vmatprep.mubr.msk.f32.mxu0 %vm244_vm0, %v7009_v47 }
 0x870   :  { %5818 = vmatprep.subr.mxu1 %v6391_v0  ;;  %5825 = vmatprep.subr.mxu0 %v6391_v0 }
 0x871   :  { %5819 = vmatpush3.msra.mxu1 %v7124_v41  ;;  %5826 = vmatpush3.msra.mxu0 %v7126_v4 }
 0x872   :  { %5821 = vmatmul.mubr.msk.f32.vlgmr.msra.gmra.mxu1 %vm244_vm0, %v7099_v34  ;;  %5796 = vmatmul.mubr.msk.f32.gmra.mxu0 %vm244_vm0, %v7013_v49 }
 0x873   :  { %5798 = vmatprep.mubr.msk.f32.mxu0 %vm244_vm0, %v7017_v50  ;;  %5827 = vmatprep.subr.mxu0 %v6391_v0 }
 0x874   :  { %5828 = vmatpush3.msra.mxu0 %v7135_v42  ;;  %5834 = vmatprep.subr.mxu1 %v6391_v0 }
 0x875   :  { %5829 = vmatprep.subr.mxu0 %v6391_v0  ;;  %5835 = vmatpush3.msra.mxu1 %v7034_v51 }
 0x876   :  { %5799 = vmatmul.mubr.msk.f32.gmra.mxu0 %vm244_vm0, %v2486_v62  ;;  %5836 = vmatprep.subr.mxu1 %v6391_v0 }
 0x877   :  { %5830 = vmatpush3.msra.mxu0 %v7145_v46  ;;  %5831 = vmatprep.mubr.msk.f32.mxu0 %vm6392_vm3, %v6391_v0 }
 0x878   :  { %5845 = vmatprep.subr.mxu0 %v6391_v0  ;;  %5837 = vmatpush3.msra.mxu1 %v7036_v52 }
 0x879   :  { %5838 = vmatprep.subr.mxu1 %v6391_v0  ;;  %5842 = vmatprep.mubr.msk.f32.mxu1 %vm6392_vm3, %v6391_v0 }
 0x87a   :  { %5832 = vmatmul.mubr.msk.f32.vlgmr.msra.gmra.mxu0 %vm244_vm0, %v7099_v34  ;;  %5839 = vmatpush3.msra.mxu1 %v7040_v55 }
 0x87b   :  { %5846 = vmatpush3.msra.mxu0 %v7101_v63  ;;  %5840 = vmatprep.subr.mxu1 %v6391_v0 }
 0x87c   :  { %5847 = vmatprep.subr.mxu0 %v6391_v0  ;;  %5841 = vmatpush3.msra.mxu1 %v7046_v57 }
 0x87d   :  { %5848 = vmatpush3.msra.mxu0 %v7107_v1  ;;  %5853 = vmatprep.mubr.msk.f32.mxu0 %vm6392_vm3, %v6391_v0 }
 0x87e   :  { %5849 = vmatprep.subr.mxu0 %v6391_v0  ;;  %5856 = vmatprep.subr.mxu1 %v6391_v0 }
 0x87f   :  { %5850 = vmatpush3.msra.mxu0 %v7115_v36 }
 0x880   :  { %5851 = vmatprep.subr.mxu0 %v6391_v0 }
 0x881   :  { %5852 = vmatpush3.msra.mxu0 %v7124_v41 }
 0x882   :  { %5867 = vmatprep.subr.mxu0 %v6391_v0 }
 0x926   :  { %v5760_v47 = vpop.f32.mrf.mxu0  ;;  %v5780_v49 = vpop.f32.mrf.mxu1 }
 0x927   :  { %v2624_v50 = vadd.f32 %v5760_v47, %v7054_v3  ;;  %v2750_v5 = vadd.f32 %v5780_v49, %v7066_v31 }
 0x928   :  { %v2618_v6 = vpop.f32.mrf.mxu0  ;;  %v2744_v8 = vpop.f32.mrf.mxu1 }
 0x929   :  { %2634 = vst.msk [vmem:[#allocation4 + $0x38] sm:$0xff] %vm244_vm0, %v2624_v50  ;;  %2760 = vst.msk [vmem:[#allocation5 + $0x38] sm:$0xff] %vm244_vm0, %v2750_v5  ;;  %v2619_v11 = vadd.f32 %v7054_v3, %v2618_v6  ;;  %v2745_v12 = vadd.f32 %v7066_v31, %v2744_v8 }
 0x92a   :  { %v5791_v15 = vpop.f32.mrf.mxu0  ;;  %v2978_v28 = vpop.f32.mrf.mxu1 }
 0x92b   :  { %2633 = vst.msk [vmem:[#allocation4 + $0x30] sm:$0xff] %vm244_vm0, %v2619_v11  ;;  %2759 = vst.msk [vmem:[#allocation5 + $0x30] sm:$0xff] %vm244_vm0, %v2745_v12  ;;  %v2846_v29 = vadd.f32 %v5791_v15, %v5073_v9  ;;  %v2982_v30 = vadd.f32 %v2978_v28, %v2908_v27 }
 0x92c   :  { %v2840_v32 = vpop.f32.mrf.mxu0  ;;  %v5811_v61 = vpop.f32.mrf.mxu1 }
 0x92d   :  { %2880 = vst.msk [vmem:[#allocation6 + $0x8] sm:$0xff] %vm244_vm0, %v2846_v29  ;;  %v2989_v33 = vadd.f32 %v7182_v25, %v2982_v30  ;;  %v2841_v3 = vadd.f32 %v5073_v9, %v2840_v32  ;;  %v3243_v32 = vld [vmem:[#allocation5 + $0x8] sm:$0xff] }
 0x92e   :  { %v5794_v7 = vpop.f32.mrf.mxu0 }
 0x92f   :  { %v5088_v31 = vmul.f32 -1.442695, %v2989_v33  ;;  %2879 = vst.msk [vmem:[#allocation6] sm:$0xff] %vm244_vm0, %v2841_v3  ;;  %v2856_v10 = vadd.f32 %v5794_v7, %v5073_v9 }
 0x930   :  { %v2850_v13 = vpop.f32.mrf.mxu0 }
 0x931   :  { %6169 = vpow2.f32 %v5088_v31  ;;  %2882 = vst.msk [vmem:[#allocation6 + $0x18] sm:$0xff] %vm244_vm0, %v2856_v10  ;;  %v2851_v14 = vadd.f32 %v5073_v9, %v2850_v13 }
 0x932   :  { %v3057_v19 = vpop.f32.mrf.mxu1  ;;  %v5797_v45 = vpop.f32.mrf.mxu0 }
 0x933   :  { %2881 = vst.msk [vmem:[#allocation6 + $0x10] sm:$0xff] %vm244_vm0, %v2851_v14  ;;  %v3061_v35 = vadd.f32 %v3057_v19, %v2990_v18  ;;  %v2866_v37 = vadd.f32 %v5797_v45, %v5073_v9 }
 0x934   :  { %v2860_v38 = vpop.f32.mrf.mxu0  ;;  %v5822_v20 = vpop.f32.mrf.mxu1 }
 0x935   :  { %v3068_v39 = vadd.f32 %v7190_v26, %v3061_v35  ;;  %2884 = vst.msk [vmem:[#allocation6 + $0x28] sm:$0xff] %vm244_vm0, %v2866_v37  ;;  %v2861_v40 = vadd.f32 %v5073_v9, %v2860_v38  ;;  %v3398_v38 = vld [vmem:[#allocation6 + $0x8] sm:$0xff] }
 0x936   :  { %v5800_v22 = vpop.f32.mrf.mxu0  ;;  %v3157_v62 = vld [vmem:[#allocation6] sm:$0xff] }
 0x937   :  { %v5089_v43 = vmul.f32 -1.442695, %v3068_v39  ;;  %2883 = vst.msk [vmem:[#allocation6 + $0x20] sm:$0xff] %vm244_vm0, %v2861_v40  ;;  %v2876_v44 = vadd.f32 %v5800_v22, %v5073_v9 }
 0x938   :  { %v2870_v48 = vpop.f32.mrf.mxu0 }
 0x939   :  { %2886 = vst.msk [vmem:[#allocation6 + $0x38] sm:$0xff] %vm244_vm0, %v2876_v44  ;;  %v2871_v53 = vadd.f32 %v5073_v9, %v2870_v48  ;;  %6171 = vpow2.f32 %v5089_v43 }
 0x93a   :  { %v3141_v54 = vpop.f32.mrf.mxu0 }
 0x93b   :  { %2885 = vst.msk [vmem:[#allocation6 + $0x30] sm:$0xff] %vm244_vm0, %v2871_v53  ;;  %v3142_v16 = vadd.f32 %v7198_v23, %v3141_v54  ;;  %v3408_v54 = vld [vmem:[#allocation4 + $0x10] sm:$0xff] }
 0x93c   :  { %v5833_v56 = vpop.f32.mrf.mxu0 }
 0x93e   :  { %v6170_v17 = vpop.eup %6169 }
 0x93f   :  { %v3148_v58 = vadd.f32 1.0, %v6170_v17 }
 0x941   :  { %6173 = vrcp.f32 %v3148_v58 }
 0x946   :  { %v6172_v21 = vpop.eup %6171 }
 0x947   :  { %v3154_v24 = vadd.f32 1.0, %v6172_v21 }
 0x949   :  { %6175 = vrcp.f32 %v3154_v24 }
 0x94e   :  { %v6174_v59 = vpop.eup %6173 }
 0x94f   :  { %v3158_v60 = vmul.f32 %v6174_v59, %v3142_v16  ;;  %v3484_v59 = vld [vmem:[#allocation5 + $0x10] sm:$0xff] }
 0x951   :  { %v3159_v47 = vadd.f32 %v3158_v60, %v3157_v62 }
 0x953   :  { %6177 = vtanh.f32 %v3159_v47 }
 0x956   :  { %v6176_v49 = vpop.eup %6175 }
 0x957   :  { %v3161_v50 = vsub.f32 1.0, %v6176_v49  ;;  %v3163_v6 = vmul.f32 %v6176_v49, %v7099_v34  ;;  %v3167_v34 = vld [vmem:[#allocation4 + $0x8] sm:$0xff] }
 0x960   :  { %v6178_v5 = vpop.eup %6177 }
 0x961   :  { %v3162_v8 = vmul.f32 %v6178_v5, %v3161_v50 }
 0x963   :  { %v3164_v9 = vadd.f32 %v3163_v6, %v3162_v8 }
 0x965   :  { %3165 = vst.msk [vmem:[#allocation7] sm:$0xff] %vm244_vm0, %v3164_v9 }
 0x96c   :  { %v3166_v11 = vld [vmem:[#allocation7] sm:$0xff] }
 0x96d   :  { %5843 = vmatmul.mubr.msk.f32.vlgmr.msra.gmra.mxu1 %vm244_vm0, %v3166_v11  ;;  %5854 = vmatmul.mubr.msk.f32.vlgmr.msra.gmra.mxu0 %vm244_vm0, %v3166_v11 }
 0x96e   :  { %5857 = vmatpush3.msra.mxu1 %v7109_v2  ;;  %5864 = vmatprep.mubr.msk.f32.mxu1 %vm6392_vm3, %v6391_v0 }
 0x96f   :  { %5858 = vmatprep.subr.mxu1 %v6391_v0  ;;  %5868 = vmatpush3.msra.mxu0 %v7034_v51 }
 0x970   :  { %5859 = vmatpush3.msra.mxu1 %v7126_v4  ;;  %5869 = vmatprep.subr.mxu0 %v6391_v0 }
 0x971   :  { %5860 = vmatprep.subr.mxu1 %v6391_v0  ;;  %5870 = vmatpush3.msra.mxu0 %v7036_v52 }
 0x972   :  { %5861 = vmatpush3.msra.mxu1 %v7135_v42  ;;  %5871 = vmatprep.subr.mxu0 %v6391_v0 }
 0x973   :  { %5862 = vmatprep.subr.mxu1 %v6391_v0  ;;  %5872 = vmatpush3.msra.mxu0 %v7040_v55 }
 0x974   :  { %5863 = vmatpush3.msra.mxu1 %v7145_v46  ;;  %5873 = vmatprep.subr.mxu0 %v6391_v0 }
 0x975   :  { %5865 = vmatmul.mubr.msk.f32.vlgmr.msra.gmra.mxu1 %vm244_vm0, %v3166_v11  ;;  %5878 = vmatprep.subr.mxu1 %v6391_v0 }
 0x976   :  { %5879 = vmatpush3.msra.mxu1 %v7101_v63  ;;  %5874 = vmatpush3.msra.mxu0 %v7046_v57 }
 0x977   :  { %5880 = vmatprep.subr.mxu1 %v6391_v0  ;;  %5875 = vmatprep.mubr.msk.f32.mxu0 %vm6392_vm3, %v6391_v0 }
 0x978   :  { %5881 = vmatpush3.msra.mxu1 %v7107_v1  ;;  %5886 = vmatprep.mubr.msk.f32.mxu1 %vm6392_vm3, %v6391_v0 }
 0x979   :  { %5882 = vmatprep.subr.mxu1 %v6391_v0  ;;  %5889 = vmatprep.subr.mxu0 %v6391_v0 }
 0x97a   :  { %5883 = vmatpush3.msra.mxu1 %v7115_v36 }
 0x97b   :  { %5884 = vmatprep.subr.mxu1 %v6391_v0 }
 0x97c   :  { %5885 = vmatpush3.msra.mxu1 %v7124_v41 }
 0x97d   :  { %5900 = vmatprep.subr.mxu1 %v6391_v0 }
 0xa2d   :  { %v3237_v12 = vpop.f32.mrf.mxu1  ;;  %v3310_v15 = vpop.f32.mrf.mxu0 }
 0xa2e   :  { %v3241_v27 = vadd.f32 %v3237_v12, %v3167_v34  ;;  %v3314_v33 = vadd.f32 %v3310_v15, %v3243_v32 }
 0xa2f   :  { %v5844_v28 = vpop.f32.mrf.mxu1  ;;  %v5855_v29 = vpop.f32.mrf.mxu0 }
 0xa30   :  { %v3242_v30 = vadd.f32 %v7182_v25, %v3241_v27  ;;  %v3315_v7 = vadd.f32 %v7190_v26, %v3314_v33  ;;  %v3639_v27 = vld [vmem:[#allocation6 + $0x10] sm:$0xff] }
 0xa32   :  { %v5093_v61 = vmul.f32 -1.442695, %v3242_v30  ;;  %v5094_v10 = vmul.f32 -1.442695, %v3315_v7 }
 0xa34   :  { %6179 = vpow2.f32 %v5093_v61 }
 0xa35   :  { %v3382_v3 = vpop.f32.mrf.mxu1  ;;  %6181 = vpow2.f32 %v5094_v10 }
 0xa36   :  { %v3383_v45 = vadd.f32 %v7198_v23, %v3382_v3 }
 0xa37   :  { %v5866_v31 = vpop.f32.mrf.mxu1 }
 0xa38   :  { %v3649_v31 = vld [vmem:[#allocation4 + $0x18] sm:$0xff] }
 0xa41   :  { %v6180_v13 = vpop.eup %6179 }
 0xa42   :  { %v3389_v14 = vadd.f32 1.0, %v6180_v13  ;;  %v6182_v18 = vpop.eup %6181 }
 0xa43   :  { %v3395_v19 = vadd.f32 1.0, %v6182_v18 }
 0xa44   :  { %6183 = vrcp.f32 %v3389_v14 }
 0xa45   :  { %6185 = vrcp.f32 %v3395_v19 }
 0xa51   :  { %v6184_v35 = vpop.eup %6183 }
 0xa52   :  { %v3399_v37 = vmul.f32 %v6184_v35, %v3383_v45  ;;  %v6186_v39 = vpop.eup %6185  ;;  %v3725_v35 = vld [vmem:[#allocation5 + $0x18] sm:$0xff] }
 0xa53   :  { %v3402_v40 = vsub.f32 1.0, %v6186_v39  ;;  %v3404_v43 = vmul.f32 %v6186_v39, %v3166_v11 }
 0xa54   :  { %v3400_v20 = vadd.f32 %v3399_v37, %v3398_v38 }
 0xa56   :  { %6187 = vtanh.f32 %v3400_v20 }
 0xa63   :  { %v6188_v22 = vpop.eup %6187 }
 0xa64   :  { %v3403_v44 = vmul.f32 %v6188_v22, %v3402_v40 }
 0xa66   :  { %v3405_v48 = vadd.f32 %v3404_v43, %v3403_v44 }
 0xa68   :  { %3406 = vst.msk [vmem:[#allocation7] sm:$0xff] %vm244_vm0, %v3405_v48 }
 0xa6f   :  { %v3407_v53 = vld [vmem:[#allocation7] sm:$0xff] }
 0xa70   :  { %5876 = vmatmul.mubr.msk.f32.vlgmr.msra.gmra.mxu0 %vm244_vm0, %v3407_v53  ;;  %5887 = vmatmul.mubr.msk.f32.vlgmr.msra.gmra.mxu1 %vm244_vm0, %v3407_v53 }
 0xa71   :  { %5890 = vmatpush3.msra.mxu0 %v7109_v2  ;;  %5897 = vmatprep.mubr.msk.f32.mxu0 %vm6392_vm3, %v6391_v0 }
 0xa72   :  { %5891 = vmatprep.subr.mxu0 %v6391_v0  ;;  %5901 = vmatpush3.msra.mxu1 %v7034_v51 }
 0xa73   :  { %5892 = vmatpush3.msra.mxu0 %v7126_v4  ;;  %5902 = vmatprep.subr.mxu1 %v6391_v0 }
 0xa74   :  { %5893 = vmatprep.subr.mxu0 %v6391_v0  ;;  %5903 = vmatpush3.msra.mxu1 %v7036_v52 }
 0xa75   :  { %5894 = vmatpush3.msra.mxu0 %v7135_v42  ;;  %5904 = vmatprep.subr.mxu1 %v6391_v0 }
 0xa76   :  { %5895 = vmatprep.subr.mxu0 %v6391_v0  ;;  %5905 = vmatpush3.msra.mxu1 %v7040_v55 }
 0xa77   :  { %5896 = vmatpush3.msra.mxu0 %v7145_v46  ;;  %5906 = vmatprep.subr.mxu1 %v6391_v0 }
 0xa78   :  { %5898 = vmatmul.mubr.msk.f32.vlgmr.msra.gmra.mxu0 %vm244_vm0, %v3407_v53  ;;  %5911 = vmatprep.subr.mxu0 %v6391_v0 }
 0xa79   :  { %5912 = vmatpush3.msra.mxu0 %v7101_v63  ;;  %5907 = vmatpush3.msra.mxu1 %v7046_v57 }
 0xa7a   :  { %5913 = vmatprep.subr.mxu0 %v6391_v0  ;;  %5908 = vmatprep.mubr.msk.f32.mxu1 %vm6392_vm3, %v6391_v0 }
 0xa7b   :  { %5914 = vmatpush3.msra.mxu0 %v7107_v1  ;;  %5919 = vmatprep.mubr.msk.f32.mxu0 %vm6392_vm3, %v6391_v0 }
 0xa7c   :  { %5915 = vmatprep.subr.mxu0 %v6391_v0  ;;  %5922 = vmatprep.subr.mxu1 %v6391_v0 }
 0xa7d   :  { %5916 = vmatpush3.msra.mxu0 %v7115_v36 }
 0xa7e   :  { %5917 = vmatprep.subr.mxu0 %v6391_v0 }
 0xa7f   :  { %5918 = vmatpush3.msra.mxu0 %v7124_v41 }
 0xa80   :  { %5933 = vmatprep.subr.mxu0 %v6391_v0 }
 0xb30   :  { %v3478_v56 = vpop.f32.mrf.mxu0  ;;  %v3551_v17 = vpop.f32.mrf.mxu1 }
 0xb31   :  { %v3482_v58 = vadd.f32 %v3478_v56, %v3408_v54  ;;  %v3555_v62 = vadd.f32 %v3551_v17, %v3484_v59 }
 0xb32   :  { %v5877_v21 = vpop.f32.mrf.mxu0  ;;  %v5888_v24 = vpop.f32.mrf.mxu1 }
 0xb33   :  { %v3483_v16 = vadd.f32 %v7182_v25, %v3482_v58  ;;  %v3556_v49 = vadd.f32 %v7190_v26, %v3555_v62  ;;  %v3880_v58 = vld [vmem:[#allocation6 + $0x18] sm:$0xff] }
 0xb35   :  { %v5098_v60 = vmul.f32 -1.442695, %v3483_v16  ;;  %v5099_v5 = vmul.f32 -1.442695, %v3556_v49 }
 0xb37   :  { %6189 = vpow2.f32 %v5098_v60 }
 0xb38   :  { %v3623_v47 = vpop.f32.mrf.mxu0  ;;  %6191 = vpow2.f32 %v5099_v5 }
 0xb39   :  { %v3624_v34 = vadd.f32 %v7198_v23, %v3623_v47 }
 0xb3a   :  { %v5899_v50 = vpop.f32.mrf.mxu0 }
 0xb3b   :  { %v3890_v50 = vld [vmem:[#allocation4 + $0x20] sm:$0xff] }
 0xb44   :  { %v6190_v6 = vpop.eup %6189 }
 0xb45   :  { %v3630_v8 = vadd.f32 1.0, %v6190_v6  ;;  %v6192_v9 = vpop.eup %6191 }
 0xb46   :  { %v3636_v11 = vadd.f32 1.0, %v6192_v9 }
 0xb47   :  { %6193 = vrcp.f32 %v3630_v8 }
 0xb48   :  { %6195 = vrcp.f32 %v3636_v11 }
 0xb54   :  { %v6194_v12 = vpop.eup %6193 }
 0xb55   :  { %v3640_v15 = vmul.f32 %v6194_v12, %v3624_v34  ;;  %v6196_v29 = vpop.eup %6195  ;;  %v3966_v12 = vld [vmem:[#allocation5 + $0x20] sm:$0xff] }
 0xb56   :  { %v3643_v30 = vsub.f32 1.0, %v6196_v29  ;;  %v3645_v61 = vmul.f32 %v6196_v29, %v3407_v53 }
 0xb57   :  { %v3641_v28 = vadd.f32 %v3640_v15, %v3639_v27 }
 0xb59   :  { %6197 = vtanh.f32 %v3641_v28 }
 0xb66   :  { %v6198_v32 = vpop.eup %6197 }
 0xb67   :  { %v3644_v33 = vmul.f32 %v6198_v32, %v3643_v30 }
 0xb69   :  { %v3646_v3 = vadd.f32 %v3645_v61, %v3644_v33 }
 0xb6b   :  { %3647 = vst.msk [vmem:[#allocation7] sm:$0xff] %vm244_vm0, %v3646_v3 }
 0xb72   :  { %v3648_v7 = vld [vmem:[#allocation7] sm:$0xff] }
 0xb73   :  { %5909 = vmatmul.mubr.msk.f32.vlgmr.msra.gmra.mxu1 %vm244_vm0, %v3648_v7  ;;  %5920 = vmatmul.mubr.msk.f32.vlgmr.msra.gmra.mxu0 %vm244_vm0, %v3648_v7 }
 0xb74   :  { %5923 = vmatpush3.msra.mxu1 %v7109_v2  ;;  %5930 = vmatprep.mubr.msk.f32.mxu1 %vm6392_vm3, %v6391_v0 }
 0xb75   :  { %5924 = vmatprep.subr.mxu1 %v6391_v0  ;;  %5934 = vmatpush3.msra.mxu0 %v7034_v51 }
 0xb76   :  { %5925 = vmatpush3.msra.mxu1 %v7126_v4  ;;  %5935 = vmatprep.subr.mxu0 %v6391_v0 }
 0xb77   :  { %5926 = vmatprep.subr.mxu1 %v6391_v0  ;;  %5936 = vmatpush3.msra.mxu0 %v7036_v52 }
 0xb78   :  { %5927 = vmatpush3.msra.mxu1 %v7135_v42  ;;  %5937 = vmatprep.subr.mxu0 %v6391_v0 }
 0xb79   :  { %5928 = vmatprep.subr.mxu1 %v6391_v0  ;;  %5938 = vmatpush3.msra.mxu0 %v7040_v55 }
 0xb7a   :  { %5929 = vmatpush3.msra.mxu1 %v7145_v46  ;;  %5939 = vmatprep.subr.mxu0 %v6391_v0 }
 0xb7b   :  { %5931 = vmatmul.mubr.msk.f32.vlgmr.msra.gmra.mxu1 %vm244_vm0, %v3648_v7  ;;  %5944 = vmatprep.subr.mxu1 %v6391_v0 }
 0xb7c   :  { %5945 = vmatpush3.msra.mxu1 %v7101_v63  ;;  %5940 = vmatpush3.msra.mxu0 %v7046_v57 }
 0xb7d   :  { %5946 = vmatprep.subr.mxu1 %v6391_v0  ;;  %5941 = vmatprep.mubr.msk.f32.mxu0 %vm6392_vm3, %v6391_v0 }
 0xb7e   :  { %5947 = vmatpush3.msra.mxu1 %v7107_v1  ;;  %5952 = vmatprep.mubr.msk.f32.mxu1 %vm6392_vm3, %v6391_v0 }
 0xb7f   :  { %5948 = vmatprep.subr.mxu1 %v6391_v0  ;;  %5955 = vmatprep.subr.mxu0 %v6391_v0 }
 0xb80   :  { %5949 = vmatpush3.msra.mxu1 %v7115_v36 }
 0xb81   :  { %5950 = vmatprep.subr.mxu1 %v6391_v0 }
 0xb82   :  { %5951 = vmatpush3.msra.mxu1 %v7124_v41 }
 0xb83   :  { %5966 = vmatprep.subr.mxu1 %v6391_v0 }
 0xc33   :  { %v3719_v10 = vpop.f32.mrf.mxu1  ;;  %v3792_v13 = vpop.f32.mrf.mxu0 }
 0xc34   :  { %v3723_v14 = vadd.f32 %v3719_v10, %v3649_v31  ;;  %v3796_v38 = vadd.f32 %v3792_v13, %v3725_v35 }
 0xc35   :  { %v5910_v18 = vpop.f32.mrf.mxu1  ;;  %v5921_v19 = vpop.f32.mrf.mxu0 }
 0xc36   :  { %v3724_v45 = vadd.f32 %v7182_v25, %v3723_v14  ;;  %v3797_v39 = vadd.f32 %v7190_v26, %v3796_v38  ;;  %v4121_v14 = vld [vmem:[#allocation6 + $0x20] sm:$0xff] }
 0xc38   :  { %v5103_v37 = vmul.f32 -1.442695, %v3724_v45  ;;  %v5104_v22 = vmul.f32 -1.442695, %v3797_v39 }
 0xc3a   :  { %6199 = vpow2.f32 %v5103_v37 }
 0xc3b   :  { %v3864_v20 = vpop.f32.mrf.mxu1  ;;  %6201 = vpow2.f32 %v5104_v22 }
 0xc3c   :  { %v3865_v54 = vadd.f32 %v7198_v23, %v3864_v20 }
 0xc3d   :  { %v5932_v40 = vpop.f32.mrf.mxu1 }
 0xc47   :  { %v6200_v43 = vpop.eup %6199 }
 0xc48   :  { %v3871_v44 = vadd.f32 1.0, %v6200_v43  ;;  %v6202_v48 = vpop.eup %6201 }
 0xc49   :  { %v3877_v53 = vadd.f32 1.0, %v6202_v48 }
 0xc4a   :  { %6203 = vrcp.f32 %v3871_v44  ;;  %v4207_v44 = vld [vmem:[#allocation5 + $0x28] sm:$0xff] }
 0xc4b   :  { %6205 = vrcp.f32 %v3877_v53 }
 0xc57   :  { %v6204_v56 = vpop.eup %6203 }
 0xc58   :  { %v3881_v17 = vmul.f32 %v6204_v56, %v3865_v54  ;;  %v6206_v24 = vpop.eup %6205 }
 0xc59   :  { %v3884_v16 = vsub.f32 1.0, %v6206_v24  ;;  %v3886_v60 = vmul.f32 %v6206_v24, %v3648_v7 }
 0xc5a   :  { %v3882_v21 = vadd.f32 %v3881_v17, %v3880_v58 }
 0xc5c   :  { %6207 = vtanh.f32 %v3882_v21 }
 0xc69   :  { %v6208_v59 = vpop.eup %6207 }
 0xc6a   :  { %v3885_v62 = vmul.f32 %v6208_v59, %v3884_v16 }
 0xc6c   :  { %v3887_v47 = vadd.f32 %v3886_v60, %v3885_v62 }
 0xc6e   :  { %3888 = vst.msk [vmem:[#allocation7] sm:$0xff] %vm244_vm0, %v3887_v47 }
 0xc75   :  { %v3889_v49 = vld [vmem:[#allocation7] sm:$0xff] }
 0xc76   :  { %5942 = vmatmul.mubr.msk.f32.vlgmr.msra.gmra.mxu0 %vm244_vm0, %v3889_v49  ;;  %5953 = vmatmul.mubr.msk.f32.vlgmr.msra.gmra.mxu1 %vm244_vm0, %v3889_v49 }
 0xc77   :  { %5956 = vmatpush3.msra.mxu0 %v7109_v2  ;;  %5963 = vmatprep.mubr.msk.f32.mxu0 %vm6392_vm3, %v6391_v0 }
 0xc78   :  { %5957 = vmatprep.subr.mxu0 %v6391_v0  ;;  %5967 = vmatpush3.msra.mxu1 %v7034_v51 }
 0xc79   :  { %5958 = vmatpush3.msra.mxu0 %v7126_v4  ;;  %5968 = vmatprep.subr.mxu1 %v6391_v0 }
 0xc7a   :  { %5959 = vmatprep.subr.mxu0 %v6391_v0  ;;  %5969 = vmatpush3.msra.mxu1 %v7036_v52 }
 0xc7b   :  { %5960 = vmatpush3.msra.mxu0 %v7135_v42  ;;  %5970 = vmatprep.subr.mxu1 %v6391_v0 }
 0xc7c   :  { %5961 = vmatprep.subr.mxu0 %v6391_v0  ;;  %5971 = vmatpush3.msra.mxu1 %v7040_v55 }
 0xc7d   :  { %5962 = vmatpush3.msra.mxu0 %v7145_v46  ;;  %5972 = vmatprep.subr.mxu1 %v6391_v0 }
 0xc7e   :  { %5964 = vmatmul.mubr.msk.f32.vlgmr.msra.gmra.mxu0 %vm244_vm0, %v3889_v49  ;;  %5977 = vmatprep.subr.mxu0 %v6391_v0 }
 0xc7f   :  { %5978 = vmatpush3.msra.mxu0 %v7101_v63  ;;  %5973 = vmatpush3.msra.mxu1 %v7046_v57 }
 0xc80   :  { %5979 = vmatprep.subr.mxu0 %v6391_v0  ;;  %5974 = vmatprep.mubr.msk.f32.mxu1 %vm6392_vm3, %v6391_v0 }
 0xc81   :  { %5980 = vmatpush3.msra.mxu0 %v7107_v1  ;;  %5985 = vmatprep.mubr.msk.f32.mxu0 %vm6392_vm3, %v6391_v0 }
 0xc82   :  { %5981 = vmatprep.subr.mxu0 %v6391_v0  ;;  %5988 = vmatprep.subr.mxu1 %v6391_v0 }
 0xc83   :  { %5982 = vmatpush3.msra.mxu0 %v7115_v36 }
 0xc84   :  { %5983 = vmatprep.subr.mxu0 %v6391_v0 }
 0xc85   :  { %5984 = vmatpush3.msra.mxu0 %v7124_v41 }
 0xc86   :  { %5999 = vmatprep.subr.mxu0 %v6391_v0 }
 0xd36   :  { %v3960_v5 = vpop.f32.mrf.mxu0  ;;  %v4033_v6 = vpop.f32.mrf.mxu1 }
 0xd37   :  { %v3964_v8 = vadd.f32 %v3960_v5, %v3890_v50  ;;  %v4037_v27 = vadd.f32 %v4033_v6, %v3966_v12 }
 0xd38   :  { %v5943_v9 = vpop.f32.mrf.mxu0  ;;  %v5954_v11 = vpop.f32.mrf.mxu1 }
 0xd39   :  { %v3965_v34 = vadd.f32 %v7182_v25, %v3964_v8  ;;  %v4038_v29 = vadd.f32 %v7190_v26, %v4037_v27  ;;  %v6269_v27 = vld [vmem:[#allocation11 + $0x10] sm:$0xff] }
 0xd3b   :  { %v5108_v15 = vmul.f32 -1.442695, %v3965_v34  ;;  %v5109_v32 = vmul.f32 -1.442695, %v4038_v29 }
 0xd3d   :  { %6209 = vpow2.f32 %v5108_v15  ;;  %v6268_v15 = vld [vmem:[#allocation11 + $0x18] sm:$0xff] }
 0xd3e   :  { %v4105_v28 = vpop.f32.mrf.mxu0  ;;  %6211 = vpow2.f32 %v5109_v32 }
 0xd3f   :  { %v4106_v31 = vadd.f32 %v7198_v23, %v4105_v28 }
 0xd40   :  { %v5965_v30 = vpop.f32.mrf.mxu0 }
 0xd4a   :  { %v6210_v61 = vpop.eup %6209 }
 0xd4b   :  { %v4112_v33 = vadd.f32 1.0, %v6210_v61  ;;  %v6212_v3 = vpop.eup %6211  ;;  %v4448_v61 = vld [vmem:[#allocation5 + $0x30] sm:$0xff] }
 0xd4c   :  { %v4118_v7 = vadd.f32 1.0, %v6212_v3 }
 0xd4d   :  { %6213 = vrcp.f32 %v4112_v33 }
 0xd4e   :  { %6215 = vrcp.f32 %v4118_v7 }
 0xd5a   :  { %v6214_v10 = vpop.eup %6213 }
 0xd5b   :  { %v4122_v13 = vmul.f32 %v6214_v10, %v4106_v31  ;;  %v6216_v19 = vpop.eup %6215 }
 0xd5c   :  { %v4125_v45 = vsub.f32 1.0, %v6216_v19  ;;  %v4127_v37 = vmul.f32 %v6216_v19, %v3889_v49  ;;  %v4362_v49 = vld [vmem:[#allocation6 + $0x28] sm:$0xff] }
 0xd5d   :  { %v4123_v18 = vadd.f32 %v4122_v13, %v4121_v14 }
 0xd5f   :  { %6217 = vtanh.f32 %v4123_v18 }
 0xd6c   :  { %v6218_v35 = vpop.eup %6217 }
 0xd6d   :  { %v4126_v38 = vmul.f32 %v6218_v35, %v4125_v45 }
 0xd6f   :  { %v4128_v20 = vadd.f32 %v4127_v37, %v4126_v38  ;;  %v4603_v37 = vld [vmem:[#allocation6 + $0x30] sm:$0xff] }
 0xd71   :  { %4129 = vst.msk [vmem:[#allocation7] sm:$0xff] %vm244_vm0, %v4128_v20 }
 0xd78   :  { %v4130_v39 = vld [vmem:[#allocation7] sm:$0xff] }
 0xd79   :  { %5975 = vmatmul.mubr.msk.f32.vlgmr.msra.gmra.mxu1 %vm244_vm0, %v4130_v39  ;;  %5986 = vmatmul.mubr.msk.f32.vlgmr.msra.gmra.mxu0 %vm244_vm0, %v4130_v39 }
 0xd7a   :  { %5989 = vmatpush3.msra.mxu1 %v7109_v2  ;;  %5996 = vmatprep.mubr.msk.f32.mxu1 %vm6392_vm3, %v6391_v0 }
 0xd7b   :  { %5990 = vmatprep.subr.mxu1 %v6391_v0  ;;  %6000 = vmatpush3.msra.mxu0 %v7034_v51  ;;  %v4131_v51 = vld [vmem:[#allocation4 + $0x28] sm:$0xff] }
 0xd7c   :  { %5991 = vmatpush3.msra.mxu1 %v7126_v4  ;;  %6001 = vmatprep.subr.mxu0 %v6391_v0 }
 0xd7d   :  { %5992 = vmatprep.subr.mxu1 %v6391_v0  ;;  %6002 = vmatpush3.msra.mxu0 %v7036_v52 }
 0xd7e   :  { %5993 = vmatpush3.msra.mxu1 %v7135_v42  ;;  %6003 = vmatprep.subr.mxu0 %v6391_v0 }
 0xd7f   :  { %5994 = vmatprep.subr.mxu1 %v6391_v0  ;;  %6004 = vmatpush3.msra.mxu0 %v7040_v55 }
 0xd80   :  { %5995 = vmatpush3.msra.mxu1 %v7145_v46  ;;  %6005 = vmatprep.subr.mxu0 %v6391_v0 }
 0xd81   :  { %5997 = vmatmul.mubr.msk.f32.vlgmr.msra.gmra.mxu1 %vm244_vm0, %v4130_v39  ;;  %6010 = vmatprep.subr.mxu1 %v6391_v0 }
 0xd82   :  { %6011 = vmatpush3.msra.mxu1 %v7101_v63  ;;  %6006 = vmatpush3.msra.mxu0 %v7046_v57 }
 0xd83   :  { %6012 = vmatprep.subr.mxu1 %v6391_v0  ;;  %6007 = vmatprep.mubr.msk.f32.mxu0 %vm6392_vm3, %v6391_v0 }
 0xd84   :  { %6013 = vmatpush3.msra.mxu1 %v7107_v1  ;;  %6018 = vmatprep.mubr.msk.f32.mxu1 %vm6392_vm3, %v6391_v0 }
 0xd85   :  { %6014 = vmatprep.subr.mxu1 %v6391_v0  ;;  %6021 = vmatprep.subr.mxu0 %v6391_v0 }
 0xd86   :  { %6015 = vmatpush3.msra.mxu1 %v7115_v36 }
 0xd87   :  { %6016 = vmatprep.subr.mxu1 %v6391_v0 }
 0xd88   :  { %6017 = vmatpush3.msra.mxu1 %v7124_v41 }
 0xd89   :  { %6032 = vmatprep.subr.mxu1 %v6391_v0 }
 0xe39   :  { %v4201_v52 = vpop.f32.mrf.mxu1  ;;  %v4274_v55 = vpop.f32.mrf.mxu0 }
 0xe3a   :  { %v4205_v57 = vadd.f32 %v4201_v52, %v4131_v51  ;;  %v4278_v53 = vadd.f32 %v4274_v55, %v4207_v44  ;;  %v6274_v44 = vld [vmem:[#allocation11 + $0x48] sm:$0xff] }
 0xe3b   :  { %v5976_v40 = vpop.f32.mrf.mxu1  ;;  %v5987_v22 = vpop.f32.mrf.mxu0 }
 0xe3c   :  { %v4206_v43 = vadd.f32 %v7182_v25, %v4205_v57  ;;  %v4279_v56 = vadd.f32 %v7190_v26, %v4278_v53  ;;  %v6272_v22 = vld [vmem:[#allocation11 + $0x58] sm:$0xff]  ;;  %v4856_v53 = vld [vmem:[%s7476_s9 + $0x10] sm:$0xff] }
 0xe3e   :  { %v5113_v48 = vmul.f32 -1.442695, %v4206_v43  ;;  %v5114_v58 = vmul.f32 -1.442695, %v4279_v56  ;;  %v6273_v43 = vld [vmem:[#allocation11 + $0x50] sm:$0xff] }
 0xe3f   :  { %v4613_v56 = vld [vmem:[#allocation4 + $0x38] sm:$0xff] }
 0xe40   :  { %6219 = vpow2.f32 %v5113_v48  ;;  %v4857_v48 = vld [vmem:[%s7476_s9 + $0x18] sm:$0xff] }
 0xe41   :  { %v4346_v54 = vpop.f32.mrf.mxu1  ;;  %6221 = vpow2.f32 %v5114_v58 }
 0xe42   :  { %v4347_v60 = vadd.f32 %v7198_v23, %v4346_v54  ;;  %v4855_v54 = vld [vmem:[%s7476_s9 + $0x8] sm:$0xff] }
 0xe43   :  { %v5998_v17 = vpop.f32.mrf.mxu1 }
 0xe4d   :  { %v6220_v21 = vpop.eup %6219 }
 0xe4e   :  { %v4353_v24 = vadd.f32 1.0, %v6220_v21  ;;  %v6222_v16 = vpop.eup %6221 }
 0xe4f   :  { %v4359_v59 = vadd.f32 1.0, %v6222_v16 }
 0xe50   :  { %6223 = vrcp.f32 %v4353_v24 }
 0xe51   :  { %6225 = vrcp.f32 %v4359_v59 }
 0xe5d   :  { %v6224_v62 = vpop.eup %6223 }
 0xe5e   :  { %v4363_v47 = vmul.f32 %v6224_v62, %v4347_v60  ;;  %v6226_v5 = vpop.eup %6225  ;;  %v4689_v60 = vld [vmem:[#allocation5 + $0x38] sm:$0xff] }
 0xe5f   :  { %v4366_v6 = vsub.f32 1.0, %v6226_v5  ;;  %v4368_v9 = vmul.f32 %v6226_v5, %v4130_v39 }
 0xe60   :  { %v4364_v50 = vadd.f32 %v4363_v47, %v4362_v49 }
 0xe62   :  { %6227 = vtanh.f32 %v4364_v50 }
 0xe6f   :  { %v6228_v8 = vpop.eup %6227 }
 0xe70   :  { %v4367_v11 = vmul.f32 %v6228_v8, %v4366_v6 }
 0xe72   :  { %v4369_v34 = vadd.f32 %v4368_v9, %v4367_v11 }
 0xe74   :  { %4370 = vst.msk [vmem:[#allocation7] sm:$0xff] %vm244_vm0, %v4369_v34 }
 0xe7b   :  { %v7388_v12 = vld [vmem:[#allocation7] sm:$0xff] }
 0xe7c   :  { %6008 = vmatmul.mubr.msk.f32.vlgmr.msra.gmra.mxu0 %vm244_vm0, %v7388_v12  ;;  %6019 = vmatmul.mubr.msk.f32.vlgmr.msra.gmra.mxu1 %vm244_vm0, %v7388_v12 }
 0xe7d   :  { %6022 = vmatpush3.msra.mxu0 %v7109_v2  ;;  %6029 = vmatprep.mubr.msk.f32.mxu0 %vm6392_vm3, %v6391_v0  ;;  %v6270_v2 = vld [vmem:[#allocation11 + $0x8] sm:$0xff] }
 0xe7e   :  { %6023 = vmatprep.subr.mxu0 %v6391_v0  ;;  %6033 = vmatpush3.msra.mxu1 %v6268_v15  ;;  %v4844_v15 = vld [vmem:[#allocation6 + $0x38] sm:$0xff] }
 0xe7f   :  { %6024 = vmatpush3.msra.mxu0 %v7126_v4  ;;  %6034 = vmatprep.subr.mxu1 %v6391_v0  ;;  %v6271_v4 = vld [vmem:[#allocation11] sm:$0xff] }
 0xe80   :  { %6025 = vmatprep.subr.mxu0 %v6391_v0  ;;  %6035 = vmatpush3.msra.mxu1 %v6269_v27 }
 0xe81   :  { %6026 = vmatpush3.msra.mxu0 %v7135_v42  ;;  %6036 = vmatprep.subr.mxu1 %v6391_v0 }
 0xe82   :  { %6027 = vmatprep.subr.mxu0 %v6391_v0  ;;  %6037 = vmatpush3.msra.mxu1 %v6270_v2 }
 0xe83   :  { %6028 = vmatpush3.msra.mxu0 %v7145_v46  ;;  %6038 = vmatprep.subr.mxu1 %v6391_v0 }
 0xe84   :  { %6030 = vmatmul.mubr.msk.f32.vlgmr.msra.gmra.mxu0 %vm244_vm0, %v7388_v12  ;;  %6043 = vmatprep.subr.mxu0 %v6391_v0 }
 0xe85   :  { %6044 = vmatpush3.msra.mxu0 %v7101_v63  ;;  %6039 = vmatpush3.msra.mxu1 %v6271_v4  ;;  %v4372_v63 = vld [vmem:[#allocation4 + $0x30] sm:$0xff] }
 0xe86   :  { %6045 = vmatprep.subr.mxu0 %v6391_v0  ;;  %6040 = vmatprep.mubr.msk.f32.mxu1 %vm6392_vm3, %v6391_v0 }
 0xe87   :  { %6046 = vmatpush3.msra.mxu0 %v7107_v1  ;;  %6051 = vmatprep.mubr.msk.f32.mxu0 %vm6392_vm3, %v6391_v0 }
 0xe88   :  { %6047 = vmatprep.subr.mxu0 %v6391_v0  ;;  %6054 = vmatprep.subr.mxu1 %v6391_v0 }
 0xe89   :  { %6048 = vmatpush3.msra.mxu0 %v7115_v36 }
 0xe8a   :  { %6049 = vmatprep.subr.mxu0 %v6391_v0 }
 0xe8b   :  { %6050 = vmatpush3.msra.mxu0 %v7124_v41 }
 0xe8c   :  { %6065 = vmatprep.subr.mxu0 %v6391_v0 }
 0xf3c   :  { %v4442_v42 = vpop.f32.mrf.mxu0  ;;  %v4515_v28 = vpop.f32.mrf.mxu1 }
 0xf3d   :  { %v4446_v29 = vadd.f32 %v4442_v42, %v4372_v63  ;;  %v4519_v3 = vadd.f32 %v4515_v28, %v4448_v61 }
 0xf3e   :  { %v6009_v1 = vpop.f32.mrf.mxu0  ;;  %v6020_v30 = vpop.f32.mrf.mxu1 }
 0xf3f   :  { %v4447_v32 = vadd.f32 %v7182_v25, %v4446_v29  ;;  %v4520_v36 = vadd.f32 %v7190_v26, %v4519_v3 }
 0xf41   :  { %v5118_v33 = vmul.f32 -1.442695, %v4447_v32  ;;  %v5119_v10 = vmul.f32 -1.442695, %v4520_v36 }
 0xf43   :  { %6229 = vpow2.f32 %v5118_v33 }
 0xf44   :  { %v4587_v7 = vpop.f32.mrf.mxu0  ;;  %6231 = vpow2.f32 %v5119_v10 }
 0xf45   :  { %v4588_v19 = vadd.f32 %v7198_v23, %v4587_v7 }
 0xf46   :  { %v6031_v31 = vpop.f32.mrf.mxu0 }
 0xf50   :  { %v6230_v41 = vpop.eup %6229 }
 0xf51   :  { %v4594_v13 = vadd.f32 1.0, %v6230_v41  ;;  %v6232_v14 = vpop.eup %6231 }
 0xf52   :  { %v4600_v18 = vadd.f32 1.0, %v6232_v14 }
 0xf53   :  { %6233 = vrcp.f32 %v4594_v13 }
 0xf54   :  { %6235 = vrcp.f32 %v4600_v18 }
 0xf60   :  { %v6234_v45 = vpop.eup %6233 }
 0xf61   :  { %v4604_v35 = vmul.f32 %v6234_v45, %v4588_v19  ;;  %v6236_v20 = vpop.eup %6235 }
 0xf62   :  { %v4607_v39 = vsub.f32 1.0, %v6236_v20  ;;  %v4609_v52 = vmul.f32 %v6236_v20, %v7388_v12 }
 0xf63   :  { %v4605_v38 = vadd.f32 %v4604_v35, %v4603_v37 }
 0xf65   :  { %6237 = vtanh.f32 %v4605_v38 }
 0xf72   :  { %v6238_v51 = vpop.eup %6237 }
 0xf73   :  { %v4608_v55 = vmul.f32 %v6238_v51, %v4607_v39 }
 0xf75   :  { %v4610_v57 = vadd.f32 %v4609_v52, %v4608_v55 }
 0xf77   :  { %4611 = vst.msk [vmem:[#allocation7] sm:$0xff] %vm244_vm0, %v4610_v57 }
 0xf7e   :  { %v4612_v40 = vld [vmem:[#allocation7] sm:$0xff] }
 0xf7f   :  { %6041 = vmatmul.mubr.msk.f32.vlgmr.msra.gmra.mxu1 %vm244_vm0, %v4612_v40  ;;  %6052 = vmatmul.mubr.msk.f32.vlgmr.msra.gmra.mxu0 %vm244_vm0, %v4612_v40 }
 0xf80   :  { %6055 = vmatpush3.msra.mxu1 %v6272_v22  ;;  %6062 = vmatprep.mubr.msk.f32.mxu1 %vm6392_vm3, %v6391_v0 }
 0xf81   :  { %6056 = vmatprep.subr.mxu1 %v6391_v0  ;;  %6073 = vmatprep.mubr.msk.f32.mxu0 %vm6392_vm3, %v6391_v0 }
 0xf82   :  { %6057 = vmatpush3.msra.mxu1 %v6273_v43  ;;  %6066 = vmatpush3.msra.mxu0 %v4857_v48 }
 0xf83   :  { %6058 = vmatprep.subr.mxu1 %v6391_v0  ;;  %6067 = vmatprep.subr.mxu0 %v6391_v0 }
 0xf84   :  { %6059 = vmatpush3.msra.mxu1 %v6274_v44  ;;  %6068 = vmatpush3.msra.mxu0 %v4856_v53 }
 0xf85   :  { %6060 = vmatprep.subr.mxu1 %v6391_v0  ;;  %6069 = vmatprep.subr.mxu0 %v6391_v0 }
 0xf86   :  { %6061 = vmatpush3.msra.mxu1 %v7145_v46  ;;  %v4854_v46 = vld [vmem:[%s7476_s9] sm:$0xff]  ;;  %6070 = vmatpush3.msra.mxu0 %v4855_v54 }
 0xf87   :  { %6063 = vmatmul.mubr.msk.f32.vlgmr.msra.gmra.mxu1 %vm244_vm0, %v4612_v40  ;;  %6071 = vmatprep.subr.mxu0 %v6391_v0 }
 0xf88   :  { %6072 = vmatpush3.msra.mxu0 %v4854_v46 }
0x103f   :  { %v4683_v17 = vpop.f32.mrf.mxu1  ;;  %v4756_v58 = vpop.f32.mrf.mxu0 }
0x1040   :  { %v4687_v21 = vadd.f32 %v4683_v17, %v4613_v56  ;;  %v4760_v47 = vadd.f32 %v4756_v58, %v4689_v60 }
0x1041   :  { %v6042_v24 = vpop.f32.mrf.mxu1  ;;  %v6053_v16 = vpop.f32.mrf.mxu0 }
0x1042   :  { %v4688_v59 = vadd.f32 %v7182_v25, %v4687_v21  ;;  %v4761_v50 = vadd.f32 %v7190_v26, %v4760_v47 }
0x1044   :  { %v5123_v62 = vmul.f32 -1.442695, %v4688_v59  ;;  %v5124_v6 = vmul.f32 -1.442695, %v4761_v50 }
0x1046   :  { %6239 = vpow2.f32 %v5123_v62 }
0x1047   :  { %v4828_v49 = vpop.f32.mrf.mxu1  ;;  %6241 = vpow2.f32 %v5124_v6 }
0x1048   :  { %v4829_v34 = vadd.f32 %v7198_v23, %v4828_v49  ;;  %v5125_v23 = vld [vmem:[%s7477_s10] ss:$0 sm:$0xff]  ;;  %s6355_s10 = scalar_lea.vmem %s4958_s5, 128 }
0x1049   :  { %v6064_v5 = vpop.f32.mrf.mxu1  ;;  %p6356_p6 = scmp.ne.s32.totalorder %s4958_s5, %s6355_s10  ;;  %p6361_p8 = scmp.lt.s32.totalorder %s6355_s10, %s6355_s10 }
0x104b   :  { %p6362_p9 = por %p6361_p8, %p6360_p7 }
0x104d   :  { %p6363_p10 = pnand %p6362_p9, %p6356_p6 }
0x1053   :  { %v6240_v0 = vpop.eup %6239 }
0x1054   :  { %v4835_v8 = vadd.f32 1.0, %v6240_v0  ;;  %v6242_v9 = vpop.eup %6241 }
0x1055   :  { %v4841_v11 = vadd.f32 1.0, %v6242_v9 }
0x1056   :  { %6243 = vrcp.f32 %v4835_v8 }
0x1057   :  { %6245 = vrcp.f32 %v4841_v11 }
0x1063   :  { %v6244_v12 = vpop.eup %6243 }
0x1064   :  { %v4845_v25 = vmul.f32 %v6244_v12, %v4829_v34  ;;  %v6246_v2 = vpop.eup %6245 }
0x1065   :  { %v4848_v4 = vsub.f32 1.0, %v6246_v2  ;;  %v4850_v26 = vmul.f32 %v6246_v2, %v4612_v40 }
0x1066   :  { %v4846_v27 = vadd.f32 %v4845_v25, %v4844_v15 }
0x1068   :  { %6247 = vtanh.f32 %v4846_v27 }
0x1075   :  { %v6248_v63 = vpop.eup %6247 }
0x1076   :  { %v4849_v42 = vmul.f32 %v6248_v63, %v4848_v4 }
0x1078   :  { %v4851_v28 = vadd.f32 %v4850_v26, %v4849_v42 }
0x107a   :  { %4852 = vst.msk [vmem:[#allocation7] sm:$0xff] %vm244_vm0, %v4851_v28 }
0x1081   :  { %v4853_v29 = vld [vmem:[#allocation7] sm:$0xff] }
0x1082   :  { %6074 = vmatmul.mubr.msk.f32.vlgmr.msra.gmra.mxu0 %vm244_vm0, %v4853_v29 }
0x1142   :  { %v4934_v1 = vpop.f32.mrf.mxu0 }
0x1143   :  { %v4935_v30 = vadd.f32 %v5125_v23, %v4934_v1 }
0x1144   :  { %v6075_v32 = vpop.f32.mrf.mxu0 }
0x1145   :  { %v4939_v61 = vsel %vm4938_vm4, %v4935_v30, -inf }
0x1146   :  { %4940 = vmax.xlane.f32.xlu0 %v4939_v61 }
0x11cf   :  { %v4941_v33 = vpop.xlane.xlu0 %4940 }
0x11d0   :  { %v4942_v3 = vsub.f32 %v4935_v30, %v4941_v33 }
0x11d2   :  { %v4943_v7 = vmul.f32 1.442695, %v4942_v3 }
0x11d4   :  { %6249 = vpow2.f32 %v4943_v7 }
0x11e1   :  { %v6250_v36 = vpop.eup %6249 }
0x11e2   :  { %v4945_v31 = vsel %vm4938_vm4, %v6250_v36, 0.0 }
0x11e3   :  { %4946 = vadd.xlane.f32.xlu0 %v4945_v31 }
0x126c   :  { %v4947_v10 = vpop.xlane.xlu0 %4946 }
0x126d   :  { %6251 = vrcp.f32 %v4947_v10 }
0x127a   :  { %v6252_v41 = vpop.eup %6251 }
0x127b   :  { %v4949_v13 = vmul.f32 %v6252_v41, %v6250_v36 }
0x127d   :  { %4950 = vst.msk [vmem:[#allocation16] sm:$0xff] %vm4938_vm4, %v4949_v13 }
0x127e   :  { %6366 = shalt.err (!%p6363_p10)
}
0x127f   :  { %4960 = dma.vmem_to_hbm [thread:$0]  %s4958_s5, 128, %s7478_s11, [#allocation10]  }
0x1280   :  { %6381 = dma.done.wait [#allocation10], 128  }
0x1281   :  { %6382 = vsyncadd [#allocation10], 4294967168 }
0x1282   :  { %4964 = vsyncpa [#allocation9], 1 }
0x1283   :  { %4965 = vsyncpa [#allocation12], 1 }
0x1284   :  { %4966 = vsyncpa [#allocation15], 1 }
0x1285   :  { %4967 = vsyncpa [#allocation10], 1 }

</bundles_post_ra>
